<compile_context>
chip_gen: v6e
topology: v6e:2x2x1
jax: 0.10.0
libtpu: 0.0.40
codegen_flags: <defaults>
</compile_context>

<pallas_src>
import functools
import math

import numpy as np
import jax
import jax.numpy as jnp
from jax import lax
from jax.experimental import pallas as pl
from jax.experimental.pallas import tpu as pltpu

LN_EPS = 1e-6
RMS_EPS = 1e-6

# Tile targets (clamped to the full dim for small shapes).
_TL = 512       # rows (sublane) per tile
_TN = 1024      # output columns (lane) per tile
_TK = 512       # contraction tile
_TQ = 256       # query rows per flash tile
_TKV = 512      # kv rows per flash tile

# Scoped-VMEM cap: 48 MiB leaves headroom on v7x's 64 MiB physical VMEM; on v5e/v6e
# (128 MiB) this could be raised further to allow even larger row tiles.
_VMEM_LIMIT = 48 * 1024 * 1024


def _cparams(dims):
    return pltpu.CompilerParams(dimension_semantics=dims,
                                vmem_limit_bytes=_VMEM_LIMIT)


def _pick_tile(dim, target, align):
    """Largest multiple of `align` dividing `dim` and <= target, else the full dim.
    # TODO(synk): pad ragged production shapes to tile multiples at the wrapper level
    # instead of silently falling back to a full-dim block (VMEM blow-up risk)."""
    if dim <= target:
        return dim
    t = (target // align) * align
    while t >= align:
        if dim % t == 0:
            return t
        t -= align
    return dim


def _gelu_tanh(x):
    # matches torch.nn.GELU(approximate='tanh')
    return 0.5 * x * (1.0 + jnp.tanh(0.7978845608028654 * (x + 0.044715 * x * x * x)))


# ----------------------------------------------------------------------------
# Kernel 1: fused LayerNorm (no affine) + modulation + matmul (+ bias, opt GELU)
# ----------------------------------------------------------------------------

def _ln_mod_mm_kernel(x_ref, shift_ref, scale_ref, w_ref, b_ref, o_ref, *, eps, act):
    x = x_ref[0]                                         # (tl, C) f32
    mu = jnp.mean(x, axis=-1, keepdims=True)
    xc = x - mu
    var = jnp.mean(xc * xc, axis=-1, keepdims=True)
    xn = xc * lax.rsqrt(var + eps)
    h = xn * (1.0 + scale_ref[0]) + shift_ref[0]         # modulation
    r = jnp.dot(h.astype(jnp.bfloat16), w_ref[...],
                preferred_element_type=jnp.float32) + b_ref[...]
    if act == "gelu":
        r = _gelu_tanh(r)
    o_ref[0] = r.astype(o_ref.dtype)


def ln_mod_matmul(x, shift, scale, w, bias, *, activation=None):
    """out(bf16) = act((LayerNorm(x) * (1 + scale) + shift) @ w + bias)."""
    B, L, C = x.shape
    N = w.shape[1]
    tl = _pick_tile(L, _TL, 8)
    tn = _pick_tile(N, _TN, 128)
    grid = (B, L // tl, N // tn)
    return pl.pallas_call(
        functools.partial(_ln_mod_mm_kernel, eps=LN_EPS, act=activation),
        out_shape=jax.ShapeDtypeStruct((B, L, N), jnp.bfloat16),
        grid=grid,
        in_specs=[
            pl.BlockSpec((1, tl, C), lambda b, i, n: (b, i, 0)),
            pl.BlockSpec((1, 1, C), lambda b, i, n: (b, 0, 0)),
            pl.BlockSpec((1, 1, C), lambda b, i, n: (b, 0, 0)),
            pl.BlockSpec((C, tn), lambda b, i, n: (0, n)),
            pl.BlockSpec((1, tn), lambda b, i, n: (0, n)),
        ],
        out_specs=pl.BlockSpec((1, tl, tn), lambda b, i, n: (b, i, n)),
        compiler_params=_cparams(("parallel", "parallel", "parallel")),
        cost_estimate=pl.CostEstimate(
            flops=2 * B * L * C * N, transcendentals=0,
            bytes_accessed=4 * B * L * C + 2 * B * L * N + 2 * C * N),
    )(x, shift, scale, w, bias)


# ----------------------------------------------------------------------------
# Kernel 2: K-tiled matmul + bias (bf16 out, f32 VMEM accumulator)
# ----------------------------------------------------------------------------

def _mm_bias_kernel(x_ref, w_ref, b_ref, o_ref, acc_ref, *, act):
    k = pl.program_id(3)

    @pl.when(k == 0)
    def _():
        acc_ref[...] = jnp.zeros_like(acc_ref)

    acc_ref[...] += jnp.dot(x_ref[0].astype(jnp.bfloat16), w_ref[...],
                            preferred_element_type=jnp.float32)

    @pl.when(k == pl.num_programs(3) - 1)
    def _():
        r = acc_ref[...] + b_ref[...]
        if act == "gelu":
            r = _gelu_tanh(r)
        o_ref[0] = r.astype(o_ref.dtype)


def matmul_bias(x, w, bias, *, activation=None):
    B, M, K = x.shape
    N = w.shape[1]
    tl = _pick_tile(M, _TL, 8)
    tn = _pick_tile(N, _TN, 128)
    tk = _pick_tile(K, _TK, 128)
    grid = (B, M // tl, N // tn, K // tk)
    return pl.pallas_call(
        functools.partial(_mm_bias_kernel, act=activation),
        out_shape=jax.ShapeDtypeStruct((B, M, N), jnp.bfloat16),
        grid=grid,
        in_specs=[
            pl.BlockSpec((1, tl, tk), lambda b, i, n, k: (b, i, k)),
            pl.BlockSpec((tk, tn), lambda b, i, n, k: (k, n)),
            pl.BlockSpec((1, tn), lambda b, i, n, k: (0, n)),
        ],
        out_specs=pl.BlockSpec((1, tl, tn), lambda b, i, n, k: (b, i, n)),
        scratch_shapes=[pltpu.VMEM((tl, tn), jnp.float32)],
        compiler_params=_cparams(("parallel", "parallel", "parallel", "arbitrary")),
        cost_estimate=pl.CostEstimate(
            flops=2 * B * M * N * K, transcendentals=0,
            bytes_accessed=4 * B * M * K + 2 * B * M * N + 2 * K * N),
    )(x, w, bias)


# ----------------------------------------------------------------------------
# Kernel 3: K-tiled matmul accumulating into the resident output block with a
#           fused epilogue  out = res + (x @ w + bias) [* gate]   (f32 out)
# ----------------------------------------------------------------------------

def _mm_res_kernel(*refs, gated):
    if gated:
        x_ref, w_ref, b_ref, res_ref, gate_ref, o_ref = refs
    else:
        x_ref, w_ref, b_ref, res_ref, o_ref = refs
        gate_ref = None
    k = pl.program_id(3)
    part = jnp.dot(x_ref[0].astype(jnp.bfloat16), w_ref[...],
                   preferred_element_type=jnp.float32)

    @pl.when(k == 0)
    def _():
        o_ref[0] = part

    @pl.when(k > 0)
    def _():
        o_ref[0] += part

    @pl.when(k == pl.num_programs(3) - 1)
    def _():
        y = o_ref[0] + b_ref[...]
        if gated:
            y = y * gate_ref[0]
        o_ref[0] = res_ref[0] + y


def matmul_residual(x, w, bias, res, gate=None):
    """out = res + (x @ w + bias) [* gate] ; gate (optional) is [B, 1, N]."""
    B, M, K = x.shape
    N = w.shape[1]
    tl = _pick_tile(M, _TL, 8)
    tn = _pick_tile(N, _TN, 128)
    tk = _pick_tile(K, _TK, 128)
    grid = (B, M // tl, N // tn, K // tk)
    gated = gate is not None
    in_specs = [
        pl.BlockSpec((1, tl, tk), lambda b, i, n, k: (b, i, k)),
        pl.BlockSpec((tk, tn), lambda b, i, n, k: (k, n)),
        pl.BlockSpec((1, tn), lambda b, i, n, k: (0, n)),
        pl.BlockSpec((1, tl, tn), lambda b, i, n, k: (b, i, n)),
    ]
    args = [x, w, bias, res]
    if gated:
        in_specs.append(pl.BlockSpec((1, 1, tn), lambda b, i, n, k: (b, 0, n)))
        args.append(gate)
    return pl.pallas_call(
        functools.partial(_mm_res_kernel, gated=gated),
        out_shape=jax.ShapeDtypeStruct((B, M, N), jnp.float32),
        grid=grid,
        in_specs=in_specs,
        out_specs=pl.BlockSpec((1, tl, tn), lambda b, i, n, k: (b, i, n)),
        compiler_params=_cparams(("parallel", "parallel", "parallel", "arbitrary")),
        cost_estimate=pl.CostEstimate(
            flops=2 * B * M * N * K, transcendentals=0,
            bytes_accessed=2 * B * M * K + 10 * B * M * N + 2 * K * N),
    )(*args)


# ----------------------------------------------------------------------------
# Kernel 4/5: fused RMSNorm (+ lane-dense in-kernel RoPE via pltpu.roll).
# Reads its input slab directly out of the fused qkv / kv projection buffer.
# ----------------------------------------------------------------------------

def _rms_rope_kernel(x_ref, w_ref, cos_ref, sin_ref, o_ref, *, eps, n_rep):
    x = x_ref[0].astype(jnp.float32)                                  # (tl, C)
    xn = x * lax.rsqrt(jnp.mean(x * x, axis=-1, keepdims=True) + eps) * w_ref[...]
    C = xn.shape[-1]
    cos = cos_ref[0]
    sin = sin_ref[0]
    if n_rep > 1:                                       # replicate per-head table -> C lanes
        cos = jnp.concatenate([cos] * n_rep, axis=-1)
        sin = jnp.concatenate([sin] * n_rep, axis=-1)
    lane = lax.broadcasted_iota(jnp.int32, xn.shape, 1)
    # pairwise partner: even lanes take lane j+1, odd lanes take lane j-1 (XLU rotates)
    swapped = jnp.where(lane % 2 == 0,
                        pltpu.roll(xn, shift=C - 1, axis=1),          # -> x[j+1]
                        pltpu.roll(xn, shift=1, axis=1))              # -> x[j-1]
    # cos holds cos repeated per pair; sin holds (-sin, +sin) interleaved
    o_ref[0] = (xn * cos + swapped * sin).astype(o_ref.dtype)


def _rms_kernel(x_ref, w_ref, o_ref, *, eps):
    x = x_ref[0].astype(jnp.float32)
    o_ref[0] = (x * lax.rsqrt(jnp.mean(x * x, axis=-1, keepdims=True) + eps)
                * w_ref[...]).astype(o_ref.dtype)


def rms_rope(x, w, cos, sin, *, chan_blocks=1, chan_idx=0):
    """RMSNorm of channel block `chan_idx` (width Ctot/chan_blocks) of x, * w, then RoPE.
    cos/sin are per-head-dim [B, L, D] tables replicated across heads in-kernel."""
    B, L, Ctot = x.shape
    C = Ctot // chan_blocks
    D = cos.shape[-1]
    tl = _pick_tile(L, _TL, 8)
    return pl.pallas_call(
        functools.partial(_rms_rope_kernel, eps=RMS_EPS, n_rep=C // D),
        out_shape=jax.ShapeDtypeStruct((B, L, C), jnp.bfloat16),
        grid=(B, L // tl),
        in_specs=[
            pl.BlockSpec((1, tl, C), lambda b, i: (b, i, chan_idx)),
            pl.BlockSpec((1, C), lambda b, i: (0, 0)),
            pl.BlockSpec((1, tl, D), lambda b, i: (b, i, 0)),
            pl.BlockSpec((1, tl, D), lambda b, i: (b, i, 0)),
        ],
        out_specs=pl.BlockSpec((1, tl, C), lambda b, i: (b, i, 0)),
        compiler_params=_cparams(("parallel", "parallel")),
    )(x, w, cos, sin)


def rms_norm(x, w, *, chan_blocks=1, chan_idx=0):
    B, L, Ctot = x.shape
    C = Ctot // chan_blocks
    tl = _pick_tile(L, _TL, 8)
    return pl.pallas_call(
        functools.partial(_rms_kernel, eps=RMS_EPS),
        out_shape=jax.ShapeDtypeStruct((B, L, C), jnp.bfloat16),
        grid=(B, L // tl),
        in_specs=[
            pl.BlockSpec((1, tl, C), lambda b, i: (b, i, chan_idx)),
            pl.BlockSpec((1, C), lambda b, i: (0, 0)),
        ],
        out_specs=pl.BlockSpec((1, tl, C), lambda b, i: (b, i, 0)),
        compiler_params=_cparams(("parallel", "parallel")),
    )(x, w)


# ----------------------------------------------------------------------------
# Kernel 6: flash attention (online softmax, KV grid axis, k_lens scalar prefetch,
#           head-indexed channel blocks over [B, L, C]-layout inputs/outputs)
# ----------------------------------------------------------------------------

def _flash_kernel(klens_ref, q_ref, k_ref, v_ref, o_ref, m_ref, l_ref, acc_ref):
    b = pl.program_id(0)
    j = pl.program_id(3)
    tkv = k_ref.shape[1]
    klen = klens_ref[b]

    @pl.when(j == 0)
    def _():
        m_ref[...] = jnp.full_like(m_ref, -jnp.inf)
        l_ref[...] = jnp.zeros_like(l_ref)
        acc_ref[...] = jnp.zeros_like(acc_ref)

    # Skip KV tiles that are entirely masked (beyond klen): no MXU/EUP/VPU work spent on
    # padded self-attn batches or short cross-attn contexts.
    @pl.when(j * tkv < klen)
    def _():
        q = q_ref[0].astype(jnp.bfloat16)                 # (tq, D), pre-scaled by 1/sqrt(D)
        kk = k_ref[0].astype(jnp.bfloat16)                # (tkv, D)
        s = lax.dot_general(q, kk, (((1,), (1,)), ((), ())),
                            preferred_element_type=jnp.float32)
        col = j * tkv + lax.broadcasted_iota(jnp.int32, s.shape, 1)
        s = jnp.where(col < klen, s, -1e30)
        m_prev = m_ref[...]
        m_new = jnp.maximum(m_prev, jnp.max(s, axis=-1, keepdims=True))
        alpha = jnp.exp(m_prev - m_new)
        p = jnp.exp(s - m_new)
        l_ref[...] = alpha * l_ref[...] + jnp.sum(p, axis=-1, keepdims=True)
        acc_ref[...] = alpha * acc_ref[...] + jnp.dot(
            p.astype(jnp.bfloat16), v_ref[0].astype(jnp.bfloat16),
            preferred_element_type=jnp.float32)
        m_ref[...] = m_new

    @pl.when(j == pl.num_programs(3) - 1)
    def _():
        l = l_ref[...]
        denom = jnp.where(l > 0.0, l, 1.0)                # fully-masked rows -> zeros
        o_ref[0] = (acc_ref[...] * pl.reciprocal(denom, approx=True)).astype(o_ref.dtype)


def flash_attention(q, k, v, k_lens, *, num_heads, head_dim, v_head_offset=0):
    """q/k: [B, L*, num_heads*head_dim]; v: [B, Lk, *] whose head channels start at block
    index `v_head_offset` (in units of head_dim) -> v may be the fused qkv / kv buffer.
    q must already carry the 1/sqrt(head_dim) softmax scale (folded into its RMS weight)."""
    B, Lq, _ = q.shape
    Lk = k.shape[1]
    D, N = head_dim, num_heads
    tq = _pick_tile(Lq, _TQ, 8)
    tkv = _pick_tile(Lk, _TKV, 8)
    grid = (B, N, Lq // tq, Lk // tkv)
    q_spec = pl.BlockSpec((1, tq, D), lambda b, h, i, j, kl: (b, i, h))
    k_spec = pl.BlockSpec((1, tkv, D), lambda b, h, i, j, kl: (b, j, h))
    v_spec = pl.BlockSpec((1, tkv, D), lambda b, h, i, j, kl: (b, j, v_head_offset + h))
    o_spec = pl.BlockSpec((1, tq, D), lambda b, h, i, j, kl: (b, i, h))
    return pl.pallas_call(
        _flash_kernel,
        out_shape=jax.ShapeDtypeStruct((B, Lq, N * D), jnp.bfloat16),
        grid_spec=pltpu.PrefetchScalarGridSpec(
            num_scalar_prefetch=1,
            grid=grid,
            in_specs=[q_spec, k_spec, v_spec],
            out_specs=o_spec,
            scratch_shapes=[pltpu.VMEM((tq, 1), jnp.float32),
                            pltpu.VMEM((tq, 1), jnp.float32),
                            pltpu.VMEM((tq, D), jnp.float32)],
        ),
        compiler_params=_cparams(("parallel", "parallel", "parallel", "arbitrary")),
    )(k_lens.astype(jnp.int32), q, k, v)


# --------------------------- module composition ----------------------------

def wan_attention_block(params, x, e, seq_lens, rope_cos_d, rope_sin_d,
                        context, context_lens, num_heads):
    B, L, C = x.shape
    D = C // num_heads
    q_scale = 1.0 / math.sqrt(D)

    e_mod = params["modulation"] + e                        # [B, 6, C] f32 (glue)
    e0, e1, e2, e3, e4, e5 = [e_mod[:, i:i + 1, :] for i in range(6)]

    # ---- self attention: LN + modulation fused into the fused QKV projection ----
    sp = params["self_attn"]
    qkv = ln_mod_matmul(x, e0, e1, sp["w_qkv"], sp["b_qkv"])            # [B, L, 3C] bf16
    q = rms_rope(qkv, sp["norm_q"] * q_scale, rope_cos_d, rope_sin_d,
                 chan_blocks=3, chan_idx=0)                             # pre-scaled q
    k = rms_rope(qkv, sp["norm_k"], rope_cos_d, rope_sin_d,
                 chan_blocks=3, chan_idx=1)
    o = flash_attention(q, k, qkv, seq_lens, num_heads=num_heads, head_dim=D,
                        v_head_offset=2 * num_heads)                    # v read from qkv
    x = matmul_residual(o, sp["wo"], sp["bo"], x, gate=e2)              # x + (o@wo+bo)*e2

    # ---- cross attention (t2v; norm3 == Identity since cross_attn_norm=False) ----
    cp = params["cross_attn"]
    qc = matmul_bias(x, cp["wq"], cp["bq"])                             # [B, L, C] bf16
    kv = matmul_bias(context, cp["w_kv"], cp["b_kv"])                   # [B, L2, 2C] bf16
    qc = rms_norm(qc, cp["norm_q"] * q_scale)
    kc = rms_norm(kv, cp["norm_k"], chan_blocks=2, chan_idx=0)
    o = flash_attention(qc, kc, kv, context_lens, num_heads=num_heads, head_dim=D,
                        v_head_offset=num_heads)                        # v read from kv
    x = matmul_residual(o, cp["wo"], cp["bo"], x, gate=None)            # ungated residual

    # ---- FFN: LN+mod+GELU fused into FFN1, bias + gated residual fused into FFN2 ----
    h = ln_mod_matmul(x, e3, e4, params["ffn_w1"], params["ffn_b1"], activation="gelu")
    x = matmul_residual(h, params["ffn_w2"], params["ffn_b2"], x, gate=e5)
    return x


# ------------------------------ pure-JAX reference -------------------------

def _bf16_dot(a, w):
    return jnp.dot(a.astype(jnp.bfloat16), w.astype(jnp.bfloat16),
                   preferred_element_type=jnp.float32)


def ref_forward(params, x, e, seq_lens, rope_cos, rope_sin, context, context_lens,
                num_heads):
    B, L, C = x.shape
    n, d = num_heads, C // num_heads

    def bf(t):      # mirrors the kernels' bf16 inter-kernel storage
        return t.astype(jnp.bfloat16).astype(jnp.float32)

    def ln(t):
        mu = jnp.mean(t, -1, keepdims=True)
        var = jnp.mean((t - mu) ** 2, -1, keepdims=True)
        return (t - mu) * lax.rsqrt(var + LN_EPS)

    def rms(t, w):
        return t * lax.rsqrt(jnp.mean(t * t, -1, keepdims=True) + RMS_EPS) * w

    def rope(t, cos, sin):
        Bx, Lx, Nx, Dx = t.shape
        tp = t.reshape(Bx, Lx, Nx, Dx // 2, 2)
        te, to = tp[..., 0], tp[..., 1]
        c, s = cos[:, :, None, :], sin[:, :, None, :]
        return jnp.stack([te * c - to * s, te * s + to * c], -1).reshape(Bx, Lx, Nx, Dx)

    def attn(q, k, v, klens):
        Dx = q.shape[-1]
        s = jnp.einsum("blnd,bmnd->bnlm", q.astype(jnp.bfloat16), k.astype(jnp.bfloat16),
                       preferred_element_type=jnp.float32) / math.sqrt(Dx)
        mask = jnp.arange(k.shape[1])[None, None, None, :] < klens[:, None, None, None]
        s = jnp.where(mask, s, -1e30)
        p = jax.nn.softmax(s, axis=-1)
        return jnp.einsum("bnlm,bmnd->blnd", p.astype(jnp.bfloat16),
                          v.astype(jnp.bfloat16), preferred_element_type=jnp.float32)

    def mm(a, w, b):
        return _bf16_dot(a, w) + b

    e_mod = params["modulation"] + e
    es = [e_mod[:, i:i + 1, :] for i in range(6)]

    sp = params["self_attn"]
    wq, wk, wv = jnp.split(sp["w_qkv"], 3, axis=1)
    bq, bk, bv = jnp.split(sp["b_qkv"], 3, axis=1)
    h = ln(x) * (1 + es[1]) + es[0]
    q = bf(rope(rms(bf(mm(h, wq, bq)), sp["norm_q"]).reshape(B, L, n, d),
                rope_cos, rope_sin))
    k = bf(rope(rms(bf(mm(h, wk, bk)), sp["norm_k"]).reshape(B, L, n, d),
                rope_cos, rope_sin))
    v = bf(mm(h, wv, bv)).reshape(B, L, n, d)
    o = bf(attn(q, k, v, seq_lens).reshape(B, L, C))
    x = x + mm(o, sp["wo"], sp["bo"]) * es[2]

    cp = params["cross_attn"]
    L2 = context.shape[1]
    wk2, wv2 = jnp.split(cp["w_kv"], 2, axis=1)
    bk2, bv2 = jnp.split(cp["b_kv"], 2, axis=1)
    q = bf(rms(bf(mm(x, cp["wq"], cp["bq"])), cp["norm_q"])).reshape(B, L, n, d)
    k = bf(rms(bf(mm(context, wk2, bk2)), cp["norm_k"])).reshape(B, L2, n, d)
    v = bf(mm(context, wv2, bv2)).reshape(B, L2, n, d)
    o = bf(attn(q, k, v, context_lens).reshape(B, L, C))
    x = x + mm(o, cp["wo"], cp["bo"])

    h2 = ln(x) * (1 + es[4]) + es[3]
    hh = bf(_gelu_tanh(mm(h2, params["ffn_w1"], params["ffn_b1"])))
    y2 = mm(hh, params["ffn_w2"], params["ffn_b2"])
    return x + y2 * es[5]


# ------------------------------ parameter init ------------------------------

def _init_linear(kw, kb, din, dout):
    bound = 1.0 / math.sqrt(din)
    w = jax.random.uniform(kw, (din, dout), jnp.float32, -bound, bound).astype(jnp.bfloat16)
    b = jax.random.uniform(kb, (1, dout), jnp.float32, -bound, bound)
    return w, b


def init_self_attn(key, dim):
    ks = jax.random.split(key, 10)
    wq, bq = _init_linear(ks[0], ks[1], dim, dim)
    wk, bk = _init_linear(ks[2], ks[3], dim, dim)
    wv, bv = _init_linear(ks[4], ks[5], dim, dim)
    wo, bo = _init_linear(ks[6], ks[7], dim, dim)
    return dict(
        w_qkv=jnp.concatenate([wq, wk, wv], axis=1),
        b_qkv=jnp.concatenate([bq, bk, bv], axis=1),
        wo=wo, bo=bo,
        norm_q=(1.0 + 0.1 * jax.random.normal(ks[8], (1, dim))).astype(jnp.float32),
        norm_k=(1.0 + 0.1 * jax.random.normal(ks[9], (1, dim))).astype(jnp.float32),
    )


def init_cross_attn(key, dim):
    ks = jax.random.split(key, 10)
    wq, bq = _init_linear(ks[0], ks[1], dim, dim)
    wk, bk = _init_linear(ks[2], ks[3], dim, dim)
    wv, bv = _init_linear(ks[4], ks[5], dim, dim)
    wo, bo = _init_linear(ks[6], ks[7], dim, dim)
    return dict(
        wq=wq, bq=bq,
        w_kv=jnp.concatenate([wk, wv], axis=1),
        b_kv=jnp.concatenate([bk, bv], axis=1),
        wo=wo, bo=bo,
        norm_q=(1.0 + 0.1 * jax.random.normal(ks[8], (1, dim))).astype(jnp.float32),
        norm_k=(1.0 + 0.1 * jax.random.normal(ks[9], (1, dim))).astype(jnp.float32),
    )


if __name__ == "__main__":
    # Small test shapes (head_dim=128 so per-head channel blocks are lane-aligned,
    # matching the real Wan configs where head_dim is 128).
    B, L, C = 2, 16, 256
    num_heads = 2
    head_dim = C // num_heads            # 128
    c2 = head_dim // 2                   # 64
    ffn_dim = 512
    L2 = 16

    key = jax.random.PRNGKey(0)
    k_params, k_x, k_e, k_ctx = jax.random.split(key, 4)
    kp = jax.random.split(k_params, 4)
    params = {
        "modulation": jax.random.normal(kp[0], (1, 6, C), jnp.float32) / math.sqrt(C),
        "self_attn": init_self_attn(kp[1], C),
        "cross_attn": init_cross_attn(kp[2], C),
    }
    kf = jax.random.split(kp[3], 4)
    params["ffn_w1"], params["ffn_b1"] = _init_linear(kf[0], kf[1], C, ffn_dim)
    params["ffn_w2"], params["ffn_b2"] = _init_linear(kf[2], kf[3], ffn_dim, C)

    x = jax.random.normal(k_x, (B, L, C), jnp.float32)
    e = jax.random.normal(k_e, (B, 6, C), jnp.float32)
    context = jax.random.normal(k_ctx, (B, L2, C), jnp.float32)

    grid_sizes = np.array([[2, 2, 4], [1, 2, 4]], np.int32)    # (F, H, W) per batch
    seq_lens = jnp.array([16, 8], jnp.int32)                   # == F*H*W per batch
    context_lens = jnp.array([16, 10], jnp.int32)

    # RoPE freqs split along dim into [c-2*(c//3), c//3, c//3] for (F, H, W) axes.
    sizes = [c2 - 2 * (c2 // 3), c2 // 3, c2 // 3]
    max_pos = 1024
    parts_cos, parts_sin = [], []
    for cp_ in sizes:
        inv = 1.0 / (10000.0 ** (np.arange(cp_, dtype=np.float64) / max(cp_, 1)))
        ang = np.outer(np.arange(max_pos, dtype=np.float64), inv)
        parts_cos.append(np.cos(ang))
        parts_sin.append(np.sin(ang))

    rope_cos = np.ones((B, L, c2), np.float32)   # identity rotation past f*h*w
    rope_sin = np.zeros((B, L, c2), np.float32)
    for i in range(B):
        f, h, w = (int(v) for v in grid_sizes[i])
        seq = f * h * w
        cos_i = np.concatenate([
            np.broadcast_to(parts_cos[0][:f][:, None, None, :], (f, h, w, sizes[0])),
            np.broadcast_to(parts_cos[1][:h][None, :, None, :], (f, h, w, sizes[1])),
            np.broadcast_to(parts_cos[2][:w][None, None, :, :], (f, h, w, sizes[2])),
        ], axis=-1).reshape(seq, c2)
        sin_i = np.concatenate([
            np.broadcast_to(parts_sin[0][:f][:, None, None, :], (f, h, w, sizes[0])),
            np.broadcast_to(parts_sin[1][:h][None, :, None, :], (f, h, w, sizes[1])),
            np.broadcast_to(parts_sin[2][:w][None, None, :, :], (f, h, w, sizes[2])),
        ], axis=-1).reshape(seq, c2)
        rope_cos[i, :seq] = cos_i
        rope_sin[i, :seq] = sin_i

    # Per-head-dim (D-wide) per-channel tables for the lane-dense in-kernel RoPE:
    #   cos_d[..., 2i] = cos_d[..., 2i+1] = cos_i ; sin_d[..., 2i] = -sin_i, [2i+1] = +sin_i
    cos_d = np.repeat(rope_cos, 2, axis=-1)
    sin_d = np.repeat(rope_sin, 2, axis=-1) * np.tile(np.array([-1.0, 1.0], np.float32), c2)
    rope_cos_d = jnp.asarray(cos_d)
    rope_sin_d = jnp.asarray(sin_d)
    rope_cos_j = jnp.asarray(rope_cos)
    rope_sin_j = jnp.asarray(rope_sin)

    fwd = jax.jit(functools.partial(wan_attention_block, num_heads=num_heads))
    out = fwd(params, x, e, seq_lens, rope_cos_d, rope_sin_d, context, context_lens)
    out = jax.block_until_ready(out)

    ref = ref_forward(params, x, e, seq_lens, rope_cos_j, rope_sin_j,
                      context, context_lens, num_heads)
    assert out.shape == (B, L, C) and out.dtype == jnp.float32
    np.testing.assert_allclose(np.asarray(out), np.asarray(ref), rtol=5e-2, atol=5e-2)
    print("KERNEL_OK")
</pallas_src>

<mosaic_0001>
module attributes {stable_mosaic.version = 11 : i64} {
  func.func @_ln_mod_mm_kernel(%arg0: i32, %arg1: i32, %arg2: i32, %arg3: memref<1x16x256xf32, #tpu.memory_space<vmem>>, %arg4: memref<1x1x256xf32, #tpu.memory_space<vmem>>, %arg5: memref<1x1x256xf32, #tpu.memory_space<vmem>>, %arg6: memref<256x768xbf16, #tpu.memory_space<vmem>>, %arg7: memref<1x768xf32, #tpu.memory_space<vmem>>, %arg8: memref<1x16x768xbf16, #tpu.memory_space<vmem>>) attributes {dimension_semantics = [#tpu.dimension_semantics<parallel>, #tpu.dimension_semantics<parallel>, #tpu.dimension_semantics<parallel>], iteration_bounds = array<i64: 2, 1, 1>, scalar_prefetch = 0 : i64, scratch_operands = 0 : i64, tpu.core_type = #tpu.core_type<tc>, window_params = [{transform_indices = @transform_0, window_bounds = array<i64: 1, 16, 256>}, {transform_indices = @transform_1, window_bounds = array<i64: 1, 1, 256>}, {transform_indices = @transform_2, window_bounds = array<i64: 1, 1, 256>}, {transform_indices = @transform_3, window_bounds = array<i64: 256, 768>}, {transform_indices = @transform_4, window_bounds = array<i64: 1, 768>}, {transform_indices = @transform_5, window_bounds = array<i64: 1, 16, 768>}]} {
    %c0 = arith.constant 0 : index
    %c0_0 = arith.constant 0 : index
    %c0_1 = arith.constant 0 : index
    %0 = vector.load %arg3[%c0, %c0_0, %c0_1] : memref<1x16x256xf32, #tpu.memory_space<vmem>>, vector<1x16x256xf32>
    %1 = vector.shape_cast %0 : vector<1x16x256xf32> to vector<16x256xf32>
    %cst = arith.constant dense<0.000000e+00> : vector<16xf32>
    %2 = vector.multi_reduction <add>, %1, %cst [1] : vector<16x256xf32> to vector<16xf32>
    %3 = vector.shape_cast %2 : vector<16xf32> to vector<16x1xf32>
    %cst_2 = arith.constant 2.560000e+02 : f32
    %4 = vector.broadcast %cst_2 : f32 to vector<16x1xf32>
    %5 = arith.divf %3, %4 : vector<16x1xf32>
    %6 = vector.broadcast %5 : vector<16x1xf32> to vector<16x256xf32>
    %7 = arith.subf %1, %6 : vector<16x256xf32>
    %8 = arith.mulf %7, %7 : vector<16x256xf32>
    %cst_3 = arith.constant dense<0.000000e+00> : vector<16xf32>
    %9 = vector.multi_reduction <add>, %8, %cst_3 [1] : vector<16x256xf32> to vector<16xf32>
    %10 = vector.shape_cast %9 : vector<16xf32> to vector<16x1xf32>
    %cst_4 = arith.constant 2.560000e+02 : f32
    %11 = vector.broadcast %cst_4 : f32 to vector<16x1xf32>
    %12 = arith.divf %10, %11 : vector<16x1xf32>
    %cst_5 = arith.constant 9.99999997E-7 : f32
    %13 = vector.broadcast %cst_5 : f32 to vector<16x1xf32>
    %14 = arith.addf %12, %13 : vector<16x1xf32>
    %15 = math.rsqrt %14 : vector<16x1xf32>
    %16 = vector.broadcast %15 : vector<16x1xf32> to vector<16x256xf32>
    %17 = arith.mulf %7, %16 : vector<16x256xf32>
    %c0_6 = arith.constant 0 : index
    %c0_7 = arith.constant 0 : index
    %c0_8 = arith.constant 0 : index
    %18 = vector.load %arg5[%c0_6, %c0_7, %c0_8] : memref<1x1x256xf32, #tpu.memory_space<vmem>>, vector<1x1x256xf32>
    %19 = vector.shape_cast %18 : vector<1x1x256xf32> to vector<1x256xf32>
    %cst_9 = arith.constant 1.000000e+00 : f32
    %20 = vector.broadcast %cst_9 : f32 to vector<1x256xf32>
    %21 = arith.addf %20, %19 : vector<1x256xf32>
    %22 = vector.broadcast %21 : vector<1x256xf32> to vector<16x256xf32>
    %23 = arith.mulf %17, %22 : vector<16x256xf32>
    %c0_10 = arith.constant 0 : index
    %c0_11 = arith.constant 0 : index
    %c0_12 = arith.constant 0 : index
    %24 = vector.load %arg4[%c0_10, %c0_11, %c0_12] : memref<1x1x256xf32, #tpu.memory_space<vmem>>, vector<1x1x256xf32>
    %25 = vector.shape_cast %24 : vector<1x1x256xf32> to vector<1x256xf32>
    %26 = vector.broadcast %25 : vector<1x256xf32> to vector<16x256xf32>
    %27 = arith.addf %23, %26 : vector<16x256xf32>
    %28 = arith.truncf %27 : vector<16x256xf32> to vector<16x256xbf16>
    %c0_13 = arith.constant 0 : index
    %c0_14 = arith.constant 0 : index
    %29 = vector.load %arg6[%c0_13, %c0_14] : memref<256x768xbf16, #tpu.memory_space<vmem>>, vector<256x768xbf16>
    %cst_15 = arith.constant dense<0.000000e+00> : vector<16x768xf32>
    %30 = tpu.matmul %28, %29, %cst_15 {dimension_numbers = #tpu.dot_dimension_numbers<[1], [0], [0], [1], [0, 0, 1, 1], [], []>} : vector<16x256xbf16>, vector<256x768xbf16>, vector<16x768xf32> -> vector<16x768xf32>
    %c0_16 = arith.constant 0 : index
    %c0_17 = arith.constant 0 : index
    %31 = vector.load %arg7[%c0_16, %c0_17] : memref<1x768xf32, #tpu.memory_space<vmem>>, vector<1x768xf32>
    %32 = vector.broadcast %31 : vector<1x768xf32> to vector<16x768xf32>
    %33 = arith.addf %30, %32 : vector<16x768xf32>
    %34 = arith.truncf %33 : vector<16x768xf32> to vector<16x768xbf16>
    %c0_18 = arith.constant 0 : index
    %c0_19 = arith.constant 0 : index
    %c0_20 = arith.constant 0 : index
    %35 = vector.load %arg8[%c0_18, %c0_19, %c0_20] : memref<1x16x768xbf16, #tpu.memory_space<vmem>>, vector<1x16x768xbf16>
    %36 = vector.shape_cast %35 : vector<1x16x768xbf16> to vector<16x768xbf16>
    %37 = vector.shape_cast %34 : vector<16x768xbf16> to vector<1x16x768xbf16>
    tpu.vector_store %arg8[%c0_18, %c0_19, %c0_20], %37 {strides = array<i32>} : memref<1x16x768xbf16, #tpu.memory_space<vmem>>, vector<1x16x768xbf16>,
    return
  }
  func.func @transform_0(%arg0: i32, %arg1: i32, %arg2: i32) -> (i32, i32, i32) {
    %c0_i32 = arith.constant 0 : i32
    %c0_i32_0 = arith.constant 0 : i32
    return %arg0, %arg1, %c0_i32 : i32, i32, i32
  }
  func.func @transform_1(%arg0: i32, %arg1: i32, %arg2: i32) -> (i32, i32, i32) {
    %c0_i32 = arith.constant 0 : i32
    %c0_i32_0 = arith.constant 0 : i32
    %c0_i32_1 = arith.constant 0 : i32
    return %arg0, %c0_i32, %c0_i32_0 : i32, i32, i32
  }
  func.func @transform_2(%arg0: i32, %arg1: i32, %arg2: i32) -> (i32, i32, i32) {
    %c0_i32 = arith.constant 0 : i32
    %c0_i32_0 = arith.constant 0 : i32
    %c0_i32_1 = arith.constant 0 : i32
    return %arg0, %c0_i32, %c0_i32_0 : i32, i32, i32
  }
  func.func @transform_3(%arg0: i32, %arg1: i32, %arg2: i32) -> (i32, i32) {
    %c0_i32 = arith.constant 0 : i32
    %c0_i32_0 = arith.constant 0 : i32
    return %c0_i32, %arg2 : i32, i32
  }
  func.func @transform_4(%arg0: i32, %arg1: i32, %arg2: i32) -> (i32, i32) {
    %c0_i32 = arith.constant 0 : i32
    %c0_i32_0 = arith.constant 0 : i32
    return %c0_i32, %arg2 : i32, i32
  }
  func.func @transform_5(%arg0: i32, %arg1: i32, %arg2: i32) -> (i32, i32, i32) {
    %c0_i32 = arith.constant 0 : i32
    return %arg0, %arg1, %arg2 : i32, i32, i32
  }
}

module attributes {stable_mosaic.version = 11 : i64} {
  func.func @_rms_rope_kernel(%arg0: i32, %arg1: i32, %arg2: memref<1x16x256xbf16, #tpu.memory_space<vmem>>, %arg3: memref<1x256xf32, #tpu.memory_space<vmem>>, %arg4: memref<1x16x128xf32, #tpu.memory_space<vmem>>, %arg5: memref<1x16x128xf32, #tpu.memory_space<vmem>>, %arg6: memref<1x16x256xbf16, #tpu.memory_space<vmem>>) attributes {dimension_semantics = [#tpu.dimension_semantics<parallel>, #tpu.dimension_semantics<parallel>], iteration_bounds = array<i64: 2, 1>, scalar_prefetch = 0 : i64, scratch_operands = 0 : i64, tpu.core_type = #tpu.core_type<tc>, window_params = [{transform_indices = @transform_0, window_bounds = array<i64: 1, 16, 256>}, {pipeline_mode = #tpu.pipeline_mode<synchronous>, transform_indices = @transform_1, window_bounds = array<i64: 1, 256>}, {transform_indices = @transform_2, window_bounds = array<i64: 1, 16, 128>}, {transform_indices = @transform_3, window_bounds = array<i64: 1, 16, 128>}, {transform_indices = @transform_4, window_bounds = array<i64: 1, 16, 256>}]} {
    %c0 = arith.constant 0 : index
    %c0_0 = arith.constant 0 : index
    %c0_1 = arith.constant 0 : index
    %0 = vector.load %arg2[%c0, %c0_0, %c0_1] : memref<1x16x256xbf16, #tpu.memory_space<vmem>>, vector<1x16x256xbf16>
    %1 = vector.shape_cast %0 : vector<1x16x256xbf16> to vector<16x256xbf16>
    %2 = arith.extf %1 : vector<16x256xbf16> to vector<16x256xf32>
    %3 = arith.mulf %2, %2 : vector<16x256xf32>
    %cst = arith.constant dense<0.000000e+00> : vector<16xf32>
    %4 = vector.multi_reduction <add>, %3, %cst [1] : vector<16x256xf32> to vector<16xf32>
    %5 = vector.shape_cast %4 : vector<16xf32> to vector<16x1xf32>
    %cst_2 = arith.constant 2.560000e+02 : f32
    %6 = vector.broadcast %cst_2 : f32 to vector<16x1xf32>
    %7 = arith.divf %5, %6 : vector<16x1xf32>
    %cst_3 = arith.constant 9.99999997E-7 : f32
    %8 = vector.broadcast %cst_3 : f32 to vector<16x1xf32>
    %9 = arith.addf %7, %8 : vector<16x1xf32>
    %10 = math.rsqrt %9 : vector<16x1xf32>
    %11 = vector.broadcast %10 : vector<16x1xf32> to vector<16x256xf32>
    %12 = arith.mulf %2, %11 : vector<16x256xf32>
    %c0_4 = arith.constant 0 : index
    %c0_5 = arith.constant 0 : index
    %13 = vector.load %arg3[%c0_4, %c0_5] : memref<1x256xf32, #tpu.memory_space<vmem>>, vector<1x256xf32>
    %14 = vector.broadcast %13 : vector<1x256xf32> to vector<16x256xf32>
    %15 = arith.mulf %12, %14 : vector<16x256xf32>
    %c0_6 = arith.constant 0 : index
    %c0_7 = arith.constant 0 : index
    %c0_8 = arith.constant 0 : index
    %16 = vector.load %arg4[%c0_6, %c0_7, %c0_8] : memref<1x16x128xf32, #tpu.memory_space<vmem>>, vector<1x16x128xf32>
    %17 = vector.shape_cast %16 : vector<1x16x128xf32> to vector<16x128xf32>
    %c0_9 = arith.constant 0 : index
    %c0_10 = arith.constant 0 : index
    %c0_11 = arith.constant 0 : index
    %18 = vector.load %arg5[%c0_9, %c0_10, %c0_11] : memref<1x16x128xf32, #tpu.memory_space<vmem>>, vector<1x16x128xf32>
    %19 = vector.shape_cast %18 : vector<1x16x128xf32> to vector<16x128xf32>
    %20 = tpu.concatenate %17, %17 in 1 : vector<16x128xf32>, vector<16x128xf32> -> vector<16x256xf32>
    %21 = tpu.concatenate %19, %19 in 1 : vector<16x128xf32>, vector<16x128xf32> -> vector<16x256xf32>
    %22 = tpu.iota {dimensions = array<i32: 1>} : vector<16x256xi32>
    %c2_i32 = arith.constant 2 : i32
    %c0_i32 = arith.constant 0 : i32
    %23 = arith.cmpi eq, %c2_i32, %c0_i32 : i32
    %c1_i32 = arith.constant 1 : i32
    %24 = arith.select %23, %c1_i32, %c2_i32 : i32
    %25 = vector.broadcast %24 : i32 to vector<16x256xi32>
    %26 = arith.remsi %22, %25 : vector<16x256xi32>
    %c0_i32_12 = arith.constant 0 : i32
    %27 = vector.broadcast %c0_i32_12 : i32 to vector<16x256xi32>
    %28 = arith.cmpi ne, %26, %27 : vector<16x256xi32>
    %c0_i32_13 = arith.constant 0 : i32
    %29 = vector.broadcast %c0_i32_13 : i32 to vector<16x256xi32>
    %30 = arith.cmpi slt, %26, %29 : vector<16x256xi32>
    %c0_i32_14 = arith.constant 0 : i32
    %31 = arith.cmpi slt, %24, %c0_i32_14 : i32
    %32 = vector.broadcast %31 : i1 to vector<16x256xi1>
    %33 = vector.broadcast %32 : vector<16x256xi1> to vector<16x256xi1>
    %34 = arith.xori %30, %33 : vector<16x256xi1>
    %35 = arith.andi %34, %28 : vector<16x256xi1>
    %36 = vector.broadcast %24 : i32 to vector<16x256xi32>
    %37 = arith.addi %26, %36 : vector<16x256xi32>
    %38 = arith.select %35, %37, %26 : vector<16x256xi1>, vector<16x256xi32>
    %c0_i32_15 = arith.constant 0 : i32
    %39 = vector.broadcast %c0_i32_15 : i32 to vector<16x256xi32>
    %40 = arith.cmpi eq, %38, %39 : vector<16x256xi32>
    %c255_i32 = arith.constant 255 : i32
    %41 = tpu.dynamic_rotate %15 by %c255_i32 dim 1 : vector<16x256xf32>, i32 -> vector<16x256xf32>
    %c1_i32_16 = arith.constant 1 : i32
    %42 = tpu.dynamic_rotate %15 by %c1_i32_16 dim 1 : vector<16x256xf32>, i32 -> vector<16x256xf32>
    %43 = arith.select %40, %41, %42 : vector<16x256xi1>, vector<16x256xf32>
    %44 = arith.mulf %15, %20 : vector<16x256xf32>
    %45 = arith.mulf %43, %21 : vector<16x256xf32>
    %46 = arith.addf %44, %45 : vector<16x256xf32>
    %47 = arith.truncf %46 : vector<16x256xf32> to vector<16x256xbf16>
    %c0_17 = arith.constant 0 : index
    %c0_18 = arith.constant 0 : index
    %c0_19 = arith.constant 0 : index
    %48 = vector.load %arg6[%c0_17, %c0_18, %c0_19] : memref<1x16x256xbf16, #tpu.memory_space<vmem>>, vector<1x16x256xbf16>
    %49 = vector.shape_cast %48 : vector<1x16x256xbf16> to vector<16x256xbf16>
    %50 = vector.shape_cast %47 : vector<16x256xbf16> to vector<1x16x256xbf16>
    tpu.vector_store %arg6[%c0_17, %c0_18, %c0_19], %50 {strides = array<i32>} : memref<1x16x256xbf16, #tpu.memory_space<vmem>>, vector<1x16x256xbf16>,
    return
  }
  func.func @transform_0(%arg0: i32, %arg1: i32) -> (i32, i32, i32) {
    %c1_i32 = arith.constant 1 : i32
    %c0_i32 = arith.constant 0 : i32
    return %arg0, %arg1, %c1_i32 : i32, i32, i32
  }
  func.func @transform_1(%arg0: i32, %arg1: i32) -> (i32, i32) {
    %c0_i32 = arith.constant 0 : i32
    %c0_i32_0 = arith.constant 0 : i32
    %c0_i32_1 = arith.constant 0 : i32
    return %c0_i32, %c0_i32_0 : i32, i32
  }
  func.func @transform_2(%arg0: i32, %arg1: i32) -> (i32, i32, i32) {
    %c0_i32 = arith.constant 0 : i32
    %c0_i32_0 = arith.constant 0 : i32
    return %arg0, %arg1, %c0_i32 : i32, i32, i32
  }
  func.func @transform_3(%arg0: i32, %arg1: i32) -> (i32, i32, i32) {
    %c0_i32 = arith.constant 0 : i32
    %c0_i32_0 = arith.constant 0 : i32
    return %arg0, %arg1, %c0_i32 : i32, i32, i32
  }
  func.func @transform_4(%arg0: i32, %arg1: i32) -> (i32, i32, i32) {
    %c0_i32 = arith.constant 0 : i32
    %c0_i32_0 = arith.constant 0 : i32
    return %arg0, %arg1, %c0_i32 : i32, i32, i32
  }
}

module attributes {stable_mosaic.version = 11 : i64} {
  func.func @_flash_kernel(%arg0: i32, %arg1: i32, %arg2: i32, %arg3: i32, %arg4: memref<2xi32, #tpu.memory_space<smem>>, %arg5: memref<1x16x128xbf16, #tpu.memory_space<vmem>>, %arg6: memref<1x16x128xbf16, #tpu.memory_space<vmem>>, %arg7: memref<1x16x128xbf16, #tpu.memory_space<vmem>>, %arg8: memref<1x16x128xbf16, #tpu.memory_space<vmem>>, %arg9: memref<16x1xf32, #tpu.memory_space<vmem>>, %arg10: memref<16x1xf32, #tpu.memory_space<vmem>>, %arg11: memref<16x128xf32, #tpu.memory_space<vmem>>) attributes {dimension_semantics = [#tpu.dimension_semantics<parallel>, #tpu.dimension_semantics<parallel>, #tpu.dimension_semantics<parallel>, #tpu.dimension_semantics<arbitrary>], iteration_bounds = array<i64: 2, 2, 1, 1>, scalar_prefetch = 1 : i64, scratch_operands = 3 : i64, tpu.core_type = #tpu.core_type<tc>, window_params = [{transform_indices = @transform_0, window_bounds = array<i64: 1, 16, 128>}, {transform_indices = @transform_1, window_bounds = array<i64: 1, 16, 128>}, {transform_indices = @transform_2, window_bounds = array<i64: 1, 16, 128>}, {transform_indices = @transform_3, window_bounds = array<i64: 1, 16, 128>}]} {
    %0 = arith.index_cast %arg0 : i32 to index
    %1 = memref.load %arg4[%0] : memref<2xi32, #tpu.memory_space<smem>>
    %c0_i32 = arith.constant 0 : i32
    %2 = arith.cmpi eq, %arg3, %c0_i32 : i32
    %3 = arith.extui %2 : i1 to i32
    %c0_i32_0 = arith.constant 0 : i32
    %4 = arith.cmpi ne, %3, %c0_i32_0 : i32
    scf.if %4 {
      %cst = arith.constant 0xFF800000 : f32
      %12 = vector.broadcast %cst : f32 to vector<16x1xf32>
      %c0 = arith.constant 0 : index
      %c0_4 = arith.constant 0 : index
      %13 = vector.load %arg9[%c0, %c0_4] : memref<16x1xf32, #tpu.memory_space<vmem>>, vector<16x1xf32>
      tpu.vector_store %arg9[%c0, %c0_4], %12 {strides = array<i32>} : memref<16x1xf32, #tpu.memory_space<vmem>>, vector<16x1xf32>,
      %cst_5 = arith.constant 0.000000e+00 : f32
      %14 = vector.broadcast %cst_5 : f32 to vector<16x1xf32>
      %c0_6 = arith.constant 0 : index
      %c0_7 = arith.constant 0 : index
      %15 = vector.load %arg10[%c0_6, %c0_7] : memref<16x1xf32, #tpu.memory_space<vmem>>, vector<16x1xf32>
      tpu.vector_store %arg10[%c0_6, %c0_7], %14 {strides = array<i32>} : memref<16x1xf32, #tpu.memory_space<vmem>>, vector<16x1xf32>,
      %cst_8 = arith.constant 0.000000e+00 : f32
      %16 = vector.broadcast %cst_8 : f32 to vector<16x128xf32>
      %c0_9 = arith.constant 0 : index
      %c0_10 = arith.constant 0 : index
      %17 = vector.load %arg11[%c0_9, %c0_10] : memref<16x128xf32, #tpu.memory_space<vmem>>, vector<16x128xf32>
      tpu.vector_store %arg11[%c0_9, %c0_10], %16 {strides = array<i32>} : memref<16x128xf32, #tpu.memory_space<vmem>>, vector<16x128xf32>,
    } else {
    }
    %c16_i32 = arith.constant 16 : i32
    %5 = arith.muli %arg3, %c16_i32 : i32
    %6 = arith.cmpi slt, %5, %1 : i32
    %7 = arith.extui %6 : i1 to i32
    %c0_i32_1 = arith.constant 0 : i32
    %8 = arith.cmpi ne, %7, %c0_i32_1 : i32
    scf.if %8 {
      %c0 = arith.constant 0 : index
      %c0_4 = arith.constant 0 : index
      %c0_5 = arith.constant 0 : index
      %12 = vector.load %arg5[%c0, %c0_4, %c0_5] : memref<1x16x128xbf16, #tpu.memory_space<vmem>>, vector<1x16x128xbf16>
      %13 = vector.shape_cast %12 : vector<1x16x128xbf16> to vector<16x128xbf16>
      %c0_6 = arith.constant 0 : index
      %c0_7 = arith.constant 0 : index
      %c0_8 = arith.constant 0 : index
      %14 = vector.load %arg6[%c0_6, %c0_7, %c0_8] : memref<1x16x128xbf16, #tpu.memory_space<vmem>>, vector<1x16x128xbf16>
      %15 = vector.shape_cast %14 : vector<1x16x128xbf16> to vector<16x128xbf16>
      %cst = arith.constant dense<0.000000e+00> : vector<16x16xf32>
      %16 = tpu.matmul %13, %15, %cst {dimension_numbers = #tpu.dot_dimension_numbers<[1], [1], [0], [0], [0, 0, 1, 0], [], []>} : vector<16x128xbf16>, vector<16x128xbf16>, vector<16x16xf32> -> vector<16x16xf32>
      %c16_i32_9 = arith.constant 16 : i32
      %17 = arith.muli %arg3, %c16_i32_9 : i32
      %18 = tpu.iota {dimensions = array<i32: 1>} : vector<16x16xi32>
      %19 = vector.broadcast %17 : i32 to vector<16x16xi32>
      %20 = arith.addi %19, %18 : vector<16x16xi32>
      %21 = vector.broadcast %1 : i32 to vector<16x16xi32>
      %22 = arith.cmpi slt, %20, %21 : vector<16x16xi32>
      %cst_10 = arith.constant -1.000000e+30 : f32
      %23 = vector.broadcast %cst_10 : f32 to vector<16x16xf32>
      %24 = arith.select %22, %16, %23 : vector<16x16xi1>, vector<16x16xf32>
      %c0_11 = arith.constant 0 : index
      %c0_12 = arith.constant 0 : index
      %25 = vector.load %arg9[%c0_11, %c0_12] : memref<16x1xf32, #tpu.memory_space<vmem>>, vector<16x1xf32>
      %cst_13 = arith.constant dense<0xFF800000> : vector<16xf32>
      %26 = vector.multi_reduction <maximumf>, %24, %cst_13 [1] : vector<16x16xf32> to vector<16xf32>
      %27 = vector.shape_cast %26 : vector<16xf32> to vector<16x1xf32>
      %28 = arith.maximumf %25, %27 : vector<16x1xf32>
      %29 = arith.subf %25, %28 : vector<16x1xf32>
      %30 = math.exp %29 : vector<16x1xf32>
      %31 = vector.broadcast %28 : vector<16x1xf32> to vector<16x16xf32>
      %32 = arith.subf %24, %31 : vector<16x16xf32>
      %33 = math.exp %32 : vector<16x16xf32>
      %c0_14 = arith.constant 0 : index
      %c0_15 = arith.constant 0 : index
      %34 = vector.load %arg10[%c0_14, %c0_15] : memref<16x1xf32, #tpu.memory_space<vmem>>, vector<16x1xf32>
      %35 = arith.mulf %30, %34 : vector<16x1xf32>
      %cst_16 = arith.constant dense<0.000000e+00> : vector<16xf32>
      %36 = vector.multi_reduction <add>, %33, %cst_16 [1] : vector<16x16xf32> to vector<16xf32>
      %37 = vector.shape_cast %36 : vector<16xf32> to vector<16x1xf32>
      %38 = arith.addf %35, %37 : vector<16x1xf32>
      %c0_17 = arith.constant 0 : index
      %c0_18 = arith.constant 0 : index
      %39 = vector.load %arg10[%c0_17, %c0_18] : memref<16x1xf32, #tpu.memory_space<vmem>>, vector<16x1xf32>
      tpu.vector_store %arg10[%c0_17, %c0_18], %38 {strides = array<i32>} : memref<16x1xf32, #tpu.memory_space<vmem>>, vector<16x1xf32>,
      %c0_19 = arith.constant 0 : index
      %c0_20 = arith.constant 0 : index
      %40 = vector.load %arg11[%c0_19, %c0_20] : memref<16x128xf32, #tpu.memory_space<vmem>>, vector<16x128xf32>
      %41 = vector.broadcast %30 : vector<16x1xf32> to vector<16x128xf32>
      %42 = arith.mulf %41, %40 : vector<16x128xf32>
      %43 = arith.truncf %33 : vector<16x16xf32> to vector<16x16xbf16>
      %c0_21 = arith.constant 0 : index
      %c0_22 = arith.constant 0 : index
      %c0_23 = arith.constant 0 : index
      %44 = vector.load %arg7[%c0_21, %c0_22, %c0_23] : memref<1x16x128xbf16, #tpu.memory_space<vmem>>, vector<1x16x128xbf16>
      %45 = vector.shape_cast %44 : vector<1x16x128xbf16> to vector<16x128xbf16>
      %cst_24 = arith.constant dense<0.000000e+00> : vector<16x128xf32>
      %46 = tpu.matmul %43, %45, %cst_24 {dimension_numbers = #tpu.dot_dimension_numbers<[1], [0], [0], [1], [0, 0, 1, 1], [], []>} : vector<16x16xbf16>, vector<16x128xbf16>, vector<16x128xf32> -> vector<16x128xf32>
      %47 = arith.addf %42, %46 : vector<16x128xf32>
      %c0_25 = arith.constant 0 : index
      %c0_26 = arith.constant 0 : index
      %48 = vector.load %arg11[%c0_25, %c0_26] : memref<16x128xf32, #tpu.memory_space<vmem>>, vector<16x128xf32>
      tpu.vector_store %arg11[%c0_25, %c0_26], %47 {strides = array<i32>} : memref<16x128xf32, #tpu.memory_space<vmem>>, vector<16x128xf32>,
      %c0_27 = arith.constant 0 : index
      %c0_28 = arith.constant 0 : index
      %49 = vector.load %arg9[%c0_27, %c0_28] : memref<16x1xf32, #tpu.memory_space<vmem>>, vector<16x1xf32>
      tpu.vector_store %arg9[%c0_27, %c0_28], %28 {strides = array<i32>} : memref<16x1xf32, #tpu.memory_space<vmem>>, vector<16x1xf32>,
    } else {
    }
    %c0_i32_2 = arith.constant 0 : i32
    %9 = arith.cmpi eq, %arg3, %c0_i32_2 : i32
    %10 = arith.extui %9 : i1 to i32
    %c0_i32_3 = arith.constant 0 : i32
    %11 = arith.cmpi ne, %10, %c0_i32_3 : i32
    scf.if %11 {
      %c0 = arith.constant 0 : index
      %c0_4 = arith.constant 0 : index
      %12 = vector.load %arg10[%c0, %c0_4] : memref<16x1xf32, #tpu.memory_space<vmem>>, vector<16x1xf32>
      %cst = arith.constant 0.000000e+00 : f32
      %13 = vector.broadcast %cst : f32 to vector<16x1xf32>
      %14 = arith.cmpf ogt, %12, %13 : vector<16x1xf32>
      %cst_5 = arith.constant 1.000000e+00 : f32
      %15 = vector.broadcast %cst_5 : f32 to vector<16x1xf32>
      %16 = arith.select %14, %12, %15 : vector<16x1xi1>, vector<16x1xf32>
      %c0_6 = arith.constant 0 : index
      %c0_7 = arith.constant 0 : index
      %17 = vector.load %arg11[%c0_6, %c0_7] : memref<16x128xf32, #tpu.memory_space<vmem>>, vector<16x128xf32>
      %18 = tpu.reciprocal %16 {approx = true} : vector<16x1xf32> -> vector<16x1xf32>
      %19 = vector.broadcast %18 : vector<16x1xf32> to vector<16x128xf32>
      %20 = arith.mulf %17, %19 : vector<16x128xf32>
      %21 = arith.truncf %20 : vector<16x128xf32> to vector<16x128xbf16>
      %c0_8 = arith.constant 0 : index
      %c0_9 = arith.constant 0 : index
      %c0_10 = arith.constant 0 : index
      %22 = vector.load %arg8[%c0_8, %c0_9, %c0_10] : memref<1x16x128xbf16, #tpu.memory_space<vmem>>, vector<1x16x128xbf16>
      %23 = vector.shape_cast %22 : vector<1x16x128xbf16> to vector<16x128xbf16>
      %24 = vector.shape_cast %21 : vector<16x128xbf16> to vector<1x16x128xbf16>
      tpu.vector_store %arg8[%c0_8, %c0_9, %c0_10], %24 {strides = array<i32>} : memref<1x16x128xbf16, #tpu.memory_space<vmem>>, vector<1x16x128xbf16>,
    } else {
    }
    return
  }
  func.func @transform_0(%arg0: i32, %arg1: i32, %arg2: i32, %arg3: i32, %arg4: memref<2xi32, #tpu.memory_space<smem>>) -> (i32, i32, i32) {
    %c0_i32 = arith.constant 0 : i32
    return %arg0, %arg2, %arg1 : i32, i32, i32
  }
  func.func @transform_1(%arg0: i32, %arg1: i32, %arg2: i32, %arg3: i32, %arg4: memref<2xi32, #tpu.memory_space<smem>>) -> (i32, i32, i32) {
    %c0_i32 = arith.constant 0 : i32
    return %arg0, %arg3, %arg1 : i32, i32, i32
  }
  func.func @transform_2(%arg0: i32, %arg1: i32, %arg2: i32, %arg3: i32, %arg4: memref<2xi32, #tpu.memory_space<smem>>) -> (i32, i32, i32) {
    %c4_i32 = arith.constant 4 : i32
    %0 = arith.addi %c4_i32, %arg1 : i32
    %c0_i32 = arith.constant 0 : i32
    return %arg0, %arg3, %0 : i32, i32, i32
  }
  func.func @transform_3(%arg0: i32, %arg1: i32, %arg2: i32, %arg3: i32, %arg4: memref<2xi32, #tpu.memory_space<smem>>) -> (i32, i32, i32) {
    %c0_i32 = arith.constant 0 : i32
    return %arg0, %arg2, %arg1 : i32, i32, i32
  }
}

module attributes {stable_mosaic.version = 11 : i64} {
  func.func @_rms_rope_kernel(%arg0: i32, %arg1: i32, %arg2: memref<1x16x256xbf16, #tpu.memory_space<vmem>>, %arg3: memref<1x256xf32, #tpu.memory_space<vmem>>, %arg4: memref<1x16x128xf32, #tpu.memory_space<vmem>>, %arg5: memref<1x16x128xf32, #tpu.memory_space<vmem>>, %arg6: memref<1x16x256xbf16, #tpu.memory_space<vmem>>) attributes {dimension_semantics = [#tpu.dimension_semantics<parallel>, #tpu.dimension_semantics<parallel>], iteration_bounds = array<i64: 2, 1>, scalar_prefetch = 0 : i64, scratch_operands = 0 : i64, tpu.core_type = #tpu.core_type<tc>, window_params = [{transform_indices = @transform_0, window_bounds = array<i64: 1, 16, 256>}, {pipeline_mode = #tpu.pipeline_mode<synchronous>, transform_indices = @transform_1, window_bounds = array<i64: 1, 256>}, {transform_indices = @transform_2, window_bounds = array<i64: 1, 16, 128>}, {transform_indices = @transform_3, window_bounds = array<i64: 1, 16, 128>}, {transform_indices = @transform_4, window_bounds = array<i64: 1, 16, 256>}]} {
    %c0 = arith.constant 0 : index
    %c0_0 = arith.constant 0 : index
    %c0_1 = arith.constant 0 : index
    %0 = vector.load %arg2[%c0, %c0_0, %c0_1] : memref<1x16x256xbf16, #tpu.memory_space<vmem>>, vector<1x16x256xbf16>
    %1 = vector.shape_cast %0 : vector<1x16x256xbf16> to vector<16x256xbf16>
    %2 = arith.extf %1 : vector<16x256xbf16> to vector<16x256xf32>
    %3 = arith.mulf %2, %2 : vector<16x256xf32>
    %cst = arith.constant dense<0.000000e+00> : vector<16xf32>
    %4 = vector.multi_reduction <add>, %3, %cst [1] : vector<16x256xf32> to vector<16xf32>
    %5 = vector.shape_cast %4 : vector<16xf32> to vector<16x1xf32>
    %cst_2 = arith.constant 2.560000e+02 : f32
    %6 = vector.broadcast %cst_2 : f32 to vector<16x1xf32>
    %7 = arith.divf %5, %6 : vector<16x1xf32>
    %cst_3 = arith.constant 9.99999997E-7 : f32
    %8 = vector.broadcast %cst_3 : f32 to vector<16x1xf32>
    %9 = arith.addf %7, %8 : vector<16x1xf32>
    %10 = math.rsqrt %9 : vector<16x1xf32>
    %11 = vector.broadcast %10 : vector<16x1xf32> to vector<16x256xf32>
    %12 = arith.mulf %2, %11 : vector<16x256xf32>
    %c0_4 = arith.constant 0 : index
    %c0_5 = arith.constant 0 : index
    %13 = vector.load %arg3[%c0_4, %c0_5] : memref<1x256xf32, #tpu.memory_space<vmem>>, vector<1x256xf32>
    %14 = vector.broadcast %13 : vector<1x256xf32> to vector<16x256xf32>
    %15 = arith.mulf %12, %14 : vector<16x256xf32>
    %c0_6 = arith.constant 0 : index
    %c0_7 = arith.constant 0 : index
    %c0_8 = arith.constant 0 : index
    %16 = vector.load %arg4[%c0_6, %c0_7, %c0_8] : memref<1x16x128xf32, #tpu.memory_space<vmem>>, vector<1x16x128xf32>
    %17 = vector.shape_cast %16 : vector<1x16x128xf32> to vector<16x128xf32>
    %c0_9 = arith.constant 0 : index
    %c0_10 = arith.constant 0 : index
    %c0_11 = arith.constant 0 : index
    %18 = vector.load %arg5[%c0_9, %c0_10, %c0_11] : memref<1x16x128xf32, #tpu.memory_space<vmem>>, vector<1x16x128xf32>
    %19 = vector.shape_cast %18 : vector<1x16x128xf32> to vector<16x128xf32>
    %20 = tpu.concatenate %17, %17 in 1 : vector<16x128xf32>, vector<16x128xf32> -> vector<16x256xf32>
    %21 = tpu.concatenate %19, %19 in 1 : vector<16x128xf32>, vector<16x128xf32> -> vector<16x256xf32>
    %22 = tpu.iota {dimensions = array<i32: 1>} : vector<16x256xi32>
    %c2_i32 = arith.constant 2 : i32
    %c0_i32 = arith.constant 0 : i32
    %23 = arith.cmpi eq, %c2_i32, %c0_i32 : i32
    %c1_i32 = arith.constant 1 : i32
    %24 = arith.select %23, %c1_i32, %c2_i32 : i32
    %25 = vector.broadcast %24 : i32 to vector<16x256xi32>
    %26 = arith.remsi %22, %25 : vector<16x256xi32>
    %c0_i32_12 = arith.constant 0 : i32
    %27 = vector.broadcast %c0_i32_12 : i32 to vector<16x256xi32>
    %28 = arith.cmpi ne, %26, %27 : vector<16x256xi32>
    %c0_i32_13 = arith.constant 0 : i32
    %29 = vector.broadcast %c0_i32_13 : i32 to vector<16x256xi32>
    %30 = arith.cmpi slt, %26, %29 : vector<16x256xi32>
    %c0_i32_14 = arith.constant 0 : i32
    %31 = arith.cmpi slt, %24, %c0_i32_14 : i32
    %32 = vector.broadcast %31 : i1 to vector<16x256xi1>
    %33 = vector.broadcast %32 : vector<16x256xi1> to vector<16x256xi1>
    %34 = arith.xori %30, %33 : vector<16x256xi1>
    %35 = arith.andi %34, %28 : vector<16x256xi1>
    %36 = vector.broadcast %24 : i32 to vector<16x256xi32>
    %37 = arith.addi %26, %36 : vector<16x256xi32>
    %38 = arith.select %35, %37, %26 : vector<16x256xi1>, vector<16x256xi32>
    %c0_i32_15 = arith.constant 0 : i32
    %39 = vector.broadcast %c0_i32_15 : i32 to vector<16x256xi32>
    %40 = arith.cmpi eq, %38, %39 : vector<16x256xi32>
    %c255_i32 = arith.constant 255 : i32
    %41 = tpu.dynamic_rotate %15 by %c255_i32 dim 1 : vector<16x256xf32>, i32 -> vector<16x256xf32>
    %c1_i32_16 = arith.constant 1 : i32
    %42 = tpu.dynamic_rotate %15 by %c1_i32_16 dim 1 : vector<16x256xf32>, i32 -> vector<16x256xf32>
    %43 = arith.select %40, %41, %42 : vector<16x256xi1>, vector<16x256xf32>
    %44 = arith.mulf %15, %20 : vector<16x256xf32>
    %45 = arith.mulf %43, %21 : vector<16x256xf32>
    %46 = arith.addf %44, %45 : vector<16x256xf32>
    %47 = arith.truncf %46 : vector<16x256xf32> to vector<16x256xbf16>
    %c0_17 = arith.constant 0 : index
    %c0_18 = arith.constant 0 : index
    %c0_19 = arith.constant 0 : index
    %48 = vector.load %arg6[%c0_17, %c0_18, %c0_19] : memref<1x16x256xbf16, #tpu.memory_space<vmem>>, vector<1x16x256xbf16>
    %49 = vector.shape_cast %48 : vector<1x16x256xbf16> to vector<16x256xbf16>
    %50 = vector.shape_cast %47 : vector<16x256xbf16> to vector<1x16x256xbf16>
    tpu.vector_store %arg6[%c0_17, %c0_18, %c0_19], %50 {strides = array<i32>} : memref<1x16x256xbf16, #tpu.memory_space<vmem>>, vector<1x16x256xbf16>,
    return
  }
  func.func @transform_0(%arg0: i32, %arg1: i32) -> (i32, i32, i32) {
    %c0_i32 = arith.constant 0 : i32
    %c0_i32_0 = arith.constant 0 : i32
    return %arg0, %arg1, %c0_i32 : i32, i32, i32
  }
  func.func @transform_1(%arg0: i32, %arg1: i32) -> (i32, i32) {
    %c0_i32 = arith.constant 0 : i32
    %c0_i32_0 = arith.constant 0 : i32
    %c0_i32_1 = arith.constant 0 : i32
    return %c0_i32, %c0_i32_0 : i32, i32
  }
  func.func @transform_2(%arg0: i32, %arg1: i32) -> (i32, i32, i32) {
    %c0_i32 = arith.constant 0 : i32
    %c0_i32_0 = arith.constant 0 : i32
    return %arg0, %arg1, %c0_i32 : i32, i32, i32
  }
  func.func @transform_3(%arg0: i32, %arg1: i32) -> (i32, i32, i32) {
    %c0_i32 = arith.constant 0 : i32
    %c0_i32_0 = arith.constant 0 : i32
    return %arg0, %arg1, %c0_i32 : i32, i32, i32
  }
  func.func @transform_4(%arg0: i32, %arg1: i32) -> (i32, i32, i32) {
    %c0_i32 = arith.constant 0 : i32
    %c0_i32_0 = arith.constant 0 : i32
    return %arg0, %arg1, %c0_i32 : i32, i32, i32
  }
}

module attributes {stable_mosaic.version = 11 : i64} {
  func.func @_mm_bias_kernel(%arg0: i32, %arg1: i32, %arg2: i32, %arg3: i32, %arg4: memref<1x16x256xf32, #tpu.memory_space<vmem>>, %arg5: memref<256x256xbf16, #tpu.memory_space<vmem>>, %arg6: memref<1x256xf32, #tpu.memory_space<vmem>>, %arg7: memref<1x16x256xbf16, #tpu.memory_space<vmem>>, %arg8: memref<16x256xf32, #tpu.memory_space<vmem>>) attributes {dimension_semantics = [#tpu.dimension_semantics<parallel>, #tpu.dimension_semantics<parallel>, #tpu.dimension_semantics<parallel>, #tpu.dimension_semantics<arbitrary>], iteration_bounds = array<i64: 2, 1, 1, 1>, scalar_prefetch = 0 : i64, scratch_operands = 1 : i64, tpu.core_type = #tpu.core_type<tc>, window_params = [{transform_indices = @transform_0, window_bounds = array<i64: 1, 16, 256>}, {transform_indices = @transform_1, window_bounds = array<i64: 256, 256>}, {transform_indices = @transform_2, window_bounds = array<i64: 1, 256>}, {transform_indices = @transform_3, window_bounds = array<i64: 1, 16, 256>}]} {
    %c0_i32 = arith.constant 0 : i32
    %0 = arith.cmpi eq, %arg3, %c0_i32 : i32
    %1 = arith.extui %0 : i1 to i32
    %c0_i32_0 = arith.constant 0 : i32
    %2 = arith.cmpi ne, %1, %c0_i32_0 : i32
    scf.if %2 {
      %cst_11 = arith.constant 0.000000e+00 : f32
      %14 = vector.broadcast %cst_11 : f32 to vector<16x256xf32>
      %c0_12 = arith.constant 0 : index
      %c0_13 = arith.constant 0 : index
      %15 = vector.load %arg8[%c0_12, %c0_13] : memref<16x256xf32, #tpu.memory_space<vmem>>, vector<16x256xf32>
      tpu.vector_store %arg8[%c0_12, %c0_13], %14 {strides = array<i32>} : memref<16x256xf32, #tpu.memory_space<vmem>>, vector<16x256xf32>,
    } else {
    }
    %c0 = arith.constant 0 : index
    %c0_1 = arith.constant 0 : index
    %3 = vector.load %arg8[%c0, %c0_1] : memref<16x256xf32, #tpu.memory_space<vmem>>, vector<16x256xf32>
    %c0_2 = arith.constant 0 : index
    %c0_3 = arith.constant 0 : index
    %c0_4 = arith.constant 0 : index
    %4 = vector.load %arg4[%c0_2, %c0_3, %c0_4] : memref<1x16x256xf32, #tpu.memory_space<vmem>>, vector<1x16x256xf32>
    %5 = vector.shape_cast %4 : vector<1x16x256xf32> to vector<16x256xf32>
    %6 = arith.truncf %5 : vector<16x256xf32> to vector<16x256xbf16>
    %c0_5 = arith.constant 0 : index
    %c0_6 = arith.constant 0 : index
    %7 = vector.load %arg5[%c0_5, %c0_6] : memref<256x256xbf16, #tpu.memory_space<vmem>>, vector<256x256xbf16>
    %cst = arith.constant dense<0.000000e+00> : vector<16x256xf32>
    %8 = tpu.matmul %6, %7, %cst {dimension_numbers = #tpu.dot_dimension_numbers<[1], [0], [0], [1], [0, 0, 1, 1], [], []>} : vector<16x256xbf16>, vector<256x256xbf16>, vector<16x256xf32> -> vector<16x256xf32>
    %9 = arith.addf %3, %8 : vector<16x256xf32>
    %c0_7 = arith.constant 0 : index
    %c0_8 = arith.constant 0 : index
    %10 = vector.load %arg8[%c0_7, %c0_8] : memref<16x256xf32, #tpu.memory_space<vmem>>, vector<16x256xf32>
    tpu.vector_store %arg8[%c0_7, %c0_8], %9 {strides = array<i32>} : memref<16x256xf32, #tpu.memory_space<vmem>>, vector<16x256xf32>,
    %c0_i32_9 = arith.constant 0 : i32
    %11 = arith.cmpi eq, %arg3, %c0_i32_9 : i32
    %12 = arith.extui %11 : i1 to i32
    %c0_i32_10 = arith.constant 0 : i32
    %13 = arith.cmpi ne, %12, %c0_i32_10 : i32
    scf.if %13 {
      %c0_11 = arith.constant 0 : index
      %c0_12 = arith.constant 0 : index
      %14 = vector.load %arg8[%c0_11, %c0_12] : memref<16x256xf32, #tpu.memory_space<vmem>>, vector<16x256xf32>
      %c0_13 = arith.constant 0 : index
      %c0_14 = arith.constant 0 : index
      %15 = vector.load %arg6[%c0_13, %c0_14] : memref<1x256xf32, #tpu.memory_space<vmem>>, vector<1x256xf32>
      %16 = vector.broadcast %15 : vector<1x256xf32> to vector<16x256xf32>
      %17 = arith.addf %14, %16 : vector<16x256xf32>
      %18 = arith.truncf %17 : vector<16x256xf32> to vector<16x256xbf16>
      %c0_15 = arith.constant 0 : index
      %c0_16 = arith.constant 0 : index
      %c0_17 = arith.constant 0 : index
      %19 = vector.load %arg7[%c0_15, %c0_16, %c0_17] : memref<1x16x256xbf16, #tpu.memory_space<vmem>>, vector<1x16x256xbf16>
      %20 = vector.shape_cast %19 : vector<1x16x256xbf16> to vector<16x256xbf16>
      %21 = vector.shape_cast %18 : vector<16x256xbf16> to vector<1x16x256xbf16>
      tpu.vector_store %arg7[%c0_15, %c0_16, %c0_17], %21 {strides = array<i32>} : memref<1x16x256xbf16, #tpu.memory_space<vmem>>, vector<1x16x256xbf16>,
    } else {
    }
    return
  }
  func.func @transform_0(%arg0: i32, %arg1: i32, %arg2: i32, %arg3: i32) -> (i32, i32, i32) {
    %c0_i32 = arith.constant 0 : i32
    return %arg0, %arg1, %arg3 : i32, i32, i32
  }
  func.func @transform_1(%arg0: i32, %arg1: i32, %arg2: i32, %arg3: i32) -> (i32, i32) {
    %c0_i32 = arith.constant 0 : i32
    return %arg3, %arg2 : i32, i32
  }
  func.func @transform_2(%arg0: i32, %arg1: i32, %arg2: i32, %arg3: i32) -> (i32, i32) {
    %c0_i32 = arith.constant 0 : i32
    %c0_i32_0 = arith.constant 0 : i32
    return %c0_i32, %arg2 : i32, i32
  }
  func.func @transform_3(%arg0: i32, %arg1: i32, %arg2: i32, %arg3: i32) -> (i32, i32, i32) {
    %c0_i32 = arith.constant 0 : i32
    return %arg0, %arg1, %arg2 : i32, i32, i32
  }
}

module attributes {stable_mosaic.version = 11 : i64} {
  func.func @_mm_res_kernel(%arg0: i32, %arg1: i32, %arg2: i32, %arg3: i32, %arg4: memref<1x16x256xbf16, #tpu.memory_space<vmem>>, %arg5: memref<256x256xbf16, #tpu.memory_space<vmem>>, %arg6: memref<1x256xf32, #tpu.memory_space<vmem>>, %arg7: memref<1x16x256xf32, #tpu.memory_space<vmem>>, %arg8: memref<1x1x256xf32, #tpu.memory_space<vmem>>, %arg9: memref<1x16x256xf32, #tpu.memory_space<vmem>>) attributes {dimension_semantics = [#tpu.dimension_semantics<parallel>, #tpu.dimension_semantics<parallel>, #tpu.dimension_semantics<parallel>, #tpu.dimension_semantics<arbitrary>], iteration_bounds = array<i64: 2, 1, 1, 1>, scalar_prefetch = 0 : i64, scratch_operands = 0 : i64, tpu.core_type = #tpu.core_type<tc>, window_params = [{transform_indices = @transform_0, window_bounds = array<i64: 1, 16, 256>}, {transform_indices = @transform_1, window_bounds = array<i64: 256, 256>}, {transform_indices = @transform_2, window_bounds = array<i64: 1, 256>}, {transform_indices = @transform_3, window_bounds = array<i64: 1, 16, 256>}, {transform_indices = @transform_4, window_bounds = array<i64: 1, 1, 256>}, {transform_indices = @transform_5, window_bounds = array<i64: 1, 16, 256>}]} {
    %c0 = arith.constant 0 : index
    %c0_0 = arith.constant 0 : index
    %c0_1 = arith.constant 0 : index
    %0 = vector.load %arg4[%c0, %c0_0, %c0_1] : memref<1x16x256xbf16, #tpu.memory_space<vmem>>, vector<1x16x256xbf16>
    %1 = vector.shape_cast %0 : vector<1x16x256xbf16> to vector<16x256xbf16>
    %c0_2 = arith.constant 0 : index
    %c0_3 = arith.constant 0 : index
    %2 = vector.load %arg5[%c0_2, %c0_3] : memref<256x256xbf16, #tpu.memory_space<vmem>>, vector<256x256xbf16>
    %cst = arith.constant dense<0.000000e+00> : vector<16x256xf32>
    %3 = tpu.matmul %1, %2, %cst {dimension_numbers = #tpu.dot_dimension_numbers<[1], [0], [0], [1], [0, 0, 1, 1], [], []>} : vector<16x256xbf16>, vector<256x256xbf16>, vector<16x256xf32> -> vector<16x256xf32>
    %c0_i32 = arith.constant 0 : i32
    %4 = arith.cmpi eq, %arg3, %c0_i32 : i32
    %5 = arith.extui %4 : i1 to i32
    %c0_i32_4 = arith.constant 0 : i32
    %6 = arith.cmpi ne, %5, %c0_i32_4 : i32
    scf.if %6 {
      %c0_9 = arith.constant 0 : index
      %c0_10 = arith.constant 0 : index
      %c0_11 = arith.constant 0 : index
      %13 = vector.load %arg9[%c0_9, %c0_10, %c0_11] : memref<1x16x256xf32, #tpu.memory_space<vmem>>, vector<1x16x256xf32>
      %14 = vector.shape_cast %13 : vector<1x16x256xf32> to vector<16x256xf32>
      %15 = vector.shape_cast %3 : vector<16x256xf32> to vector<1x16x256xf32>
      tpu.vector_store %arg9[%c0_9, %c0_10, %c0_11], %15 {strides = array<i32>} : memref<1x16x256xf32, #tpu.memory_space<vmem>>, vector<1x16x256xf32>,
    } else {
    }
    %c0_i32_5 = arith.constant 0 : i32
    %7 = arith.cmpi sgt, %arg3, %c0_i32_5 : i32
    %8 = arith.extui %7 : i1 to i32
    %c0_i32_6 = arith.constant 0 : i32
    %9 = arith.cmpi ne, %8, %c0_i32_6 : i32
    scf.if %9 {
      %c0_9 = arith.constant 0 : index
      %c0_10 = arith.constant 0 : index
      %c0_11 = arith.constant 0 : index
      %13 = vector.load %arg9[%c0_9, %c0_10, %c0_11] : memref<1x16x256xf32, #tpu.memory_space<vmem>>, vector<1x16x256xf32>
      %14 = vector.shape_cast %13 : vector<1x16x256xf32> to vector<16x256xf32>
      %15 = arith.addf %14, %3 : vector<16x256xf32>
      %c0_12 = arith.constant 0 : index
      %c0_13 = arith.constant 0 : index
      %c0_14 = arith.constant 0 : index
      %16 = vector.load %arg9[%c0_12, %c0_13, %c0_14] : memref<1x16x256xf32, #tpu.memory_space<vmem>>, vector<1x16x256xf32>
      %17 = vector.shape_cast %16 : vector<1x16x256xf32> to vector<16x256xf32>
      %18 = vector.shape_cast %15 : vector<16x256xf32> to vector<1x16x256xf32>
      tpu.vector_store %arg9[%c0_12, %c0_13, %c0_14], %18 {strides = array<i32>} : memref<1x16x256xf32, #tpu.memory_space<vmem>>, vector<1x16x256xf32>,
    } else {
    }
    %c0_i32_7 = arith.constant 0 : i32
    %10 = arith.cmpi eq, %arg3, %c0_i32_7 : i32
    %11 = arith.extui %10 : i1 to i32
    %c0_i32_8 = arith.constant 0 : i32
    %12 = arith.cmpi ne, %11, %c0_i32_8 : i32
    scf.if %12 {
      %c0_9 = arith.constant 0 : index
      %c0_10 = arith.constant 0 : index
      %c0_11 = arith.constant 0 : index
      %13 = vector.load %arg9[%c0_9, %c0_10, %c0_11] : memref<1x16x256xf32, #tpu.memory_space<vmem>>, vector<1x16x256xf32>
      %14 = vector.shape_cast %13 : vector<1x16x256xf32> to vector<16x256xf32>
      %c0_12 = arith.constant 0 : index
      %c0_13 = arith.constant 0 : index
      %15 = vector.load %arg6[%c0_12, %c0_13] : memref<1x256xf32, #tpu.memory_space<vmem>>, vector<1x256xf32>
      %16 = vector.broadcast %15 : vector<1x256xf32> to vector<16x256xf32>
      %17 = arith.addf %14, %16 : vector<16x256xf32>
      %c0_14 = arith.constant 0 : index
      %c0_15 = arith.constant 0 : index
      %c0_16 = arith.constant 0 : index
      %18 = vector.load %arg8[%c0_14, %c0_15, %c0_16] : memref<1x1x256xf32, #tpu.memory_space<vmem>>, vector<1x1x256xf32>
      %19 = vector.shape_cast %18 : vector<1x1x256xf32> to vector<1x256xf32>
      %20 = vector.broadcast %19 : vector<1x256xf32> to vector<16x256xf32>
      %21 = arith.mulf %17, %20 : vector<16x256xf32>
      %c0_17 = arith.constant 0 : index
      %c0_18 = arith.constant 0 : index
      %c0_19 = arith.constant 0 : index
      %22 = vector.load %arg7[%c0_17, %c0_18, %c0_19] : memref<1x16x256xf32, #tpu.memory_space<vmem>>, vector<1x16x256xf32>
      %23 = vector.shape_cast %22 : vector<1x16x256xf32> to vector<16x256xf32>
      %24 = arith.addf %23, %21 : vector<16x256xf32>
      %c0_20 = arith.constant 0 : index
      %c0_21 = arith.constant 0 : index
      %c0_22 = arith.constant 0 : index
      %25 = vector.load %arg9[%c0_20, %c0_21, %c0_22] : memref<1x16x256xf32, #tpu.memory_space<vmem>>, vector<1x16x256xf32>
      %26 = vector.shape_cast %25 : vector<1x16x256xf32> to vector<16x256xf32>
      %27 = vector.shape_cast %24 : vector<16x256xf32> to vector<1x16x256xf32>
      tpu.vector_store %arg9[%c0_20, %c0_21, %c0_22], %27 {strides = array<i32>} : memref<1x16x256xf32, #tpu.memory_space<vmem>>, vector<1x16x256xf32>,
    } else {
    }
    return
  }
  func.func @transform_0(%arg0: i32, %arg1: i32, %arg2: i32, %arg3: i32) -> (i32, i32, i32) {
    %c0_i32 = arith.constant 0 : i32
    return %arg0, %arg1, %arg3 : i32, i32, i32
  }
  func.func @transform_1(%arg0: i32, %arg1: i32, %arg2: i32, %arg3: i32) -> (i32, i32) {
    %c0_i32 = arith.constant 0 : i32
    return %arg3, %arg2 : i32, i32
  }
  func.func @transform_2(%arg0: i32, %arg1: i32, %arg2: i32, %arg3: i32) -> (i32, i32) {
    %c0_i32 = arith.constant 0 : i32
    %c0_i32_0 = arith.constant 0 : i32
    return %c0_i32, %arg2 : i32, i32
  }
  func.func @transform_3(%arg0: i32, %arg1: i32, %arg2: i32, %arg3: i32) -> (i32, i32, i32) {
    %c0_i32 = arith.constant 0 : i32
    return %arg0, %arg1, %arg2 : i32, i32, i32
  }
  func.func @transform_4(%arg0: i32, %arg1: i32, %arg2: i32, %arg3: i32) -> (i32, i32, i32) {
    %c0_i32 = arith.constant 0 : i32
    %c0_i32_0 = arith.constant 0 : i32
    return %arg0, %c0_i32, %arg2 : i32, i32, i32
  }
  func.func @transform_5(%arg0: i32, %arg1: i32, %arg2: i32, %arg3: i32) -> (i32, i32, i32) {
    %c0_i32 = arith.constant 0 : i32
    return %arg0, %arg1, %arg2 : i32, i32, i32
  }
}

module attributes {stable_mosaic.version = 11 : i64} {
  func.func @_rms_kernel(%arg0: i32, %arg1: i32, %arg2: memref<1x16x256xbf16, #tpu.memory_space<vmem>>, %arg3: memref<1x256xf32, #tpu.memory_space<vmem>>, %arg4: memref<1x16x256xbf16, #tpu.memory_space<vmem>>) attributes {dimension_semantics = [#tpu.dimension_semantics<parallel>, #tpu.dimension_semantics<parallel>], iteration_bounds = array<i64: 2, 1>, scalar_prefetch = 0 : i64, scratch_operands = 0 : i64, tpu.core_type = #tpu.core_type<tc>, window_params = [{transform_indices = @transform_0, window_bounds = array<i64: 1, 16, 256>}, {pipeline_mode = #tpu.pipeline_mode<synchronous>, transform_indices = @transform_1, window_bounds = array<i64: 1, 256>}, {transform_indices = @transform_2, window_bounds = array<i64: 1, 16, 256>}]} {
    %c0 = arith.constant 0 : index
    %c0_0 = arith.constant 0 : index
    %c0_1 = arith.constant 0 : index
    %0 = vector.load %arg2[%c0, %c0_0, %c0_1] : memref<1x16x256xbf16, #tpu.memory_space<vmem>>, vector<1x16x256xbf16>
    %1 = vector.shape_cast %0 : vector<1x16x256xbf16> to vector<16x256xbf16>
    %2 = arith.extf %1 : vector<16x256xbf16> to vector<16x256xf32>
    %3 = arith.mulf %2, %2 : vector<16x256xf32>
    %cst = arith.constant dense<0.000000e+00> : vector<16xf32>
    %4 = vector.multi_reduction <add>, %3, %cst [1] : vector<16x256xf32> to vector<16xf32>
    %5 = vector.shape_cast %4 : vector<16xf32> to vector<16x1xf32>
    %cst_2 = arith.constant 2.560000e+02 : f32
    %6 = vector.broadcast %cst_2 : f32 to vector<16x1xf32>
    %7 = arith.divf %5, %6 : vector<16x1xf32>
    %cst_3 = arith.constant 9.99999997E-7 : f32
    %8 = vector.broadcast %cst_3 : f32 to vector<16x1xf32>
    %9 = arith.addf %7, %8 : vector<16x1xf32>
    %10 = math.rsqrt %9 : vector<16x1xf32>
    %11 = vector.broadcast %10 : vector<16x1xf32> to vector<16x256xf32>
    %12 = arith.mulf %2, %11 : vector<16x256xf32>
    %c0_4 = arith.constant 0 : index
    %c0_5 = arith.constant 0 : index
    %13 = vector.load %arg3[%c0_4, %c0_5] : memref<1x256xf32, #tpu.memory_space<vmem>>, vector<1x256xf32>
    %14 = vector.broadcast %13 : vector<1x256xf32> to vector<16x256xf32>
    %15 = arith.mulf %12, %14 : vector<16x256xf32>
    %16 = arith.truncf %15 : vector<16x256xf32> to vector<16x256xbf16>
    %c0_6 = arith.constant 0 : index
    %c0_7 = arith.constant 0 : index
    %c0_8 = arith.constant 0 : index
    %17 = vector.load %arg4[%c0_6, %c0_7, %c0_8] : memref<1x16x256xbf16, #tpu.memory_space<vmem>>, vector<1x16x256xbf16>
    %18 = vector.shape_cast %17 : vector<1x16x256xbf16> to vector<16x256xbf16>
    %19 = vector.shape_cast %16 : vector<16x256xbf16> to vector<1x16x256xbf16>
    tpu.vector_store %arg4[%c0_6, %c0_7, %c0_8], %19 {strides = array<i32>} : memref<1x16x256xbf16, #tpu.memory_space<vmem>>, vector<1x16x256xbf16>,
    return
  }
  func.func @transform_0(%arg0: i32, %arg1: i32) -> (i32, i32, i32) {
    %c0_i32 = arith.constant 0 : i32
    %c0_i32_0 = arith.constant 0 : i32
    return %arg0, %arg1, %c0_i32 : i32, i32, i32
  }
  func.func @transform_1(%arg0: i32, %arg1: i32) -> (i32, i32) {
    %c0_i32 = arith.constant 0 : i32
    %c0_i32_0 = arith.constant 0 : i32
    %c0_i32_1 = arith.constant 0 : i32
    return %c0_i32, %c0_i32_0 : i32, i32
  }
  func.func @transform_2(%arg0: i32, %arg1: i32) -> (i32, i32, i32) {
    %c0_i32 = arith.constant 0 : i32
    %c0_i32_0 = arith.constant 0 : i32
    return %arg0, %arg1, %c0_i32 : i32, i32, i32
  }
}

module attributes {stable_mosaic.version = 11 : i64} {
  func.func @_mm_bias_kernel(%arg0: i32, %arg1: i32, %arg2: i32, %arg3: i32, %arg4: memref<1x16x256xf32, #tpu.memory_space<vmem>>, %arg5: memref<256x512xbf16, #tpu.memory_space<vmem>>, %arg6: memref<1x512xf32, #tpu.memory_space<vmem>>, %arg7: memref<1x16x512xbf16, #tpu.memory_space<vmem>>, %arg8: memref<16x512xf32, #tpu.memory_space<vmem>>) attributes {dimension_semantics = [#tpu.dimension_semantics<parallel>, #tpu.dimension_semantics<parallel>, #tpu.dimension_semantics<parallel>, #tpu.dimension_semantics<arbitrary>], iteration_bounds = array<i64: 2, 1, 1, 1>, scalar_prefetch = 0 : i64, scratch_operands = 1 : i64, tpu.core_type = #tpu.core_type<tc>, window_params = [{transform_indices = @transform_0, window_bounds = array<i64: 1, 16, 256>}, {transform_indices = @transform_1, window_bounds = array<i64: 256, 512>}, {transform_indices = @transform_2, window_bounds = array<i64: 1, 512>}, {transform_indices = @transform_3, window_bounds = array<i64: 1, 16, 512>}]} {
    %c0_i32 = arith.constant 0 : i32
    %0 = arith.cmpi eq, %arg3, %c0_i32 : i32
    %1 = arith.extui %0 : i1 to i32
    %c0_i32_0 = arith.constant 0 : i32
    %2 = arith.cmpi ne, %1, %c0_i32_0 : i32
    scf.if %2 {
      %cst_11 = arith.constant 0.000000e+00 : f32
      %14 = vector.broadcast %cst_11 : f32 to vector<16x512xf32>
      %c0_12 = arith.constant 0 : index
      %c0_13 = arith.constant 0 : index
      %15 = vector.load %arg8[%c0_12, %c0_13] : memref<16x512xf32, #tpu.memory_space<vmem>>, vector<16x512xf32>
      tpu.vector_store %arg8[%c0_12, %c0_13], %14 {strides = array<i32>} : memref<16x512xf32, #tpu.memory_space<vmem>>, vector<16x512xf32>,
    } else {
    }
    %c0 = arith.constant 0 : index
    %c0_1 = arith.constant 0 : index
    %3 = vector.load %arg8[%c0, %c0_1] : memref<16x512xf32, #tpu.memory_space<vmem>>, vector<16x512xf32>
    %c0_2 = arith.constant 0 : index
    %c0_3 = arith.constant 0 : index
    %c0_4 = arith.constant 0 : index
    %4 = vector.load %arg4[%c0_2, %c0_3, %c0_4] : memref<1x16x256xf32, #tpu.memory_space<vmem>>, vector<1x16x256xf32>
    %5 = vector.shape_cast %4 : vector<1x16x256xf32> to vector<16x256xf32>
    %6 = arith.truncf %5 : vector<16x256xf32> to vector<16x256xbf16>
    %c0_5 = arith.constant 0 : index
    %c0_6 = arith.constant 0 : index
    %7 = vector.load %arg5[%c0_5, %c0_6] : memref<256x512xbf16, #tpu.memory_space<vmem>>, vector<256x512xbf16>
    %cst = arith.constant dense<0.000000e+00> : vector<16x512xf32>
    %8 = tpu.matmul %6, %7, %cst {dimension_numbers = #tpu.dot_dimension_numbers<[1], [0], [0], [1], [0, 0, 1, 1], [], []>} : vector<16x256xbf16>, vector<256x512xbf16>, vector<16x512xf32> -> vector<16x512xf32>
    %9 = arith.addf %3, %8 : vector<16x512xf32>
    %c0_7 = arith.constant 0 : index
    %c0_8 = arith.constant 0 : index
    %10 = vector.load %arg8[%c0_7, %c0_8] : memref<16x512xf32, #tpu.memory_space<vmem>>, vector<16x512xf32>
    tpu.vector_store %arg8[%c0_7, %c0_8], %9 {strides = array<i32>} : memref<16x512xf32, #tpu.memory_space<vmem>>, vector<16x512xf32>,
    %c0_i32_9 = arith.constant 0 : i32
    %11 = arith.cmpi eq, %arg3, %c0_i32_9 : i32
    %12 = arith.extui %11 : i1 to i32
    %c0_i32_10 = arith.constant 0 : i32
    %13 = arith.cmpi ne, %12, %c0_i32_10 : i32
    scf.if %13 {
      %c0_11 = arith.constant 0 : index
      %c0_12 = arith.constant 0 : index
      %14 = vector.load %arg8[%c0_11, %c0_12] : memref<16x512xf32, #tpu.memory_space<vmem>>, vector<16x512xf32>
      %c0_13 = arith.constant 0 : index
      %c0_14 = arith.constant 0 : index
      %15 = vector.load %arg6[%c0_13, %c0_14] : memref<1x512xf32, #tpu.memory_space<vmem>>, vector<1x512xf32>
      %16 = vector.broadcast %15 : vector<1x512xf32> to vector<16x512xf32>
      %17 = arith.addf %14, %16 : vector<16x512xf32>
      %18 = arith.truncf %17 : vector<16x512xf32> to vector<16x512xbf16>
      %c0_15 = arith.constant 0 : index
      %c0_16 = arith.constant 0 : index
      %c0_17 = arith.constant 0 : index
      %19 = vector.load %arg7[%c0_15, %c0_16, %c0_17] : memref<1x16x512xbf16, #tpu.memory_space<vmem>>, vector<1x16x512xbf16>
      %20 = vector.shape_cast %19 : vector<1x16x512xbf16> to vector<16x512xbf16>
      %21 = vector.shape_cast %18 : vector<16x512xbf16> to vector<1x16x512xbf16>
      tpu.vector_store %arg7[%c0_15, %c0_16, %c0_17], %21 {strides = array<i32>} : memref<1x16x512xbf16, #tpu.memory_space<vmem>>, vector<1x16x512xbf16>,
    } else {
    }
    return
  }
  func.func @transform_0(%arg0: i32, %arg1: i32, %arg2: i32, %arg3: i32) -> (i32, i32, i32) {
    %c0_i32 = arith.constant 0 : i32
    return %arg0, %arg1, %arg3 : i32, i32, i32
  }
  func.func @transform_1(%arg0: i32, %arg1: i32, %arg2: i32, %arg3: i32) -> (i32, i32) {
    %c0_i32 = arith.constant 0 : i32
    return %arg3, %arg2 : i32, i32
  }
  func.func @transform_2(%arg0: i32, %arg1: i32, %arg2: i32, %arg3: i32) -> (i32, i32) {
    %c0_i32 = arith.constant 0 : i32
    %c0_i32_0 = arith.constant 0 : i32
    return %c0_i32, %arg2 : i32, i32
  }
  func.func @transform_3(%arg0: i32, %arg1: i32, %arg2: i32, %arg3: i32) -> (i32, i32, i32) {
    %c0_i32 = arith.constant 0 : i32
    return %arg0, %arg1, %arg2 : i32, i32, i32
  }
}

module attributes {stable_mosaic.version = 11 : i64} {
  func.func @_rms_kernel(%arg0: i32, %arg1: i32, %arg2: memref<1x16x256xbf16, #tpu.memory_space<vmem>>, %arg3: memref<1x256xf32, #tpu.memory_space<vmem>>, %arg4: memref<1x16x256xbf16, #tpu.memory_space<vmem>>) attributes {dimension_semantics = [#tpu.dimension_semantics<parallel>, #tpu.dimension_semantics<parallel>], iteration_bounds = array<i64: 2, 1>, scalar_prefetch = 0 : i64, scratch_operands = 0 : i64, tpu.core_type = #tpu.core_type<tc>, window_params = [{transform_indices = @transform_0, window_bounds = array<i64: 1, 16, 256>}, {pipeline_mode = #tpu.pipeline_mode<synchronous>, transform_indices = @transform_1, window_bounds = array<i64: 1, 256>}, {transform_indices = @transform_2, window_bounds = array<i64: 1, 16, 256>}]} {
    %c0 = arith.constant 0 : index
    %c0_0 = arith.constant 0 : index
    %c0_1 = arith.constant 0 : index
    %0 = vector.load %arg2[%c0, %c0_0, %c0_1] : memref<1x16x256xbf16, #tpu.memory_space<vmem>>, vector<1x16x256xbf16>
    %1 = vector.shape_cast %0 : vector<1x16x256xbf16> to vector<16x256xbf16>
    %2 = arith.extf %1 : vector<16x256xbf16> to vector<16x256xf32>
    %3 = arith.mulf %2, %2 : vector<16x256xf32>
    %cst = arith.constant dense<0.000000e+00> : vector<16xf32>
    %4 = vector.multi_reduction <add>, %3, %cst [1] : vector<16x256xf32> to vector<16xf32>
    %5 = vector.shape_cast %4 : vector<16xf32> to vector<16x1xf32>
    %cst_2 = arith.constant 2.560000e+02 : f32
    %6 = vector.broadcast %cst_2 : f32 to vector<16x1xf32>
    %7 = arith.divf %5, %6 : vector<16x1xf32>
    %cst_3 = arith.constant 9.99999997E-7 : f32
    %8 = vector.broadcast %cst_3 : f32 to vector<16x1xf32>
    %9 = arith.addf %7, %8 : vector<16x1xf32>
    %10 = math.rsqrt %9 : vector<16x1xf32>
    %11 = vector.broadcast %10 : vector<16x1xf32> to vector<16x256xf32>
    %12 = arith.mulf %2, %11 : vector<16x256xf32>
    %c0_4 = arith.constant 0 : index
    %c0_5 = arith.constant 0 : index
    %13 = vector.load %arg3[%c0_4, %c0_5] : memref<1x256xf32, #tpu.memory_space<vmem>>, vector<1x256xf32>
    %14 = vector.broadcast %13 : vector<1x256xf32> to vector<16x256xf32>
    %15 = arith.mulf %12, %14 : vector<16x256xf32>
    %16 = arith.truncf %15 : vector<16x256xf32> to vector<16x256xbf16>
    %c0_6 = arith.constant 0 : index
    %c0_7 = arith.constant 0 : index
    %c0_8 = arith.constant 0 : index
    %17 = vector.load %arg4[%c0_6, %c0_7, %c0_8] : memref<1x16x256xbf16, #tpu.memory_space<vmem>>, vector<1x16x256xbf16>
    %18 = vector.shape_cast %17 : vector<1x16x256xbf16> to vector<16x256xbf16>
    %19 = vector.shape_cast %16 : vector<16x256xbf16> to vector<1x16x256xbf16>
    tpu.vector_store %arg4[%c0_6, %c0_7, %c0_8], %19 {strides = array<i32>} : memref<1x16x256xbf16, #tpu.memory_space<vmem>>, vector<1x16x256xbf16>,
    return
  }
  func.func @transform_0(%arg0: i32, %arg1: i32) -> (i32, i32, i32) {
    %c0_i32 = arith.constant 0 : i32
    %c0_i32_0 = arith.constant 0 : i32
    return %arg0, %arg1, %c0_i32 : i32, i32, i32
  }
  func.func @transform_1(%arg0: i32, %arg1: i32) -> (i32, i32) {
    %c0_i32 = arith.constant 0 : i32
    %c0_i32_0 = arith.constant 0 : i32
    %c0_i32_1 = arith.constant 0 : i32
    return %c0_i32, %c0_i32_0 : i32, i32
  }
  func.func @transform_2(%arg0: i32, %arg1: i32) -> (i32, i32, i32) {
    %c0_i32 = arith.constant 0 : i32
    %c0_i32_0 = arith.constant 0 : i32
    return %arg0, %arg1, %c0_i32 : i32, i32, i32
  }
}

module attributes {stable_mosaic.version = 11 : i64} {
  func.func @_flash_kernel(%arg0: i32, %arg1: i32, %arg2: i32, %arg3: i32, %arg4: memref<2xi32, #tpu.memory_space<smem>>, %arg5: memref<1x16x128xbf16, #tpu.memory_space<vmem>>, %arg6: memref<1x16x128xbf16, #tpu.memory_space<vmem>>, %arg7: memref<1x16x128xbf16, #tpu.memory_space<vmem>>, %arg8: memref<1x16x128xbf16, #tpu.memory_space<vmem>>, %arg9: memref<16x1xf32, #tpu.memory_space<vmem>>, %arg10: memref<16x1xf32, #tpu.memory_space<vmem>>, %arg11: memref<16x128xf32, #tpu.memory_space<vmem>>) attributes {dimension_semantics = [#tpu.dimension_semantics<parallel>, #tpu.dimension_semantics<parallel>, #tpu.dimension_semantics<parallel>, #tpu.dimension_semantics<arbitrary>], iteration_bounds = array<i64: 2, 2, 1, 1>, scalar_prefetch = 1 : i64, scratch_operands = 3 : i64, tpu.core_type = #tpu.core_type<tc>, window_params = [{transform_indices = @transform_0, window_bounds = array<i64: 1, 16, 128>}, {transform_indices = @transform_1, window_bounds = array<i64: 1, 16, 128>}, {transform_indices = @transform_2, window_bounds = array<i64: 1, 16, 128>}, {transform_indices = @transform_3, window_bounds = array<i64: 1, 16, 128>}]} {
    %0 = arith.index_cast %arg0 : i32 to index
    %1 = memref.load %arg4[%0] : memref<2xi32, #tpu.memory_space<smem>>
    %c0_i32 = arith.constant 0 : i32
    %2 = arith.cmpi eq, %arg3, %c0_i32 : i32
    %3 = arith.extui %2 : i1 to i32
    %c0_i32_0 = arith.constant 0 : i32
    %4 = arith.cmpi ne, %3, %c0_i32_0 : i32
    scf.if %4 {
      %cst = arith.constant 0xFF800000 : f32
      %12 = vector.broadcast %cst : f32 to vector<16x1xf32>
      %c0 = arith.constant 0 : index
      %c0_4 = arith.constant 0 : index
      %13 = vector.load %arg9[%c0, %c0_4] : memref<16x1xf32, #tpu.memory_space<vmem>>, vector<16x1xf32>
      tpu.vector_store %arg9[%c0, %c0_4], %12 {strides = array<i32>} : memref<16x1xf32, #tpu.memory_space<vmem>>, vector<16x1xf32>,
      %cst_5 = arith.constant 0.000000e+00 : f32
      %14 = vector.broadcast %cst_5 : f32 to vector<16x1xf32>
      %c0_6 = arith.constant 0 : index
      %c0_7 = arith.constant 0 : index
      %15 = vector.load %arg10[%c0_6, %c0_7] : memref<16x1xf32, #tpu.memory_space<vmem>>, vector<16x1xf32>
      tpu.vector_store %arg10[%c0_6, %c0_7], %14 {strides = array<i32>} : memref<16x1xf32, #tpu.memory_space<vmem>>, vector<16x1xf32>,
      %cst_8 = arith.constant 0.000000e+00 : f32
      %16 = vector.broadcast %cst_8 : f32 to vector<16x128xf32>
      %c0_9 = arith.constant 0 : index
      %c0_10 = arith.constant 0 : index
      %17 = vector.load %arg11[%c0_9, %c0_10] : memref<16x128xf32, #tpu.memory_space<vmem>>, vector<16x128xf32>
      tpu.vector_store %arg11[%c0_9, %c0_10], %16 {strides = array<i32>} : memref<16x128xf32, #tpu.memory_space<vmem>>, vector<16x128xf32>,
    } else {
    }
    %c16_i32 = arith.constant 16 : i32
    %5 = arith.muli %arg3, %c16_i32 : i32
    %6 = arith.cmpi slt, %5, %1 : i32
    %7 = arith.extui %6 : i1 to i32
    %c0_i32_1 = arith.constant 0 : i32
    %8 = arith.cmpi ne, %7, %c0_i32_1 : i32
    scf.if %8 {
      %c0 = arith.constant 0 : index
      %c0_4 = arith.constant 0 : index
      %c0_5 = arith.constant 0 : index
      %12 = vector.load %arg5[%c0, %c0_4, %c0_5] : memref<1x16x128xbf16, #tpu.memory_space<vmem>>, vector<1x16x128xbf16>
      %13 = vector.shape_cast %12 : vector<1x16x128xbf16> to vector<16x128xbf16>
      %c0_6 = arith.constant 0 : index
      %c0_7 = arith.constant 0 : index
      %c0_8 = arith.constant 0 : index
      %14 = vector.load %arg6[%c0_6, %c0_7, %c0_8] : memref<1x16x128xbf16, #tpu.memory_space<vmem>>, vector<1x16x128xbf16>
      %15 = vector.shape_cast %14 : vector<1x16x128xbf16> to vector<16x128xbf16>
      %cst = arith.constant dense<0.000000e+00> : vector<16x16xf32>
      %16 = tpu.matmul %13, %15, %cst {dimension_numbers = #tpu.dot_dimension_numbers<[1], [1], [0], [0], [0, 0, 1, 0], [], []>} : vector<16x128xbf16>, vector<16x128xbf16>, vector<16x16xf32> -> vector<16x16xf32>
      %c16_i32_9 = arith.constant 16 : i32
      %17 = arith.muli %arg3, %c16_i32_9 : i32
      %18 = tpu.iota {dimensions = array<i32: 1>} : vector<16x16xi32>
      %19 = vector.broadcast %17 : i32 to vector<16x16xi32>
      %20 = arith.addi %19, %18 : vector<16x16xi32>
      %21 = vector.broadcast %1 : i32 to vector<16x16xi32>
      %22 = arith.cmpi slt, %20, %21 : vector<16x16xi32>
      %cst_10 = arith.constant -1.000000e+30 : f32
      %23 = vector.broadcast %cst_10 : f32 to vector<16x16xf32>
      %24 = arith.select %22, %16, %23 : vector<16x16xi1>, vector<16x16xf32>
      %c0_11 = arith.constant 0 : index
      %c0_12 = arith.constant 0 : index
      %25 = vector.load %arg9[%c0_11, %c0_12] : memref<16x1xf32, #tpu.memory_space<vmem>>, vector<16x1xf32>
      %cst_13 = arith.constant dense<0xFF800000> : vector<16xf32>
      %26 = vector.multi_reduction <maximumf>, %24, %cst_13 [1] : vector<16x16xf32> to vector<16xf32>
      %27 = vector.shape_cast %26 : vector<16xf32> to vector<16x1xf32>
      %28 = arith.maximumf %25, %27 : vector<16x1xf32>
      %29 = arith.subf %25, %28 : vector<16x1xf32>
      %30 = math.exp %29 : vector<16x1xf32>
      %31 = vector.broadcast %28 : vector<16x1xf32> to vector<16x16xf32>
      %32 = arith.subf %24, %31 : vector<16x16xf32>
      %33 = math.exp %32 : vector<16x16xf32>
      %c0_14 = arith.constant 0 : index
      %c0_15 = arith.constant 0 : index
      %34 = vector.load %arg10[%c0_14, %c0_15] : memref<16x1xf32, #tpu.memory_space<vmem>>, vector<16x1xf32>
      %35 = arith.mulf %30, %34 : vector<16x1xf32>
      %cst_16 = arith.constant dense<0.000000e+00> : vector<16xf32>
      %36 = vector.multi_reduction <add>, %33, %cst_16 [1] : vector<16x16xf32> to vector<16xf32>
      %37 = vector.shape_cast %36 : vector<16xf32> to vector<16x1xf32>
      %38 = arith.addf %35, %37 : vector<16x1xf32>
      %c0_17 = arith.constant 0 : index
      %c0_18 = arith.constant 0 : index
      %39 = vector.load %arg10[%c0_17, %c0_18] : memref<16x1xf32, #tpu.memory_space<vmem>>, vector<16x1xf32>
      tpu.vector_store %arg10[%c0_17, %c0_18], %38 {strides = array<i32>} : memref<16x1xf32, #tpu.memory_space<vmem>>, vector<16x1xf32>,
      %c0_19 = arith.constant 0 : index
      %c0_20 = arith.constant 0 : index
      %40 = vector.load %arg11[%c0_19, %c0_20] : memref<16x128xf32, #tpu.memory_space<vmem>>, vector<16x128xf32>
      %41 = vector.broadcast %30 : vector<16x1xf32> to vector<16x128xf32>
      %42 = arith.mulf %41, %40 : vector<16x128xf32>
      %43 = arith.truncf %33 : vector<16x16xf32> to vector<16x16xbf16>
      %c0_21 = arith.constant 0 : index
      %c0_22 = arith.constant 0 : index
      %c0_23 = arith.constant 0 : index
      %44 = vector.load %arg7[%c0_21, %c0_22, %c0_23] : memref<1x16x128xbf16, #tpu.memory_space<vmem>>, vector<1x16x128xbf16>
      %45 = vector.shape_cast %44 : vector<1x16x128xbf16> to vector<16x128xbf16>
      %cst_24 = arith.constant dense<0.000000e+00> : vector<16x128xf32>
      %46 = tpu.matmul %43, %45, %cst_24 {dimension_numbers = #tpu.dot_dimension_numbers<[1], [0], [0], [1], [0, 0, 1, 1], [], []>} : vector<16x16xbf16>, vector<16x128xbf16>, vector<16x128xf32> -> vector<16x128xf32>
      %47 = arith.addf %42, %46 : vector<16x128xf32>
      %c0_25 = arith.constant 0 : index
      %c0_26 = arith.constant 0 : index
      %48 = vector.load %arg11[%c0_25, %c0_26] : memref<16x128xf32, #tpu.memory_space<vmem>>, vector<16x128xf32>
      tpu.vector_store %arg11[%c0_25, %c0_26], %47 {strides = array<i32>} : memref<16x128xf32, #tpu.memory_space<vmem>>, vector<16x128xf32>,
      %c0_27 = arith.constant 0 : index
      %c0_28 = arith.constant 0 : index
      %49 = vector.load %arg9[%c0_27, %c0_28] : memref<16x1xf32, #tpu.memory_space<vmem>>, vector<16x1xf32>
      tpu.vector_store %arg9[%c0_27, %c0_28], %28 {strides = array<i32>} : memref<16x1xf32, #tpu.memory_space<vmem>>, vector<16x1xf32>,
    } else {
    }
    %c0_i32_2 = arith.constant 0 : i32
    %9 = arith.cmpi eq, %arg3, %c0_i32_2 : i32
    %10 = arith.extui %9 : i1 to i32
    %c0_i32_3 = arith.constant 0 : i32
    %11 = arith.cmpi ne, %10, %c0_i32_3 : i32
    scf.if %11 {
      %c0 = arith.constant 0 : index
      %c0_4 = arith.constant 0 : index
      %12 = vector.load %arg10[%c0, %c0_4] : memref<16x1xf32, #tpu.memory_space<vmem>>, vector<16x1xf32>
      %cst = arith.constant 0.000000e+00 : f32
      %13 = vector.broadcast %cst : f32 to vector<16x1xf32>
      %14 = arith.cmpf ogt, %12, %13 : vector<16x1xf32>
      %cst_5 = arith.constant 1.000000e+00 : f32
      %15 = vector.broadcast %cst_5 : f32 to vector<16x1xf32>
      %16 = arith.select %14, %12, %15 : vector<16x1xi1>, vector<16x1xf32>
      %c0_6 = arith.constant 0 : index
      %c0_7 = arith.constant 0 : index
      %17 = vector.load %arg11[%c0_6, %c0_7] : memref<16x128xf32, #tpu.memory_space<vmem>>, vector<16x128xf32>
      %18 = tpu.reciprocal %16 {approx = true} : vector<16x1xf32> -> vector<16x1xf32>
      %19 = vector.broadcast %18 : vector<16x1xf32> to vector<16x128xf32>
      %20 = arith.mulf %17, %19 : vector<16x128xf32>
      %21 = arith.truncf %20 : vector<16x128xf32> to vector<16x128xbf16>
      %c0_8 = arith.constant 0 : index
      %c0_9 = arith.constant 0 : index
      %c0_10 = arith.constant 0 : index
      %22 = vector.load %arg8[%c0_8, %c0_9, %c0_10] : memref<1x16x128xbf16, #tpu.memory_space<vmem>>, vector<1x16x128xbf16>
      %23 = vector.shape_cast %22 : vector<1x16x128xbf16> to vector<16x128xbf16>
      %24 = vector.shape_cast %21 : vector<16x128xbf16> to vector<1x16x128xbf16>
      tpu.vector_store %arg8[%c0_8, %c0_9, %c0_10], %24 {strides = array<i32>} : memref<1x16x128xbf16, #tpu.memory_space<vmem>>, vector<1x16x128xbf16>,
    } else {
    }
    return
  }
  func.func @transform_0(%arg0: i32, %arg1: i32, %arg2: i32, %arg3: i32, %arg4: memref<2xi32, #tpu.memory_space<smem>>) -> (i32, i32, i32) {
    %c0_i32 = arith.constant 0 : i32
    return %arg0, %arg2, %arg1 : i32, i32, i32
  }
  func.func @transform_1(%arg0: i32, %arg1: i32, %arg2: i32, %arg3: i32, %arg4: memref<2xi32, #tpu.memory_space<smem>>) -> (i32, i32, i32) {
    %c0_i32 = arith.constant 0 : i32
    return %arg0, %arg3, %arg1 : i32, i32, i32
  }
  func.func @transform_2(%arg0: i32, %arg1: i32, %arg2: i32, %arg3: i32, %arg4: memref<2xi32, #tpu.memory_space<smem>>) -> (i32, i32, i32) {
    %c2_i32 = arith.constant 2 : i32
    %0 = arith.addi %c2_i32, %arg1 : i32
    %c0_i32 = arith.constant 0 : i32
    return %arg0, %arg3, %0 : i32, i32, i32
  }
  func.func @transform_3(%arg0: i32, %arg1: i32, %arg2: i32, %arg3: i32, %arg4: memref<2xi32, #tpu.memory_space<smem>>) -> (i32, i32, i32) {
    %c0_i32 = arith.constant 0 : i32
    return %arg0, %arg2, %arg1 : i32, i32, i32
  }
}

module attributes {stable_mosaic.version = 11 : i64} {
  func.func @_mm_res_kernel(%arg0: i32, %arg1: i32, %arg2: i32, %arg3: i32, %arg4: memref<1x16x256xbf16, #tpu.memory_space<vmem>>, %arg5: memref<256x256xbf16, #tpu.memory_space<vmem>>, %arg6: memref<1x256xf32, #tpu.memory_space<vmem>>, %arg7: memref<1x16x256xf32, #tpu.memory_space<vmem>>, %arg8: memref<1x16x256xf32, #tpu.memory_space<vmem>>) attributes {dimension_semantics = [#tpu.dimension_semantics<parallel>, #tpu.dimension_semantics<parallel>, #tpu.dimension_semantics<parallel>, #tpu.dimension_semantics<arbitrary>], iteration_bounds = array<i64: 2, 1, 1, 1>, scalar_prefetch = 0 : i64, scratch_operands = 0 : i64, tpu.core_type = #tpu.core_type<tc>, window_params = [{transform_indices = @transform_0, window_bounds = array<i64: 1, 16, 256>}, {transform_indices = @transform_1, window_bounds = array<i64: 256, 256>}, {transform_indices = @transform_2, window_bounds = array<i64: 1, 256>}, {transform_indices = @transform_3, window_bounds = array<i64: 1, 16, 256>}, {transform_indices = @transform_4, window_bounds = array<i64: 1, 16, 256>}]} {
    %c0 = arith.constant 0 : index
    %c0_0 = arith.constant 0 : index
    %c0_1 = arith.constant 0 : index
    %0 = vector.load %arg4[%c0, %c0_0, %c0_1] : memref<1x16x256xbf16, #tpu.memory_space<vmem>>, vector<1x16x256xbf16>
    %1 = vector.shape_cast %0 : vector<1x16x256xbf16> to vector<16x256xbf16>
    %c0_2 = arith.constant 0 : index
    %c0_3 = arith.constant 0 : index
    %2 = vector.load %arg5[%c0_2, %c0_3] : memref<256x256xbf16, #tpu.memory_space<vmem>>, vector<256x256xbf16>
    %cst = arith.constant dense<0.000000e+00> : vector<16x256xf32>
    %3 = tpu.matmul %1, %2, %cst {dimension_numbers = #tpu.dot_dimension_numbers<[1], [0], [0], [1], [0, 0, 1, 1], [], []>} : vector<16x256xbf16>, vector<256x256xbf16>, vector<16x256xf32> -> vector<16x256xf32>
    %c0_i32 = arith.constant 0 : i32
    %4 = arith.cmpi eq, %arg3, %c0_i32 : i32
    %5 = arith.extui %4 : i1 to i32
    %c0_i32_4 = arith.constant 0 : i32
    %6 = arith.cmpi ne, %5, %c0_i32_4 : i32
    scf.if %6 {
      %c0_9 = arith.constant 0 : index
      %c0_10 = arith.constant 0 : index
      %c0_11 = arith.constant 0 : index
      %13 = vector.load %arg8[%c0_9, %c0_10, %c0_11] : memref<1x16x256xf32, #tpu.memory_space<vmem>>, vector<1x16x256xf32>
      %14 = vector.shape_cast %13 : vector<1x16x256xf32> to vector<16x256xf32>
      %15 = vector.shape_cast %3 : vector<16x256xf32> to vector<1x16x256xf32>
      tpu.vector_store %arg8[%c0_9, %c0_10, %c0_11], %15 {strides = array<i32>} : memref<1x16x256xf32, #tpu.memory_space<vmem>>, vector<1x16x256xf32>,
    } else {
    }
    %c0_i32_5 = arith.constant 0 : i32
    %7 = arith.cmpi sgt, %arg3, %c0_i32_5 : i32
    %8 = arith.extui %7 : i1 to i32
    %c0_i32_6 = arith.constant 0 : i32
    %9 = arith.cmpi ne, %8, %c0_i32_6 : i32
    scf.if %9 {
      %c0_9 = arith.constant 0 : index
      %c0_10 = arith.constant 0 : index
      %c0_11 = arith.constant 0 : index
      %13 = vector.load %arg8[%c0_9, %c0_10, %c0_11] : memref<1x16x256xf32, #tpu.memory_space<vmem>>, vector<1x16x256xf32>
      %14 = vector.shape_cast %13 : vector<1x16x256xf32> to vector<16x256xf32>
      %15 = arith.addf %14, %3 : vector<16x256xf32>
      %c0_12 = arith.constant 0 : index
      %c0_13 = arith.constant 0 : index
      %c0_14 = arith.constant 0 : index
      %16 = vector.load %arg8[%c0_12, %c0_13, %c0_14] : memref<1x16x256xf32, #tpu.memory_space<vmem>>, vector<1x16x256xf32>
      %17 = vector.shape_cast %16 : vector<1x16x256xf32> to vector<16x256xf32>
      %18 = vector.shape_cast %15 : vector<16x256xf32> to vector<1x16x256xf32>
      tpu.vector_store %arg8[%c0_12, %c0_13, %c0_14], %18 {strides = array<i32>} : memref<1x16x256xf32, #tpu.memory_space<vmem>>, vector<1x16x256xf32>,
    } else {
    }
    %c0_i32_7 = arith.constant 0 : i32
    %10 = arith.cmpi eq, %arg3, %c0_i32_7 : i32
    %11 = arith.extui %10 : i1 to i32
    %c0_i32_8 = arith.constant 0 : i32
    %12 = arith.cmpi ne, %11, %c0_i32_8 : i32
    scf.if %12 {
      %c0_9 = arith.constant 0 : index
      %c0_10 = arith.constant 0 : index
      %c0_11 = arith.constant 0 : index
      %13 = vector.load %arg8[%c0_9, %c0_10, %c0_11] : memref<1x16x256xf32, #tpu.memory_space<vmem>>, vector<1x16x256xf32>
      %14 = vector.shape_cast %13 : vector<1x16x256xf32> to vector<16x256xf32>
      %c0_12 = arith.constant 0 : index
      %c0_13 = arith.constant 0 : index
      %15 = vector.load %arg6[%c0_12, %c0_13] : memref<1x256xf32, #tpu.memory_space<vmem>>, vector<1x256xf32>
      %16 = vector.broadcast %15 : vector<1x256xf32> to vector<16x256xf32>
      %17 = arith.addf %14, %16 : vector<16x256xf32>
      %c0_14 = arith.constant 0 : index
      %c0_15 = arith.constant 0 : index
      %c0_16 = arith.constant 0 : index
      %18 = vector.load %arg7[%c0_14, %c0_15, %c0_16] : memref<1x16x256xf32, #tpu.memory_space<vmem>>, vector<1x16x256xf32>
      %19 = vector.shape_cast %18 : vector<1x16x256xf32> to vector<16x256xf32>
      %20 = arith.addf %19, %17 : vector<16x256xf32>
      %c0_17 = arith.constant 0 : index
      %c0_18 = arith.constant 0 : index
      %c0_19 = arith.constant 0 : index
      %21 = vector.load %arg8[%c0_17, %c0_18, %c0_19] : memref<1x16x256xf32, #tpu.memory_space<vmem>>, vector<1x16x256xf32>
      %22 = vector.shape_cast %21 : vector<1x16x256xf32> to vector<16x256xf32>
      %23 = vector.shape_cast %20 : vector<16x256xf32> to vector<1x16x256xf32>
      tpu.vector_store %arg8[%c0_17, %c0_18, %c0_19], %23 {strides = array<i32>} : memref<1x16x256xf32, #tpu.memory_space<vmem>>, vector<1x16x256xf32>,
    } else {
    }
    return
  }
  func.func @transform_0(%arg0: i32, %arg1: i32, %arg2: i32, %arg3: i32) -> (i32, i32, i32) {
    %c0_i32 = arith.constant 0 : i32
    return %arg0, %arg1, %arg3 : i32, i32, i32
  }
  func.func @transform_1(%arg0: i32, %arg1: i32, %arg2: i32, %arg3: i32) -> (i32, i32) {
    %c0_i32 = arith.constant 0 : i32
    return %arg3, %arg2 : i32, i32
  }
  func.func @transform_2(%arg0: i32, %arg1: i32, %arg2: i32, %arg3: i32) -> (i32, i32) {
    %c0_i32 = arith.constant 0 : i32
    %c0_i32_0 = arith.constant 0 : i32
    return %c0_i32, %arg2 : i32, i32
  }
  func.func @transform_3(%arg0: i32, %arg1: i32, %arg2: i32, %arg3: i32) -> (i32, i32, i32) {
    %c0_i32 = arith.constant 0 : i32
    return %arg0, %arg1, %arg2 : i32, i32, i32
  }
  func.func @transform_4(%arg0: i32, %arg1: i32, %arg2: i32, %arg3: i32) -> (i32, i32, i32) {
    %c0_i32 = arith.constant 0 : i32
    return %arg0, %arg1, %arg2 : i32, i32, i32
  }
}

module attributes {stable_mosaic.version = 11 : i64} {
  func.func @_ln_mod_mm_kernel(%arg0: i32, %arg1: i32, %arg2: i32, %arg3: memref<1x16x256xf32, #tpu.memory_space<vmem>>, %arg4: memref<1x1x256xf32, #tpu.memory_space<vmem>>, %arg5: memref<1x1x256xf32, #tpu.memory_space<vmem>>, %arg6: memref<256x512xbf16, #tpu.memory_space<vmem>>, %arg7: memref<1x512xf32, #tpu.memory_space<vmem>>, %arg8: memref<1x16x512xbf16, #tpu.memory_space<vmem>>) attributes {dimension_semantics = [#tpu.dimension_semantics<parallel>, #tpu.dimension_semantics<parallel>, #tpu.dimension_semantics<parallel>], iteration_bounds = array<i64: 2, 1, 1>, scalar_prefetch = 0 : i64, scratch_operands = 0 : i64, tpu.core_type = #tpu.core_type<tc>, window_params = [{transform_indices = @transform_0, window_bounds = array<i64: 1, 16, 256>}, {transform_indices = @transform_1, window_bounds = array<i64: 1, 1, 256>}, {transform_indices = @transform_2, window_bounds = array<i64: 1, 1, 256>}, {transform_indices = @transform_3, window_bounds = array<i64: 256, 512>}, {transform_indices = @transform_4, window_bounds = array<i64: 1, 512>}, {transform_indices = @transform_5, window_bounds = array<i64: 1, 16, 512>}]} {
    %c0 = arith.constant 0 : index
    %c0_0 = arith.constant 0 : index
    %c0_1 = arith.constant 0 : index
    %0 = vector.load %arg3[%c0, %c0_0, %c0_1] : memref<1x16x256xf32, #tpu.memory_space<vmem>>, vector<1x16x256xf32>
    %1 = vector.shape_cast %0 : vector<1x16x256xf32> to vector<16x256xf32>
    %cst = arith.constant dense<0.000000e+00> : vector<16xf32>
    %2 = vector.multi_reduction <add>, %1, %cst [1] : vector<16x256xf32> to vector<16xf32>
    %3 = vector.shape_cast %2 : vector<16xf32> to vector<16x1xf32>
    %cst_2 = arith.constant 2.560000e+02 : f32
    %4 = vector.broadcast %cst_2 : f32 to vector<16x1xf32>
    %5 = arith.divf %3, %4 : vector<16x1xf32>
    %6 = vector.broadcast %5 : vector<16x1xf32> to vector<16x256xf32>
    %7 = arith.subf %1, %6 : vector<16x256xf32>
    %8 = arith.mulf %7, %7 : vector<16x256xf32>
    %cst_3 = arith.constant dense<0.000000e+00> : vector<16xf32>
    %9 = vector.multi_reduction <add>, %8, %cst_3 [1] : vector<16x256xf32> to vector<16xf32>
    %10 = vector.shape_cast %9 : vector<16xf32> to vector<16x1xf32>
    %cst_4 = arith.constant 2.560000e+02 : f32
    %11 = vector.broadcast %cst_4 : f32 to vector<16x1xf32>
    %12 = arith.divf %10, %11 : vector<16x1xf32>
    %cst_5 = arith.constant 9.99999997E-7 : f32
    %13 = vector.broadcast %cst_5 : f32 to vector<16x1xf32>
    %14 = arith.addf %12, %13 : vector<16x1xf32>
    %15 = math.rsqrt %14 : vector<16x1xf32>
    %16 = vector.broadcast %15 : vector<16x1xf32> to vector<16x256xf32>
    %17 = arith.mulf %7, %16 : vector<16x256xf32>
    %c0_6 = arith.constant 0 : index
    %c0_7 = arith.constant 0 : index
    %c0_8 = arith.constant 0 : index
    %18 = vector.load %arg5[%c0_6, %c0_7, %c0_8] : memref<1x1x256xf32, #tpu.memory_space<vmem>>, vector<1x1x256xf32>
    %19 = vector.shape_cast %18 : vector<1x1x256xf32> to vector<1x256xf32>
    %cst_9 = arith.constant 1.000000e+00 : f32
    %20 = vector.broadcast %cst_9 : f32 to vector<1x256xf32>
    %21 = arith.addf %20, %19 : vector<1x256xf32>
    %22 = vector.broadcast %21 : vector<1x256xf32> to vector<16x256xf32>
    %23 = arith.mulf %17, %22 : vector<16x256xf32>
    %c0_10 = arith.constant 0 : index
    %c0_11 = arith.constant 0 : index
    %c0_12 = arith.constant 0 : index
    %24 = vector.load %arg4[%c0_10, %c0_11, %c0_12] : memref<1x1x256xf32, #tpu.memory_space<vmem>>, vector<1x1x256xf32>
    %25 = vector.shape_cast %24 : vector<1x1x256xf32> to vector<1x256xf32>
    %26 = vector.broadcast %25 : vector<1x256xf32> to vector<16x256xf32>
    %27 = arith.addf %23, %26 : vector<16x256xf32>
    %28 = arith.truncf %27 : vector<16x256xf32> to vector<16x256xbf16>
    %c0_13 = arith.constant 0 : index
    %c0_14 = arith.constant 0 : index
    %29 = vector.load %arg6[%c0_13, %c0_14] : memref<256x512xbf16, #tpu.memory_space<vmem>>, vector<256x512xbf16>
    %cst_15 = arith.constant dense<0.000000e+00> : vector<16x512xf32>
    %30 = tpu.matmul %28, %29, %cst_15 {dimension_numbers = #tpu.dot_dimension_numbers<[1], [0], [0], [1], [0, 0, 1, 1], [], []>} : vector<16x256xbf16>, vector<256x512xbf16>, vector<16x512xf32> -> vector<16x512xf32>
    %c0_16 = arith.constant 0 : index
    %c0_17 = arith.constant 0 : index
    %31 = vector.load %arg7[%c0_16, %c0_17] : memref<1x512xf32, #tpu.memory_space<vmem>>, vector<1x512xf32>
    %32 = vector.broadcast %31 : vector<1x512xf32> to vector<16x512xf32>
    %33 = arith.addf %30, %32 : vector<16x512xf32>
    %cst_18 = arith.constant 5.000000e-01 : f32
    %34 = vector.broadcast %cst_18 : f32 to vector<16x512xf32>
    %35 = arith.mulf %34, %33 : vector<16x512xf32>
    %cst_19 = arith.constant 4.471500e-02 : f32
    %36 = vector.broadcast %cst_19 : f32 to vector<16x512xf32>
    %37 = arith.mulf %36, %33 : vector<16x512xf32>
    %38 = arith.mulf %37, %33 : vector<16x512xf32>
    %39 = arith.mulf %38, %33 : vector<16x512xf32>
    %40 = arith.addf %33, %39 : vector<16x512xf32>
    %cst_20 = arith.constant 0.797884583 : f32
    %41 = vector.broadcast %cst_20 : f32 to vector<16x512xf32>
    %42 = arith.mulf %41, %40 : vector<16x512xf32>
    %43 = math.tanh %42 : vector<16x512xf32>
    %cst_21 = arith.constant 1.000000e+00 : f32
    %44 = vector.broadcast %cst_21 : f32 to vector<16x512xf32>
    %45 = arith.addf %44, %43 : vector<16x512xf32>
    %46 = arith.mulf %35, %45 : vector<16x512xf32>
    %47 = arith.truncf %46 : vector<16x512xf32> to vector<16x512xbf16>
    %c0_22 = arith.constant 0 : index
    %c0_23 = arith.constant 0 : index
    %c0_24 = arith.constant 0 : index
    %48 = vector.load %arg8[%c0_22, %c0_23, %c0_24] : memref<1x16x512xbf16, #tpu.memory_space<vmem>>, vector<1x16x512xbf16>
    %49 = vector.shape_cast %48 : vector<1x16x512xbf16> to vector<16x512xbf16>
    %50 = vector.shape_cast %47 : vector<16x512xbf16> to vector<1x16x512xbf16>
    tpu.vector_store %arg8[%c0_22, %c0_23, %c0_24], %50 {strides = array<i32>} : memref<1x16x512xbf16, #tpu.memory_space<vmem>>, vector<1x16x512xbf16>,
    return
  }
  func.func @transform_0(%arg0: i32, %arg1: i32, %arg2: i32) -> (i32, i32, i32) {
    %c0_i32 = arith.constant 0 : i32
    %c0_i32_0 = arith.constant 0 : i32
    return %arg0, %arg1, %c0_i32 : i32, i32, i32
  }
  func.func @transform_1(%arg0: i32, %arg1: i32, %arg2: i32) -> (i32, i32, i32) {
    %c0_i32 = arith.constant 0 : i32
    %c0_i32_0 = arith.constant 0 : i32
    %c0_i32_1 = arith.constant 0 : i32
    return %arg0, %c0_i32, %c0_i32_0 : i32, i32, i32
  }
  func.func @transform_2(%arg0: i32, %arg1: i32, %arg2: i32) -> (i32, i32, i32) {
    %c0_i32 = arith.constant 0 : i32
    %c0_i32_0 = arith.constant 0 : i32
    %c0_i32_1 = arith.constant 0 : i32
    return %arg0, %c0_i32, %c0_i32_0 : i32, i32, i32
  }
  func.func @transform_3(%arg0: i32, %arg1: i32, %arg2: i32) -> (i32, i32) {
    %c0_i32 = arith.constant 0 : i32
    %c0_i32_0 = arith.constant 0 : i32
    return %c0_i32, %arg2 : i32, i32
  }
  func.func @transform_4(%arg0: i32, %arg1: i32, %arg2: i32) -> (i32, i32) {
    %c0_i32 = arith.constant 0 : i32
    %c0_i32_0 = arith.constant 0 : i32
    return %c0_i32, %arg2 : i32, i32
  }
  func.func @transform_5(%arg0: i32, %arg1: i32, %arg2: i32) -> (i32, i32, i32) {
    %c0_i32 = arith.constant 0 : i32
    return %arg0, %arg1, %arg2 : i32, i32, i32
  }
}

module attributes {stable_mosaic.version = 11 : i64} {
  func.func @_mm_res_kernel(%arg0: i32, %arg1: i32, %arg2: i32, %arg3: i32, %arg4: memref<1x16x512xbf16, #tpu.memory_space<vmem>>, %arg5: memref<512x256xbf16, #tpu.memory_space<vmem>>, %arg6: memref<1x256xf32, #tpu.memory_space<vmem>>, %arg7: memref<1x16x256xf32, #tpu.memory_space<vmem>>, %arg8: memref<1x1x256xf32, #tpu.memory_space<vmem>>, %arg9: memref<1x16x256xf32, #tpu.memory_space<vmem>>) attributes {dimension_semantics = [#tpu.dimension_semantics<parallel>, #tpu.dimension_semantics<parallel>, #tpu.dimension_semantics<parallel>, #tpu.dimension_semantics<arbitrary>], iteration_bounds = array<i64: 2, 1, 1, 1>, scalar_prefetch = 0 : i64, scratch_operands = 0 : i64, tpu.core_type = #tpu.core_type<tc>, window_params = [{transform_indices = @transform_0, window_bounds = array<i64: 1, 16, 512>}, {transform_indices = @transform_1, window_bounds = array<i64: 512, 256>}, {transform_indices = @transform_2, window_bounds = array<i64: 1, 256>}, {transform_indices = @transform_3, window_bounds = array<i64: 1, 16, 256>}, {transform_indices = @transform_4, window_bounds = array<i64: 1, 1, 256>}, {transform_indices = @transform_5, window_bounds = array<i64: 1, 16, 256>}]} {
    %c0 = arith.constant 0 : index
    %c0_0 = arith.constant 0 : index
    %c0_1 = arith.constant 0 : index
    %0 = vector.load %arg4[%c0, %c0_0, %c0_1] : memref<1x16x512xbf16, #tpu.memory_space<vmem>>, vector<1x16x512xbf16>
    %1 = vector.shape_cast %0 : vector<1x16x512xbf16> to vector<16x512xbf16>
    %c0_2 = arith.constant 0 : index
    %c0_3 = arith.constant 0 : index
    %2 = vector.load %arg5[%c0_2, %c0_3] : memref<512x256xbf16, #tpu.memory_space<vmem>>, vector<512x256xbf16>
    %cst = arith.constant dense<0.000000e+00> : vector<16x256xf32>
    %3 = tpu.matmul %1, %2, %cst {dimension_numbers = #tpu.dot_dimension_numbers<[1], [0], [0], [1], [0, 0, 1, 1], [], []>} : vector<16x512xbf16>, vector<512x256xbf16>, vector<16x256xf32> -> vector<16x256xf32>
    %c0_i32 = arith.constant 0 : i32
    %4 = arith.cmpi eq, %arg3, %c0_i32 : i32
    %5 = arith.extui %4 : i1 to i32
    %c0_i32_4 = arith.constant 0 : i32
    %6 = arith.cmpi ne, %5, %c0_i32_4 : i32
    scf.if %6 {
      %c0_9 = arith.constant 0 : index
      %c0_10 = arith.constant 0 : index
      %c0_11 = arith.constant 0 : index
      %13 = vector.load %arg9[%c0_9, %c0_10, %c0_11] : memref<1x16x256xf32, #tpu.memory_space<vmem>>, vector<1x16x256xf32>
      %14 = vector.shape_cast %13 : vector<1x16x256xf32> to vector<16x256xf32>
      %15 = vector.shape_cast %3 : vector<16x256xf32> to vector<1x16x256xf32>
      tpu.vector_store %arg9[%c0_9, %c0_10, %c0_11], %15 {strides = array<i32>} : memref<1x16x256xf32, #tpu.memory_space<vmem>>, vector<1x16x256xf32>,
    } else {
    }
    %c0_i32_5 = arith.constant 0 : i32
    %7 = arith.cmpi sgt, %arg3, %c0_i32_5 : i32
    %8 = arith.extui %7 : i1 to i32
    %c0_i32_6 = arith.constant 0 : i32
    %9 = arith.cmpi ne, %8, %c0_i32_6 : i32
    scf.if %9 {
      %c0_9 = arith.constant 0 : index
      %c0_10 = arith.constant 0 : index
      %c0_11 = arith.constant 0 : index
      %13 = vector.load %arg9[%c0_9, %c0_10, %c0_11] : memref<1x16x256xf32, #tpu.memory_space<vmem>>, vector<1x16x256xf32>
      %14 = vector.shape_cast %13 : vector<1x16x256xf32> to vector<16x256xf32>
      %15 = arith.addf %14, %3 : vector<16x256xf32>
      %c0_12 = arith.constant 0 : index
      %c0_13 = arith.constant 0 : index
      %c0_14 = arith.constant 0 : index
      %16 = vector.load %arg9[%c0_12, %c0_13, %c0_14] : memref<1x16x256xf32, #tpu.memory_space<vmem>>, vector<1x16x256xf32>
      %17 = vector.shape_cast %16 : vector<1x16x256xf32> to vector<16x256xf32>
      %18 = vector.shape_cast %15 : vector<16x256xf32> to vector<1x16x256xf32>
      tpu.vector_store %arg9[%c0_12, %c0_13, %c0_14], %18 {strides = array<i32>} : memref<1x16x256xf32, #tpu.memory_space<vmem>>, vector<1x16x256xf32>,
    } else {
    }
    %c0_i32_7 = arith.constant 0 : i32
    %10 = arith.cmpi eq, %arg3, %c0_i32_7 : i32
    %11 = arith.extui %10 : i1 to i32
    %c0_i32_8 = arith.constant 0 : i32
    %12 = arith.cmpi ne, %11, %c0_i32_8 : i32
    scf.if %12 {
      %c0_9 = arith.constant 0 : index
      %c0_10 = arith.constant 0 : index
      %c0_11 = arith.constant 0 : index
      %13 = vector.load %arg9[%c0_9, %c0_10, %c0_11] : memref<1x16x256xf32, #tpu.memory_space<vmem>>, vector<1x16x256xf32>
      %14 = vector.shape_cast %13 : vector<1x16x256xf32> to vector<16x256xf32>
      %c0_12 = arith.constant 0 : index
      %c0_13 = arith.constant 0 : index
      %15 = vector.load %arg6[%c0_12, %c0_13] : memref<1x256xf32, #tpu.memory_space<vmem>>, vector<1x256xf32>
      %16 = vector.broadcast %15 : vector<1x256xf32> to vector<16x256xf32>
      %17 = arith.addf %14, %16 : vector<16x256xf32>
      %c0_14 = arith.constant 0 : index
      %c0_15 = arith.constant 0 : index
      %c0_16 = arith.constant 0 : index
      %18 = vector.load %arg8[%c0_14, %c0_15, %c0_16] : memref<1x1x256xf32, #tpu.memory_space<vmem>>, vector<1x1x256xf32>
      %19 = vector.shape_cast %18 : vector<1x1x256xf32> to vector<1x256xf32>
      %20 = vector.broadcast %19 : vector<1x256xf32> to vector<16x256xf32>
      %21 = arith.mulf %17, %20 : vector<16x256xf32>
      %c0_17 = arith.constant 0 : index
      %c0_18 = arith.constant 0 : index
      %c0_19 = arith.constant 0 : index
      %22 = vector.load %arg7[%c0_17, %c0_18, %c0_19] : memref<1x16x256xf32, #tpu.memory_space<vmem>>, vector<1x16x256xf32>
      %23 = vector.shape_cast %22 : vector<1x16x256xf32> to vector<16x256xf32>
      %24 = arith.addf %23, %21 : vector<16x256xf32>
      %c0_20 = arith.constant 0 : index
      %c0_21 = arith.constant 0 : index
      %c0_22 = arith.constant 0 : index
      %25 = vector.load %arg9[%c0_20, %c0_21, %c0_22] : memref<1x16x256xf32, #tpu.memory_space<vmem>>, vector<1x16x256xf32>
      %26 = vector.shape_cast %25 : vector<1x16x256xf32> to vector<16x256xf32>
      %27 = vector.shape_cast %24 : vector<16x256xf32> to vector<1x16x256xf32>
      tpu.vector_store %arg9[%c0_20, %c0_21, %c0_22], %27 {strides = array<i32>} : memref<1x16x256xf32, #tpu.memory_space<vmem>>, vector<1x16x256xf32>,
    } else {
    }
    return
  }
  func.func @transform_0(%arg0: i32, %arg1: i32, %arg2: i32, %arg3: i32) -> (i32, i32, i32) {
    %c0_i32 = arith.constant 0 : i32
    return %arg0, %arg1, %arg3 : i32, i32, i32
  }
  func.func @transform_1(%arg0: i32, %arg1: i32, %arg2: i32, %arg3: i32) -> (i32, i32) {
    %c0_i32 = arith.constant 0 : i32
    return %arg3, %arg2 : i32, i32
  }
  func.func @transform_2(%arg0: i32, %arg1: i32, %arg2: i32, %arg3: i32) -> (i32, i32) {
    %c0_i32 = arith.constant 0 : i32
    %c0_i32_0 = arith.constant 0 : i32
    return %c0_i32, %arg2 : i32, i32
  }
  func.func @transform_3(%arg0: i32, %arg1: i32, %arg2: i32, %arg3: i32) -> (i32, i32, i32) {
    %c0_i32 = arith.constant 0 : i32
    return %arg0, %arg1, %arg2 : i32, i32, i32
  }
  func.func @transform_4(%arg0: i32, %arg1: i32, %arg2: i32, %arg3: i32) -> (i32, i32, i32) {
    %c0_i32 = arith.constant 0 : i32
    %c0_i32_0 = arith.constant 0 : i32
    return %arg0, %c0_i32, %arg2 : i32, i32, i32
  }
  func.func @transform_5(%arg0: i32, %arg1: i32, %arg2: i32, %arg3: i32) -> (i32, i32, i32) {
    %c0_i32 = arith.constant 0 : i32
    return %arg0, %arg1, %arg2 : i32, i32, i32
  }
}

</mosaic_0001>

<bundles_post_ra>
// kernel: wan_attention_block.15
= control target key start
LH: loop header
LB: loop body
LE: loop exit
PB: predicated region body
PF: predicated region fallthrough
CT: control target
= control target key end

     0   :  { %s745_s15 = smov 0   ;;  %s747_s16 = smov 0   ;;  %s849_s0 = inlined_call_operand.vmem [shape: bf16[2,16,768], index: 0, kind: input, shape index: {}]   ;;  %s850_s1 = inlined_call_operand.vmem [shape: f32[1,256], index: 1, kind: input, shape index: {}]   ;;  %s851_s2 = inlined_call_operand.vmem [shape: f32[2,16,128], index: 2, kind: input, shape index: {}]   ;;  %s852_s3 = inlined_call_operand.vmem [shape: f32[2,16,128], index: 3, kind: input, shape index: {}]   ;;  %s853_s4 = inlined_call_operand.vmem [shape: bf16[2,16,256], index: 4, kind: output, shape index: {}]  }
   0x1   :  { %s749_s17 = smov 0   ;;  %s751_s18 = smov 0  }
   0x2   :  { %s753_s19 = smov 0  }
   0x3 LB: > { %s26_s20 = sadd.s32 1, %s712_s18  ;;  %p42_p1 = scmp.ne.s32.totalorder %s704_s16, %s700_s15  ;;  %s716_s19 = sphi %s753_s19, %s14_s19   ;;  %s712_s18 = sphi %s751_s18, %s861_s18   ;;  %s708_s17 = sphi %s749_s17, %s860_s17   ;;  %s704_s16 = sphi %s747_s16, %s859_s16   ;;  %s700_s15 = sphi %s745_s15, %s858_s15  }
   0x4   : > { %p28_p0 = scmp.ge.s32.totalorder %s26_s20, 2  ;;  %p43_p2 = scmp.eq.s32.totalorder %s716_s19, 0 }
   0x5   : > { %s35_s22 = sadd.s32 1, %s704_s16  ;;  %p610_p5 = scmp.ge.s32.totalorder %s716_s19, 2 }
   0x6   : > { %s863_s20 = smov (%p28_p0, %s26_s20), 0  ;;  %p44_p3 = por %p43_p2, %p42_p1 }
   0x7   : > { %s30_s21 = ssub.s32 %s712_s18, %s863_s20  ;;  %176 = sbr.rel (%p610_p5) target bundleno = 18 (0x12), region = 20 }
   0x8   : > { %p33_p4 = scmp.eq.s32.totalorder %s30_s21, 0 }
   0xa   : > { %s780_s23 = scalar_select %p33_p4, %s704_s16, %s35_s22  }
   0xc   : > { %179 = sbr.rel (!%p44_p3) target bundleno = 18 (0x12), region = 24  ;;  %s181_s24 = sand.u32 (%p44_p3), 1, %s704_s16  }
   0xd   : > { %s612_s25 = smul.u32 (%p44_p3), 48, %s712_s18  ;;  %s611_s26 = sshll.u32 (%p44_p3), %s181_s24, 4 }
   0xe   : > { %s183_s30 = scalar_lea.vmem (%p44_p3), [#allocation2], %s611_s26 }
   0xf   : > { %s512_s29 = scalar_lea.vmem (%p44_p3), %s849_s0, %s612_s25 }
  0x10   : > { %v613_v0 = vld [vmem:[%s512_s29 + $0x8] sm:$0xff] (%p44_p3)  ;;  %v614_v1 = vld [vmem:[%s512_s29 + $0x20] sm:$0xff] (%p44_p3) }
  0x11   : > { %222 = vst [vmem:[%s183_s30] sm:$0xff] %v613_v0  ;;  %224 = vst [vmem:[%s183_s30 + $0x8] sm:$0xff] %v614_v1 }
  0x12 PF: > { %p615_p6 = scmp.ge.s32.totalorder %s716_s19, 1  ;;  %p255_p7 = scmp.lt.s32.totalorder %s716_s19, 3 }
  0x14   : > { %p256_p8 = pnand %p615_p6, %p255_p7 }
  0x15   : > { %s262_s5 = sand.u32 (!%p256_p8), 1, %s700_s15   ;;  %s718_s10 = smov (!%p256_p8), 127  }
  0x16   : > { %259 = sbr.rel (%p256_p8) target bundleno = 342 (0x156), region = 70  ;;  %s616_s6 = sshll.u32 (!%p256_p8), %s262_s5, 4 }
  0x17   : > { %s264_s7 = scalar_lea.vmem (!%p256_p8), [#allocation2], %s616_s6  ;;  %s719_s11 = smov (!%p256_p8), 1  }
  0x18   : > { %p312_p9 = scmp.lt.s32.totalorder (!%p256_p8), %s708_s17, 1 }
  0x1b   : > { %v342_v2 = vld [vmem:[%s264_s7] sm:$0xff]  ;;  %v343_v3 = vld [vmem:[%s264_s7 + $0x8] sm:$0xff]  ;;  %v371_v19 = vlaneseq  ;;  %s865_s17 = smov (!%p312_p9, %s708_s17), 1 }
  0x1c   : > { %v344_v4 = vunpack.c.l.bf16 %v342_v2  ;;  %v345_v5 = vunpack.c.h.bf16 %v342_v2  ;;  %v346_v6 = vunpack.c.l.bf16 %v343_v3  ;;  %v347_v7 = vunpack.c.h.bf16 %v343_v3  ;;  %v369_v24 = vld [vmem:[%s850_s1] sm:$0x3]  ;;  %s796_s12 = sshll.u32 %s865_s17, 4 }
  0x1d   : > { %v372_v21 = vshrl.u32 %v371_v19, 7  ;;  %v390_v40 = vand.u32 127, %v371_v19  ;;  %s319_s15 = scalar_lea.vmem %s851_s2, %s796_s12  ;;  %s329_s24 = scalar_lea.vmem %s852_s3, %s796_s12 }
  0x1e   : > { %v348_v8 = vmul.f32 %v344_v4, %v344_v4  ;;  %v349_v9 = vmul.f32 %v345_v5, %v345_v5  ;;  %v350_v10 = vmul.f32 %v346_v6, %v346_v6  ;;  %v351_v11 = vmul.f32 %v347_v7, %v347_v7  ;;  %v385_v49 = vld [vmem:[%s319_s15] sm:$0xff]  ;;  %v386_v60 = vld [vmem:[%s319_s15 + $0x8] sm:$0xff]  ;;  %s340_s26 = scalar_lea.vmem %s853_s4, %s796_s12 }
  0x1f   : > { %v377_v22 = vsub.s32 1, %v372_v21  ;;  %v373_v23 = vsub.s32 0, %v372_v21  ;;  %v391_v41 = vadd.s32 128, %v390_v40  ;;  %v396_v43 = vand.u32 1, %v390_v40  ;;  %v387_v50 = vld [vmem:[%s329_s24] sm:$0xff]  ;;  %v388_v1 = vld [vmem:[%s329_s24 + $0x8] sm:$0xff] }
  0x20   : > { %v352_v12 = vadd.f32 %v349_v9, %v348_v8  ;;  %v355_v13 = vadd.f32 %v351_v11, %v350_v10  ;;  %vm426_vm0 = vcmp.lt.s32.totalorder %v390_v40, 127  ;;  %vm439_vm1 = vcmp.lt.s32.totalorder %v390_v40, 1 }
  0x21   : > { %v378_v25 = vrot.slane %v369_v24, %v377_v22  ;;  %v374_v26 = vrot.slane %v369_v24, %v373_v23  ;;  %v403_v44 = vand.u32 1, %v391_v41  ;;  %vm806_vm2 = vcmp.eq.s32.totalorder %v396_v43, 0 }
  0x22   : > { %353 = vadd.xlane.f32.xlu0 %v352_v12 }
  0x23   : > { %vm810_vm3 = vcmp.eq.s32.totalorder %v403_v44, 0 }
  0x26   : > { %356 = vadd.xlane.f32.xlu0 %v355_v13 }
  0xab   : > { %v354_v14 = vpop.xlane.xlu0 %353 }
  0xac   : > { %v359_v15 = vmul.f32 0.00390625, %v354_v14 }
  0xae   : > { %v361_v16 = vadd.f32 1e-06, %v359_v15 }
  0xaf   : > { %v357_v17 = vpop.xlane.xlu0 %356 }
  0xb0   : > { %674 = vrsqrt.f32 %v361_v16  ;;  %v360_v18 = vmul.f32 0.00390625, %v357_v17 }
  0xb2   : > { %v362_v20 = vadd.f32 1e-06, %v360_v18 }
  0xb4   : > { %676 = vrsqrt.f32 %v362_v20 }
  0xbd   : > { %v675_v27 = vpop.eup %674 }
  0xbe   : > { %v366_v28 = vmul.f32 %v675_v27, %v345_v5  ;;  %v365_v29 = vmul.f32 %v675_v27, %v344_v4 }
  0xc0   : > { %v382_v30 = vmul.f32 %v378_v25, %v366_v28  ;;  %v381_v31 = vmul.f32 %v374_v26, %v365_v29 }
  0xc1   : > { %v677_v32 = vpop.eup %676 }
  0xc2   : > { %422 = vrot.lane.b32.xlu0 %v382_v30, %s718_s10  ;;  %418 = vrot.lane.b32.xlu1 %v381_v31, %s718_s10  ;;  %v367_v33 = vmul.f32 %v677_v32, %v346_v6  ;;  %v368_v35 = vmul.f32 %v677_v32, %v347_v7  ;;  %v449_v58 = vmul.f32 %v385_v49, %v382_v30 }
  0xc3   : > { %v448_v59 = vmul.f32 %v385_v49, %v381_v31 }
  0xc4   : > { %v383_v34 = vmul.f32 %v374_v26, %v367_v33  ;;  %v384_v36 = vmul.f32 %v378_v25, %v368_v35 }
  0xc6   : > { %420 = vrot.lane.b32.xlu1 %v383_v34, %s718_s10  ;;  %v450_v7 = vmul.f32 %v386_v60, %v383_v34  ;;  %v451_v10 = vmul.f32 %v386_v60, %v384_v36 }
  0xca   : > { %424 = vrot.lane.b32.xlu1 %v384_v36, %s718_s10 }
  0xce   : > { %431 = vrot.lane.b32.xlu1 %v381_v31, %s719_s11 }
  0xd2   : > { %433 = vrot.lane.b32.xlu1 %v383_v34, %s719_s11 }
  0xd6   : > { %435 = vrot.lane.b32.xlu1 %v382_v30, %s719_s11 }
  0xda   : > { %437 = vrot.lane.b32.xlu1 %v384_v36, %s719_s11 }
 0x134   : > { %v419_v37 = vpop.permute.xlu1 %418  ;;  %v423_v46 = vpop.permute.xlu0 %422 }
 0x135   : > { %v427_v52 = vsel %vm426_vm0, %v419_v37, %v423_v46  ;;  %v429_v53 = vsel %vm426_vm0, %v423_v46, %v419_v37 }
 0x138   : > { %v421_v38 = vpop.permute.xlu1 %420 }
 0x13c   : > { %v425_v39 = vpop.permute.xlu1 %424 }
 0x13d   : > { %v428_v63 = vsel %vm426_vm0, %v421_v38, %v425_v39  ;;  %v430_v0 = vsel %vm426_vm0, %v425_v39, %v421_v38 }
 0x140   : > { %v432_v42 = vpop.permute.xlu1 %431 }
 0x144   : > { %v434_v45 = vpop.permute.xlu1 %433 }
 0x148   : > { %v436_v51 = vpop.permute.xlu1 %435 }
 0x149   : > { %v440_v54 = vsel %vm439_vm1, %v432_v42, %v436_v51  ;;  %v442_v55 = vsel %vm439_vm1, %v436_v51, %v432_v42 }
 0x14a   : > { %v444_v56 = vsel %vm806_vm2, %v427_v52, %v442_v55  ;;  %v445_v57 = vsel %vm810_vm3, %v429_v53, %v440_v54 }
 0x14b   : > { %v452_v61 = vmul.f32 %v444_v56, %v387_v50  ;;  %v453_v62 = vmul.f32 %v445_v57, %v387_v50 }
 0x14c   : > { %v438_v2 = vpop.permute.xlu1 %437 }
 0x14d   : > { %v456_v3 = vadd.f32 %v452_v61, %v448_v59  ;;  %v457_v4 = vadd.f32 %v453_v62, %v449_v58  ;;  %v441_v5 = vsel %vm439_vm1, %v434_v45, %v438_v2  ;;  %v443_v6 = vsel %vm439_vm1, %v438_v2, %v434_v45 }
 0x14e   : > { %v446_v8 = vsel %vm806_vm2, %v428_v63, %v443_v6  ;;  %v447_v9 = vsel %vm810_vm3, %v430_v0, %v441_v5 }
 0x14f   : > { %v630_v11 = vpack.c.bf16 %v457_v4, %v456_v3  ;;  %v454_v12 = vmul.f32 %v446_v8, %v388_v1  ;;  %v455_v13 = vmul.f32 %v447_v9, %v388_v1 }
 0x151   : > { %472 = vst [vmem:[%s340_s26] sm:$0xff] %v630_v11  ;;  %v458_v14 = vadd.f32 %v454_v12, %v450_v7  ;;  %v459_v15 = vadd.f32 %v455_v13, %v451_v10 }
 0x153   : > { %v631_v16 = vpack.c.bf16 %v459_v15, %v458_v14 }
 0x155   : > { %473 = vst [vmem:[%s340_s26 + $0x8] sm:$0xff] %v631_v16 }
 0x156 PF: > { %s14_s19 = sadd.s32 1, %s716_s19   ;;  %s858_s15 = smov %s704_s16 }
 0x157   : > { %p11_p10 = scmp.ge.s32.totalorder %s14_s19, 4   ;;  %s859_s16 = smov %s780_s23 }
 0x158   : > { %s860_s17 = smov %s712_s18  ;;  %s861_s18 = smov %s863_s20 }
 0x159   :  { %13 = sbr.rel (!%p11_p10) target bundleno = 3 (0x3), region = 115 }

// kernel: wan_attention_block.14
= control target key start
LH: loop header
LB: loop body
LE: loop exit
PB: predicated region body
PF: predicated region fallthrough
CT: control target
= control target key end

     0   :  { %s742_s15 = smov 0   ;;  %s744_s16 = smov 0   ;;  %s846_s0 = inlined_call_operand.vmem [shape: bf16[2,16,768], index: 0, kind: input, shape index: {}]   ;;  %s847_s1 = inlined_call_operand.vmem [shape: f32[1,256], index: 1, kind: input, shape index: {}]   ;;  %s848_s2 = inlined_call_operand.vmem [shape: f32[2,16,128], index: 2, kind: input, shape index: {}]   ;;  %s849_s3 = inlined_call_operand.vmem [shape: f32[2,16,128], index: 3, kind: input, shape index: {}]   ;;  %s850_s4 = inlined_call_operand.vmem [shape: bf16[2,16,256], index: 4, kind: output, shape index: {}]  }
   0x1   :  { %s746_s17 = smov 0   ;;  %s748_s18 = smov 0  }
   0x2   :  { %s750_s19 = smov 0  }
   0x3 LB: > { %s26_s20 = sadd.s32 1, %s709_s18  ;;  %p42_p1 = scmp.ne.s32.totalorder %s701_s16, %s697_s15  ;;  %s713_s19 = sphi %s750_s19, %s14_s19   ;;  %s709_s18 = sphi %s748_s18, %s858_s18   ;;  %s705_s17 = sphi %s746_s17, %s857_s17   ;;  %s701_s16 = sphi %s744_s16, %s856_s16   ;;  %s697_s15 = sphi %s742_s15, %s855_s15  }
   0x4   : > { %p28_p0 = scmp.ge.s32.totalorder %s26_s20, 2  ;;  %p43_p2 = scmp.eq.s32.totalorder %s713_s19, 0 }
   0x5   : > { %s35_s22 = sadd.s32 1, %s701_s16  ;;  %p608_p5 = scmp.ge.s32.totalorder %s713_s19, 2 }
   0x6   : > { %s860_s20 = smov (%p28_p0, %s26_s20), 0  ;;  %p44_p3 = por %p43_p2, %p42_p1 }
   0x7   : > { %s30_s21 = ssub.s32 %s709_s18, %s860_s20  ;;  %176 = sbr.rel (%p608_p5) target bundleno = 18 (0x12), region = 20 }
   0x8   : > { %p33_p4 = scmp.eq.s32.totalorder %s30_s21, 0 }
   0xa   : > { %s777_s23 = scalar_select %p33_p4, %s701_s16, %s35_s22  }
   0xc   : > { %179 = sbr.rel (!%p44_p3) target bundleno = 18 (0x12), region = 24  ;;  %s181_s24 = sand.u32 (%p44_p3), 1, %s701_s16  }
   0xd   : > { %s628_s25 = smul.u32 (%p44_p3), 48, %s709_s18  ;;  %s609_s26 = sshll.u32 (%p44_p3), %s181_s24, 4 }
   0xe   : > { %s183_s30 = scalar_lea.vmem (%p44_p3), [#allocation2], %s609_s26 }
   0xf   : > { %s189_s29 = scalar_lea.vmem (%p44_p3), %s846_s0, %s628_s25 }
  0x10   : > { %v220_v0 = vld [vmem:[%s189_s29] sm:$0xff] (%p44_p3)  ;;  %v222_v1 = vld [vmem:[%s189_s29 + $0x18] sm:$0xff] (%p44_p3) }
  0x11   : > { %221 = vst [vmem:[%s183_s30] sm:$0xff] %v220_v0  ;;  %223 = vst [vmem:[%s183_s30 + $0x8] sm:$0xff] %v222_v1 }
  0x12 PF: > { %p611_p6 = scmp.ge.s32.totalorder %s713_s19, 1  ;;  %p254_p7 = scmp.lt.s32.totalorder %s713_s19, 3 }
  0x14   : > { %p255_p8 = pnand %p611_p6, %p254_p7 }
  0x15   : > { %s261_s5 = sand.u32 (!%p255_p8), 1, %s697_s15   ;;  %s715_s10 = smov (!%p255_p8), 127  }
  0x16   : > { %258 = sbr.rel (%p255_p8) target bundleno = 342 (0x156), region = 70  ;;  %s612_s6 = sshll.u32 (!%p255_p8), %s261_s5, 4 }
  0x17   : > { %s263_s7 = scalar_lea.vmem (!%p255_p8), [#allocation2], %s612_s6  ;;  %s716_s11 = smov (!%p255_p8), 1  }
  0x18   : > { %p311_p9 = scmp.lt.s32.totalorder (!%p255_p8), %s705_s17, 1 }
  0x1b   : > { %v341_v2 = vld [vmem:[%s263_s7] sm:$0xff]  ;;  %v342_v3 = vld [vmem:[%s263_s7 + $0x8] sm:$0xff]  ;;  %v370_v19 = vlaneseq  ;;  %s862_s17 = smov (!%p311_p9, %s705_s17), 1 }
  0x1c   : > { %v343_v4 = vunpack.c.l.bf16 %v341_v2  ;;  %v344_v5 = vunpack.c.h.bf16 %v341_v2  ;;  %v345_v6 = vunpack.c.l.bf16 %v342_v3  ;;  %v346_v7 = vunpack.c.h.bf16 %v342_v3  ;;  %v368_v24 = vld [vmem:[%s847_s1] sm:$0x3]  ;;  %s793_s12 = sshll.u32 %s862_s17, 4 }
  0x1d   : > { %v371_v21 = vshrl.u32 %v370_v19, 7  ;;  %v389_v40 = vand.u32 127, %v370_v19  ;;  %s318_s15 = scalar_lea.vmem %s848_s2, %s793_s12  ;;  %s328_s24 = scalar_lea.vmem %s849_s3, %s793_s12 }
  0x1e   : > { %v347_v8 = vmul.f32 %v343_v4, %v343_v4  ;;  %v348_v9 = vmul.f32 %v344_v5, %v344_v5  ;;  %v349_v10 = vmul.f32 %v345_v6, %v345_v6  ;;  %v350_v11 = vmul.f32 %v346_v7, %v346_v7  ;;  %v384_v49 = vld [vmem:[%s318_s15] sm:$0xff]  ;;  %v385_v60 = vld [vmem:[%s318_s15 + $0x8] sm:$0xff]  ;;  %s339_s26 = scalar_lea.vmem %s850_s4, %s793_s12 }
  0x1f   : > { %v376_v22 = vsub.s32 1, %v371_v21  ;;  %v372_v23 = vsub.s32 0, %v371_v21  ;;  %v390_v41 = vadd.s32 128, %v389_v40  ;;  %v395_v43 = vand.u32 1, %v389_v40  ;;  %v386_v50 = vld [vmem:[%s328_s24] sm:$0xff]  ;;  %v387_v1 = vld [vmem:[%s328_s24 + $0x8] sm:$0xff] }
  0x20   : > { %v351_v12 = vadd.f32 %v348_v9, %v347_v8  ;;  %v354_v13 = vadd.f32 %v350_v11, %v349_v10  ;;  %vm425_vm0 = vcmp.lt.s32.totalorder %v389_v40, 127  ;;  %vm438_vm1 = vcmp.lt.s32.totalorder %v389_v40, 1 }
  0x21   : > { %v377_v25 = vrot.slane %v368_v24, %v376_v22  ;;  %v373_v26 = vrot.slane %v368_v24, %v372_v23  ;;  %v402_v44 = vand.u32 1, %v390_v41  ;;  %vm803_vm2 = vcmp.eq.s32.totalorder %v395_v43, 0 }
  0x22   : > { %352 = vadd.xlane.f32.xlu0 %v351_v12 }
  0x23   : > { %vm807_vm3 = vcmp.eq.s32.totalorder %v402_v44, 0 }
  0x26   : > { %355 = vadd.xlane.f32.xlu0 %v354_v13 }
  0xab   : > { %v353_v14 = vpop.xlane.xlu0 %352 }
  0xac   : > { %v358_v15 = vmul.f32 0.00390625, %v353_v14 }
  0xae   : > { %v360_v16 = vadd.f32 1e-06, %v358_v15 }
  0xaf   : > { %v356_v17 = vpop.xlane.xlu0 %355 }
  0xb0   : > { %671 = vrsqrt.f32 %v360_v16  ;;  %v359_v18 = vmul.f32 0.00390625, %v356_v17 }
  0xb2   : > { %v361_v20 = vadd.f32 1e-06, %v359_v18 }
  0xb4   : > { %673 = vrsqrt.f32 %v361_v20 }
  0xbd   : > { %v672_v27 = vpop.eup %671 }
  0xbe   : > { %v365_v28 = vmul.f32 %v672_v27, %v344_v5  ;;  %v364_v29 = vmul.f32 %v672_v27, %v343_v4 }
  0xc0   : > { %v381_v30 = vmul.f32 %v377_v25, %v365_v28  ;;  %v380_v31 = vmul.f32 %v373_v26, %v364_v29 }
  0xc1   : > { %v674_v32 = vpop.eup %673 }
  0xc2   : > { %421 = vrot.lane.b32.xlu0 %v381_v30, %s715_s10  ;;  %417 = vrot.lane.b32.xlu1 %v380_v31, %s715_s10  ;;  %v366_v33 = vmul.f32 %v674_v32, %v345_v6  ;;  %v367_v35 = vmul.f32 %v674_v32, %v346_v7  ;;  %v448_v58 = vmul.f32 %v384_v49, %v381_v30 }
  0xc3   : > { %v447_v59 = vmul.f32 %v384_v49, %v380_v31 }
  0xc4   : > { %v382_v34 = vmul.f32 %v373_v26, %v366_v33  ;;  %v383_v36 = vmul.f32 %v377_v25, %v367_v35 }
  0xc6   : > { %419 = vrot.lane.b32.xlu1 %v382_v34, %s715_s10  ;;  %v449_v7 = vmul.f32 %v385_v60, %v382_v34  ;;  %v450_v10 = vmul.f32 %v385_v60, %v383_v36 }
  0xca   : > { %423 = vrot.lane.b32.xlu1 %v383_v36, %s715_s10 }
  0xce   : > { %430 = vrot.lane.b32.xlu1 %v380_v31, %s716_s11 }
  0xd2   : > { %432 = vrot.lane.b32.xlu1 %v382_v34, %s716_s11 }
  0xd6   : > { %434 = vrot.lane.b32.xlu1 %v381_v30, %s716_s11 }
  0xda   : > { %436 = vrot.lane.b32.xlu1 %v383_v36, %s716_s11 }
 0x134   : > { %v418_v37 = vpop.permute.xlu1 %417  ;;  %v422_v46 = vpop.permute.xlu0 %421 }
 0x135   : > { %v426_v52 = vsel %vm425_vm0, %v418_v37, %v422_v46  ;;  %v428_v53 = vsel %vm425_vm0, %v422_v46, %v418_v37 }
 0x138   : > { %v420_v38 = vpop.permute.xlu1 %419 }
 0x13c   : > { %v424_v39 = vpop.permute.xlu1 %423 }
 0x13d   : > { %v427_v63 = vsel %vm425_vm0, %v420_v38, %v424_v39  ;;  %v429_v0 = vsel %vm425_vm0, %v424_v39, %v420_v38 }
 0x140   : > { %v431_v42 = vpop.permute.xlu1 %430 }
 0x144   : > { %v433_v45 = vpop.permute.xlu1 %432 }
 0x148   : > { %v435_v51 = vpop.permute.xlu1 %434 }
 0x149   : > { %v439_v54 = vsel %vm438_vm1, %v431_v42, %v435_v51  ;;  %v441_v55 = vsel %vm438_vm1, %v435_v51, %v431_v42 }
 0x14a   : > { %v443_v56 = vsel %vm803_vm2, %v426_v52, %v441_v55  ;;  %v444_v57 = vsel %vm807_vm3, %v428_v53, %v439_v54 }
 0x14b   : > { %v451_v61 = vmul.f32 %v443_v56, %v386_v50  ;;  %v452_v62 = vmul.f32 %v444_v57, %v386_v50 }
 0x14c   : > { %v437_v2 = vpop.permute.xlu1 %436 }
 0x14d   : > { %v455_v3 = vadd.f32 %v451_v61, %v447_v59  ;;  %v456_v4 = vadd.f32 %v452_v62, %v448_v58  ;;  %v440_v5 = vsel %vm438_vm1, %v433_v45, %v437_v2  ;;  %v442_v6 = vsel %vm438_vm1, %v437_v2, %v433_v45 }
 0x14e   : > { %v445_v8 = vsel %vm803_vm2, %v427_v63, %v442_v6  ;;  %v446_v9 = vsel %vm807_vm3, %v429_v0, %v440_v5 }
 0x14f   : > { %v626_v11 = vpack.c.bf16 %v456_v4, %v455_v3  ;;  %v453_v12 = vmul.f32 %v445_v8, %v387_v1  ;;  %v454_v13 = vmul.f32 %v446_v9, %v387_v1 }
 0x151   : > { %471 = vst [vmem:[%s339_s26] sm:$0xff] %v626_v11  ;;  %v457_v14 = vadd.f32 %v453_v12, %v449_v7  ;;  %v458_v15 = vadd.f32 %v454_v13, %v450_v10 }
 0x153   : > { %v627_v16 = vpack.c.bf16 %v458_v15, %v457_v14 }
 0x155   : > { %472 = vst [vmem:[%s339_s26 + $0x8] sm:$0xff] %v627_v16 }
 0x156 PF: > { %s14_s19 = sadd.s32 1, %s713_s19   ;;  %s855_s15 = smov %s701_s16 }
 0x157   : > { %p11_p10 = scmp.ge.s32.totalorder %s14_s19, 4   ;;  %s856_s16 = smov %s777_s23 }
 0x158   : > { %s857_s17 = smov %s709_s18  ;;  %s858_s18 = smov %s860_s20 }
 0x159   :  { %13 = sbr.rel (!%p11_p10) target bundleno = 3 (0x3), region = 115 }

// kernel: wan_attention_block.16
= control target key start
LH: loop header
LB: loop body
LE: loop exit
PB: predicated region body
PF: predicated region fallthrough
CT: control target
= control target key end

     0   :  { %s1297_s0 = inlined_call_operand.vmem [shape: s32[2], index: 0, kind: input, shape index: {}]   ;;  %s1298_s1 = inlined_call_operand.vmem [shape: bf16[2,16,256], index: 1, kind: input, shape index: {}]   ;;  %s1299_s2 = inlined_call_operand.vmem [shape: bf16[2,16,256], index: 2, kind: input, shape index: {}]   ;;  %s1300_s3 = inlined_call_operand.vmem [shape: bf16[2,16,768], index: 3, kind: input, shape index: {}]   ;;  %s1301_s4 = inlined_call_operand.vmem [shape: bf16[2,16,256], index: 4, kind: output, shape index: {}]  }
   0x1   :  { %s9_s17 = sshll.u32 %s1297_s0, 4  ;;  %s10_s17 = int_to_ptr.vmem [resolvable:$true] %s9_s17 }
   0x2   :  { %s995_s18 = scalar_lea.vmem %s10_s17, 16  ;;  %p1000_p1 = scmp.lt.s32.totalorder %s10_s17, %s10_s17 }
   0x3   :  { %p996_p0 = scmp.ne.s32.totalorder %s10_s17, %s995_s18  ;;  %p1001_p2 = scmp.lt.s32.totalorder %s995_s18, %s995_s18 }
   0x5   :  { %p1002_p3 = por %p1001_p2, %p1000_p1 }
   0x7   :  { %p1003_p4 = pnand %p1002_p3, %p996_p0 }
   0x9   :  { %1006 = shalt.err (!%p1003_p4)  }
   0xa   :  { %s1081_s19 = smov [#allocation6]  }
   0xb   :  { %12 = dma.vmem_to_smem %s10_s17, 16, %s1081_s19, [#allocation5] }
   0xc   :  { %1043 = dma.done.wait [#allocation5], 16 }
   0xd   :  { %1044 = vsyncadd [#allocation5], 4294967280 }
   0xe   :  { %14 = sfence }
   0xf   :  { %s1116_s20 = smov 0   ;;  %s1118_s21 = smov 0  }
  0x10   :  { %s1120_s22 = smov 0   ;;  %s1122_s0 = smov 0  }
  0x11   :  { %s1124_s23 = smov 0   ;;  %s1126_s24 = smov 0  }
  0x12   :  { %s1128_s25 = smov 0   ;;  %s1130_s26 = smov 0  }
  0x13   :  { %s1132_s27 = smov 0  }
  0x14 LB: > { %s843_s28 = sadd.s32 4294967295, %s1079_s27   ;;  %s42_s29 = sadd.s32 1, %s1071_s25  ;;  %s1079_s27 = sphi %s1132_s27, %s20_s27   ;;  %s1075_s26 = sphi %s1130_s26, %s1315_s26   ;;  %s1071_s25 = sphi %s1128_s25, %s1314_s25   ;;  %s1067_s24 = sphi %s1126_s24, %s1313_s24   ;;  %s1063_s23 = sphi %s1124_s23, %s1312_s23   ;;  %s1059_s0 = sphi %s1122_s0, %s1311_s0   ;;  %s1055_s22 = sphi %s1120_s22, %s1310_s22   ;;  %s1051_s21 = sphi %s1118_s21, %s1309_s21   ;;  %s1047_s20 = sphi %s1116_s20, %s1308_s20  }
  0x15   : > { %p44_p5 = scmp.ge.s32.totalorder %s42_s29, 2  ;;  %s46_s30 = sadd.s32 1, %s1075_s26 }
  0x16   : > { %s57_s5 = sadd.s32 1, %s1059_s0  ;;  %p64_p6 = scmp.ne.s32.totalorder %s1059_s0, %s1055_s22 }
  0x17   : > { %s1317_s29 = smov (%p44_p5, %s42_s29), 0  ;;  %s1319_s30 = smov (!%p44_p5, %s46_s30), %s1075_s26 }
  0x18   : > { %s53_s6 = ssub.s32 %s1071_s25, %s1317_s29  ;;  %p65_p7 = scmp.eq.s32.totalorder %s1079_s27, 0 }
  0x19   : > { %p48_p8 = scmp.ge.s32.totalorder %s1319_s30, 2  ;;  %s110_s7 = sadd.s32 4, %s1071_s25 }
  0x1a   : > { %p1179_p9 = por %p65_p7, %p64_p6  ;;  %s111_s9 = sadd.s32 4, %s1317_s29 }
  0x1b   : > { %s1321_s30 = smov (%p48_p8, %s1319_s30), 0  ;;  %s115_s10 = ssub.s32 %s110_s7, %s111_s9 }
  0x1c   : > { %1304 = sst [smem:[#allocation12_spill]] %s1321_s30  ;;  %s119_s11 = sadd.s32 1, %s1051_s21 }
  0x1d   : > { %s50_s12 = ssub.s32 %s1075_s26, %s1321_s30  ;;  %p126_p10 = scmp.ne.s32.totalorder %s1051_s21, %s1047_s20 }
  0x1e   : > { %s54_s13 = sor.u32 %s53_s6, %s50_s12  ;;  %s116_s14 = sor.u32 %s115_s10, %s50_s12 }
  0x1f   : > { %p55_p11 = scmp.eq.s32.totalorder %s54_s13, 0  ;;  %p117_p12 = scmp.eq.s32.totalorder %s116_s14, 0 }
  0x20   : > { %p1193_p13 = por %p126_p10, %p65_p7  ;;  %p160_p0 = scmp.eq.s32.totalorder %s843_s28, 3 }
  0x21   : > { %s1198_s16 = scalar_select %p55_p11, %s1059_s0, %s57_s5  }
  0x22   : > { %s1201_s17 = scalar_select %p117_p12, %s1051_s21, %s119_s11  }
  0x23   : > { %p1206_p1 = por %p160_p0, %p64_p6  ;;  %p846_p2 = scmp.ge.s32.totalorder %s1079_s27, 4 }
  0x25   : > { %182 = sbr.rel (%p846_p2) target bundleno = 64 (0x40), region = 16 }
  0x2a   : > { %185 = sbr.rel (!%p1179_p9) target bundleno = 49 (0x31), region = 20  ;;  %s187_s19 = sand.u32 (%p1179_p9), 1, %s1059_s0  }
  0x2b   : > { %s848_s28 = sshll.u32 (%p1179_p9), %s1075_s26, 2  ;;  %s847_s5 = sshll.u32 (%p1179_p9), %s187_s19, 3 }
  0x2c   : > { %s194_s6 = sadd.s32 (%p1179_p9), %s1071_s25, %s848_s28  ;;  %s189_s12 = scalar_lea.vmem (%p1179_p9), [#allocation7], %s847_s5 }
  0x2d   : > { %s849_s7 = sshll.u32 (%p1179_p9), %s194_s6, 2 }
  0x2e   : > { %s196_s11 = scalar_lea.vmem (%p1179_p9), %s1298_s1, %s849_s7 }
  0x2f   : > { %v213_v0 = vld [vmem:[%s196_s11] sm:$0xf]  ;;  %v215_v1 = vld [vmem:[%s196_s11 + $0x8] sm:$0xf] }
  0x30   : > { %214 = vst [vmem:[%s189_s12] sm:$0xf] %v213_v0  ;;  %216 = vst [vmem:[%s189_s12 + $0x4] sm:$0xf] %v215_v1 }
  0x31 PF: > { %244 = sbr.rel (!%p1179_p9) target bundleno = 56 (0x38), region = 61  ;;  %s246_s13 = sand.u32 (%p1179_p9), 1, %s1059_s0  }
  0x32   : > { %s851_s14 = sshll.u32 (%p1179_p9), %s1075_s26, 2  ;;  %s850_s19 = sshll.u32 (%p1179_p9), %s246_s13, 3 }
  0x33   : > { %s253_s28 = sadd.s32 (%p1179_p9), %s1071_s25, %s851_s14  ;;  %s248_s5 = scalar_lea.vmem (%p1179_p9), [#allocation8], %s850_s19 }
  0x34   : > { %s852_s6 = sshll.u32 (%p1179_p9), %s253_s28, 2 }
  0x35   : > { %s255_s7 = scalar_lea.vmem (%p1179_p9), %s1299_s2, %s852_s6 }
  0x36   : > { %v272_v2 = vld [vmem:[%s255_s7] sm:$0xf]  ;;  %v274_v3 = vld [vmem:[%s255_s7 + $0x8] sm:$0xf] }
  0x37   : > { %273 = vst [vmem:[%s248_s5] sm:$0xf] %v272_v2  ;;  %275 = vst [vmem:[%s248_s5 + $0x4] sm:$0xf] %v274_v3 }
  0x38 PF: > { %303 = sbr.rel (!%p1193_p13) target bundleno = 64 (0x40), region = 102  ;;  %s305_s8 = sand.u32 (%p1193_p13), 1, %s1051_s21  }
  0x39   : > { %s748_s10 = smul.u32 (%p1193_p13), 12, %s1075_s26  ;;  %s853_s11 = sshll.u32 (%p1193_p13), %s305_s8, 3 }
  0x3a   : > { %s307_s19 = scalar_lea.vmem (%p1193_p13), [#allocation9], %s853_s11 }
  0x3b   : > { %s749_s12 = sadd.s32 (%p1193_p13), %s1071_s25, %s748_s10 }
  0x3c   : > { %s854_s13 = sshll.u32 (%p1193_p13), %s749_s12, 2 }
  0x3d   : > { %s751_s28 = scalar_lea.vmem %s1300_s3, %s854_s13 }
  0x3e   : > { %v855_v4 = vld [vmem:[%s751_s28 + $0x10] sm:$0xf]  ;;  %v856_v5 = vld [vmem:[%s751_s28 + $0x28] sm:$0xf] }
  0x3f   : > { %333 = vst [vmem:[%s307_s19] sm:$0xf] %v855_v4  ;;  %335 = vst [vmem:[%s307_s19 + $0x4] sm:$0xf] %v856_v5 }
  0x40 PF: > { %p857_p3 = scmp.ge.s32.totalorder %s1079_s27, 1  ;;  %p362_p4 = scmp.lt.s32.totalorder %s1079_s27, 5 }
  0x42   : > { %p363_p5 = pnand %p857_p3, %p362_p4 }
  0x43   : > { %s369_s15 = sand.u32 (!%p363_p5), 1, %s1055_s22   ;;  %s383_s6 = sand.u32 (!%p363_p5), 1, %s1047_s20  }
  0x44   : > { %366 = sbr.rel (%p363_p5) target bundleno = 932 (0x3a4), region = 143  ;;  %s858_s9 = sshll.u32 (!%p363_p5), %s369_s15, 3 }
  0x45   : > { %s1239_s7 = sshll.u32 (!%p363_p5), %s383_s6, 3  ;;  %s419_s5 = sld [smem:[#allocation6 + %s1067_s24]] (!%p363_p5) }
  0x46   : > { %s371_s22 = scalar_lea.vmem (!%p363_p5), [#allocation7], %s858_s9  ;;  %s378_s20 = scalar_lea.vmem (!%p363_p5), [#allocation8], %s858_s9 }
  0x47   : > { %s385_s8 = scalar_lea.vmem (!%p363_p5), [#allocation9], %s1239_s7  ;;  %s1247_s10 = scalar_lea.vmem (!%p363_p5), [#allocation10], %s858_s9 }
  0x49   : > { %vm424_vm0 = vcmask 7168   ;;  %v1082_v6 = vmov -inf   ;;  %v1083_v7 = vmov 0.0  }
  0x4a   : > { %425 = vst.msk [vmem:[#allocation2] sm:$0xff] %vm424_vm0, %v1082_v6  ;;  %426 = vst.msk [vmem:[#allocation2 + $0x8] sm:$0xff] %vm424_vm0, %v1082_v6 }
  0x4b   : > { %427 = vst.msk [vmem:[#allocation3] sm:$0xff] %vm424_vm0, %v1083_v7  ;;  %428 = vst.msk [vmem:[#allocation3 + $0x8] sm:$0xff] %vm424_vm0, %v1083_v7  ;;  %p863_p6 = scmp.le.s32.totalorder %s419_s5, 0 }
  0x4c   : > { %429 = vst [vmem:[#allocation4] sm:$0xff] %v1083_v7  ;;  %430 = vst [vmem:[#allocation4 + $0x8] sm:$0xff] %v1083_v7 }
  0x4d   : > { %435 = sbr.rel (%p863_p6) target bundleno = 774 (0x306), region = 163 }
  0x52   : > { %v979_v8 = vld [vmem:[%s378_s20] sm:$0xff]   ;;  %v1084_v9 = vmov 0.0   ;;  %vm1085_vm1 = vmmov 0   ;;  %v980_v10 = vld [vmem:[%s371_s22] sm:$0xff]   ;;  %v493_v11 = vlaneseq  ;;  %v497_v13 = vstv %s419_s5 }
  0x53   : > { %886 = vmatprep.subr.bf16.mxu0 %v1084_v9  ;;  %892 = vmatprep.subr.bf16.mxu1 %v1084_v9  ;;  %vm503_vm3 = vcmask 130048   ;;  %v1086_v22 = vmov 0   ;;  %v501_v23 = vld [vmem:[#allocation2] sm:$0xff]  ;;  %v502_v26 = vld [vmem:[#allocation2 + $0x8] sm:$0xff]  ;;  %v981_v31 = vld [vmem:[%s385_s8] sm:$0xff]  }
  0x54   : > { %887 = vmatpush3.bf16.xpose.msra.mxu0 %v979_v8  ;;  %888 = vmatprep.mubr.msk.bf16.mxu0 %vm1085_vm1, %v1084_v9  ;;  %v494_v12 = vand.u32 127, %v493_v11  ;;  %v534_v47 = vld [vmem:[#allocation3] sm:$0xff]  ;;  %v535_v50 = vld [vmem:[#allocation3 + $0x8] sm:$0xff]  ;;  %v549_v55 = vld [vmem:[#allocation4] sm:$0xff] }
  0x55   : > { %894 = vmatprep.mubr.msk.bf16.mxu1 %vm1085_vm1, %v1084_v9  ;;  %977 = vset.pattern.permute.xlu1 %v1086_v22  ;;  %v550_v58 = vld [vmem:[#allocation4 + $0x8] sm:$0xff] }
  0x56   : > { %vm498_vm2 = vcmp.lt.s32.totalorder %v494_v12, %v497_v13  ;;  %978 = vset.pattern.permute.xlu0 %v1086_v22  ;;  %893 = vmatpush3.bf16.msra.mxu1 %v981_v31 }
  0x5b   : > { %889 = vmatmul.mubr.bf16.vlgmr.msra.gmra.mxu0 %v980_v10 }
 0x11b   : > { %v486_v14 = vpop.f32.mrf.mxu0 }
 0x11c   : > { %v499_v15 = vsel %vm498_vm2, %v486_v14, -1e+30 }
 0x11d   : > { %v890_v16 = vpop.f32.mrf.mxu0  ;;  %v504_v17 = vsel %vm503_vm3, %v499_v15, -inf }
 0x11e   : > { %505 = vmax.xlane.f32.xlu0 %v504_v17 }
 0x11f   : > { %v489_v18 = vpop.f32.mrf.mxu0 }
 0x120   : > { %v500_v19 = vsel %vm498_vm2, %v489_v18, -1e+30 }
 0x121   : > { %v891_v20 = vpop.f32.mrf.mxu0  ;;  %v507_v21 = vsel %vm503_vm3, %v500_v19, -inf }
 0x122   : > { %508 = vmax.xlane.f32.xlu0 %v507_v21 }
 0x1a7   : > { %v506_v24 = vpop.xlane.xlu0 %505 }
 0x1a8   : > { %v510_v25 = vmax.f32 %v501_v23, %v506_v24 }
 0x1aa   : > { %v512_v27 = vsub.f32 %v501_v23, %v510_v25  ;;  %620 = vst.msk [vmem:[#allocation2] sm:$0xff] %vm424_vm0, %v510_v25  ;;  %520 = vperm.xlu1 %977, %v510_v25  }
 0x1ab   : > { %v509_v28 = vpop.xlane.xlu0 %508 }
 0x1ac   : > { %v511_v29 = vmax.f32 %v502_v26, %v509_v28  ;;  %v514_v44 = vmul.f32 1.442695, %v512_v27 }
 0x1ae   : > { %v513_v30 = vsub.f32 %v502_v26, %v511_v29  ;;  %621 = vst.msk [vmem:[#allocation2 + $0x8] sm:$0xff] %vm424_vm0, %v511_v29  ;;  %525 = vperm.xlu1 %977, %v511_v29  }
 0x1b0   : > { %v516_v41 = vmul.f32 1.442695, %v513_v30 }
 0x225   : > { %v521_v32 = vpop.permute.xlu1 %520 }
 0x226   : > { %v528_v33 = vsub.f32 %v499_v15, %v521_v32 }
 0x228   : > { %v530_v34 = vmul.f32 1.442695, %v528_v33 }
 0x229   : > { %v526_v35 = vpop.permute.xlu1 %525 }
 0x22a   : > { %982 = vpow2.f32 %v530_v34  ;;  %v529_v36 = vsub.f32 %v500_v19, %v526_v35 }
 0x22c   : > { %v532_v37 = vmul.f32 1.442695, %v529_v36 }
 0x22e   : > { %984 = vpow2.f32 %v532_v37 }
 0x22f   : > { %986 = vpow2.f32 %v516_v41 }
 0x230   : > { %988 = vpow2.f32 %v514_v44 }
 0x237   : > { %v983_v38 = vpop.eup %982 }
 0x238   : > { %v538_v39 = vsel %vm503_vm3, %v983_v38, 0.0 }
 0x239   : > { %539 = vadd.xlane.f32.xlu0 %v538_v39 }
 0x23b   : > { %v985_v40 = vpop.eup %984 }
 0x23c   : > { %v541_v42 = vsel %vm503_vm3, %v985_v40, 0.0  ;;  %v563_v43 = vpack.c.bf16 %v985_v40, %v983_v38  ;;  %v987_v45 = vpop.eup %986 }
 0x23d   : > { %542 = vadd.xlane.f32.xlu1 %v541_v42  ;;  %v989_v46 = vpop.eup %988  ;;  %v537_v52 = vmul.f32 %v987_v45, %v535_v50 }
 0x23e   : > { %895 = vmatmul.mubr.msk.bf16.vlgmr.msra.gmra.mxu1 %vm503_vm3, %v563_v43  ;;  %v536_v48 = vmul.f32 %v989_v46, %v534_v47 }
 0x24e   : > { %558 = vperm.xlu1 %977, %v987_v45  }
 0x24f   : > { %553 = vperm.xlu0 %978, %v989_v46  }
 0x2c2   : > { %v540_v49 = vpop.xlane.xlu0 %539 }
 0x2c3   : > { %v544_v51 = vadd.f32 %v540_v49, %v536_v48 }
 0x2c5   : > { %547 = vst.msk [vmem:[#allocation3] sm:$0xff] %vm424_vm0, %v544_v51 }
 0x2c6   : > { %v543_v53 = vpop.xlane.xlu1 %542 }
 0x2c7   : > { %v545_v54 = vadd.f32 %v543_v53, %v537_v52 }
 0x2c9   : > { %548 = vst.msk [vmem:[#allocation3 + $0x8] sm:$0xff] %vm424_vm0, %v545_v54 }
 0x2ca   : > { %v554_v56 = vpop.permute.xlu0 %553  ;;  %v559_v59 = vpop.permute.xlu1 %558 }
 0x2cb   : > { %v561_v57 = vmul.f32 %v554_v56, %v549_v55  ;;  %v562_v63 = vmul.f32 %v559_v59, %v550_v58 }
 0x2fe   : > { %v609_v60 = vpop.f32.mrf.mxu1 }
 0x2ff   : > { %v616_v61 = vadd.f32 %v609_v60, %v561_v57 }
 0x300   : > { %v896_v62 = vpop.f32.mrf.mxu1 }
 0x301   : > { %618 = vst [vmem:[#allocation4] sm:$0xff] %v616_v61 }
 0x302   : > { %v612_v0 = vpop.f32.mrf.mxu1 }
 0x303   : > { %v617_v1 = vadd.f32 %v612_v0, %v562_v63 }
 0x304   : > { %v897_v2 = vpop.f32.mrf.mxu1 }
 0x305   : > { %619 = vst [vmem:[#allocation4 + $0x8] sm:$0xff] %v617_v1 }
 0x306 PF: > { %v625_v3 = vld [vmem:[#allocation3] sm:$0xff]  ;;  %v626_v4 = vld [vmem:[#allocation3 + $0x8] sm:$0xff]  ;;  %v1087_v5 = vmov 0   ;;  %s871_s11 = sshll.u32 (%p1206_p1), %s1067_s24, 2 }
 0x307   : > { %990 = vset.pattern.permute.xlu0 %v1087_v5  ;;  %vm627_vm4 = vcmp.gt.f32.partialorder %v625_v3, 0.0  ;;  %vm628_vm5 = vcmp.gt.f32.partialorder %v626_v4, 0.0  ;;  %s668_s12 = sadd.s32 (%p1206_p1), %s1063_s23, %s871_s11 }
 0x308   : > { %v629_v6 = vsel %vm627_vm4, %v625_v3, 1.0  ;;  %v630_v7 = vsel %vm628_vm5, %v626_v4, 1.0  ;;  %v631_v11 = vld [vmem:[#allocation4] sm:$0xff]  ;;  %s872_s13 = sshll.u32 (%p1206_p1), %s668_s12, 2 }
 0x309   : > { %991 = vrcp.f32 %v629_v6  ;;  %s670_s28 = scalar_lea.vmem (%p1206_p1), %s1301_s4, %s872_s13 }
 0x30a   : > { %993 = vrcp.f32 %v630_v7 }
 0x30c   : > { %v632_v12 = vld [vmem:[#allocation4 + $0x8] sm:$0xff] }
 0x316   : > { %v992_v8 = vpop.eup %991 }
 0x317   : > { %637 = vperm.xlu0 %990, %v992_v8   ;;  %v994_v9 = vpop.eup %993 }
 0x31b   : > { %642 = vperm.xlu0 %990, %v994_v9  }
 0x392   : > { %v638_v10 = vpop.permute.xlu0 %637 }
 0x393   : > { %v645_v14 = vmul.f32 %v638_v10, %v631_v11 }
 0x396   : > { %v643_v13 = vpop.permute.xlu0 %642 }
 0x397   : > { %v646_v15 = vmul.f32 %v643_v13, %v632_v12  ;;  %663 = sbr.rel (!%p1206_p1) target bundleno = 932 (0x3a4), region = 171 }
 0x399   : > { %v880_v16 = vpack.c.bf16 %v646_v15, %v645_v14 }
 0x39b   : > { %881 = vst [vmem:[%s1247_s10] sm:$0xff] %v880_v16  }
 0x3a2   : > { %v687_v17 = vld [vmem:[%s1247_s10] sm:$0xf]  ;;  %v689_v18 = vld [vmem:[%s1247_s10 + $0x4] sm:$0xf] }
 0x3a3   : > { %688 = vst [vmem:[%s670_s28] sm:$0xf] %v687_v17  ;;  %690 = vst [vmem:[%s670_s28 + $0x8] sm:$0xf] %v689_v18 }
 0x3a4 PF: > { %s20_s27 = sadd.s32 1, %s1079_s27   ;;  %s1307_s18 = sld [smem:[#allocation12_spill]] }
 0x3a5   : > { %p17_p7 = scmp.ge.s32.totalorder %s20_s27, 6   ;;  %s1308_s20 = smov %s1051_s21 }
 0x3a6   : > { %s1309_s21 = smov %s1201_s17  ;;  %s1310_s22 = smov %s1059_s0 }
 0x3a7   : > { %s1311_s0 = smov %s1198_s16  ;;  %s1312_s23 = smov %s1071_s25 }
 0x3a8   : > { %s1313_s24 = smov %s1075_s26  ;;  %s1314_s25 = smov %s1317_s29 }
 0x3a9   :  { %19 = sbr.rel (!%p17_p7) target bundleno = 20 (0x14), region = 259 }
 0x3aa   : > { %s1315_s26 = smov %s1307_s18 }

// kernel: wan_attention_block.13
= control target key start
LH: loop header
LB: loop body
LE: loop exit
PB: predicated region body
PF: predicated region fallthrough
CT: control target
= control target key end

     0   :  { %10 = vsyncpa [#allocation3], 0  ;;  %s1774_s18 = smov 0   ;;  %s1776_s19 = smov 0   ;;  %s1914_s0 = inlined_call_operand.vmem [shape: f32[2,16,256], index: 0, kind: input, shape index: {}]   ;;  %s1915_s1 = inlined_call_operand.vmem [shape: f32[2,1,256], index: 1, kind: input, shape index: {}]   ;;  %s1916_s2 = inlined_call_operand.vmem [shape: f32[2,1,256], index: 2, kind: input, shape index: {}]   ;;  %s1917_s3 = inlined_call_operand.hbm [shape: bf16[256,768], index: 3, kind: input, shape index: {}]   ;;  %s1918_s4 = inlined_call_operand.vmem [shape: f32[1,768], index: 4, kind: input, shape index: {}]   ;;  %s1919_s5 = inlined_call_operand.vmem [shape: bf16[2,16,768], index: 5, kind: output, shape index: {}]  }
   0x1   :  { %s1778_s20 = smov 0  }
   0x2 LB: > { %s1377_s21 = sadd.s32 4294967295, %s1739_s20   ;;  %s35_s22 = sadd.s32 1, %s1735_s19  ;;  %s1739_s20 = sphi %s1778_s20, %s16_s20   ;;  %s1735_s19 = sphi %s1776_s19, %s1923_s19   ;;  %s1731_s18 = sphi %s1774_s18, %s1922_s18  }
   0x3   : > { %p37_p0 = scmp.ge.s32.totalorder %s35_s22, 2  ;;  %p1379_p1 = scmp.ge.s32.totalorder %s1739_s20, 1 }
   0x4   : > { %p202_p2 = scmp.lt.s32.totalorder %s1739_s20, 3  ;;  %p1799_p4 = scmp.eq.s32.totalorder %s1377_s21, 0 }
   0x5   : > { %s1925_s22 = smov (%p37_p0, %s35_s22), 0  ;;  %s1741_s25 = smov [#allocation2]  }
   0x6   : > { %p1795_p3 = pnand %p1379_p1, %p202_p2  ;;  %s217_s26 = sshll.u32 %s1741_s25, 4  ;;  %s218_s26 = int_to_ptr.vmem [resolvable:$true] %s217_s26 }
   0x7   : > { %s1698_s27 = scalar_lea.vmem %s218_s26, 12288  ;;  %p1706_p11 = scmp.lt.s32.totalorder %s218_s26, %s218_s26 }
   0x8   : > { %p1506_p5 = pneg %p1795_p3  ;;  %p1699_p8 = scmp.ne.s32.totalorder %s218_s26, %s1698_s27 }
   0x9   : > { %p1707_p12 = scmp.lt.s32.totalorder %s1698_s27, %s1698_s27 }
   0xa   : > { %p1507_p6 = pnand %p1799_p4, %p1506_p5 }
   0xb   : > { %p1708_p13 = por %p1707_p12, %p1706_p11 }
   0xc   : > { %p1689_p7 = pneg %p1507_p6 }
   0xe   : > { %p1701_p9 = pnand %p1699_p8, %p1689_p7 }
  0x10   : > { %p1702_p10 = pneg %p1701_p9 }
  0x12   : > { %p1709_p0 = pnand %p1708_p13, %p1702_p10 }
  0x14   : > { %1712 = shalt.err (!%p1709_p0)
}
  0x15   : > { %s1742_s28 = smov 384   ;;  %s1743_s29 = smov 24  }
  0x16   : > { %1509 = dma.hbm_to_vmem [thread:$0]  (!%p1507_p6), %s1917_s3, 12288, %s218_s26, [#allocation3], %s1742_s28, %s1742_s28, %s1743_s29  }
  0x17   : > { %269 = sbr.rel (%p1795_p3) target bundleno = 620 (0x26c), region = 40 }
  0x1c   : > { %1726 = dma.done.wait (%p1799_p4), [#allocation3], 12288  }
  0x1d   : > { %1728 = vsyncadd (%p1799_p4), [#allocation3], 4294955008  ;;  %p324_p1 = scmp.lt.s32.totalorder %s1731_s18, 1  ;;  %v1539_v6 = vld [vmem:[#allocation2 + $0x154] ss:$24 sps:$4 sm:$0xff]  }
  0x1e   : > { %v1541_v7 = vld [vmem:[#allocation2 + $0x150] ss:$24 sps:$4 sm:$0xff]   ;;  %v1542_v8 = vld [vmem:[#allocation2 + $0x15c] ss:$24 sps:$4 sm:$0xff]   ;;  %1044 = vmatprep.subr.bf16.mxu0 %v1539_v6  ;;  %v1548_v11 = vld [vmem:[#allocation2 + $0x12c] ss:$24 sps:$4 sm:$0xff]  }
  0x1f   : > { %s1927_s18 = smov (!%p324_p1, %s1731_s18), 1  ;;  %v1544_v9 = vld [vmem:[#allocation2 + $0x158] ss:$24 sps:$4 sm:$0xff]   ;;  %v1545_v10 = vld [vmem:[#allocation2 + $0x124] ss:$24 sps:$4 sm:$0xff]   ;;  %1087 = vmatprep.subr.bf16.mxu1 %v1542_v8  ;;  %1045 = vmatpush1.bf16.msra.mxu0 %v1541_v7 }
  0x20   : > { %s1494_s7 = sshll.u32 %s1927_s18, 5  ;;  %1088 = vmatpush1.bf16.msra.mxu1 %v1544_v9  ;;  %v1547_v12 = vld [vmem:[#allocation2 + $0x120] ss:$24 sps:$4 sm:$0xff]   ;;  %1046 = vmatprep.subr.bf16.mxu0 %v1545_v10  ;;  %v1551_v14 = vld [vmem:[#allocation2 + $0xf4] ss:$24 sps:$4 sm:$0xff]   ;;  %s1387_s11 = sshll.u32 %s1927_s18, 1 }
  0x21   : > { %s332_s10 = scalar_lea.vmem %s1914_s0, %s1494_s7  ;;  %v1550_v13 = vld [vmem:[#allocation2 + $0x128] ss:$24 sps:$4 sm:$0xff]   ;;  %1089 = vmatprep.subr.bf16.mxu1 %v1548_v11  ;;  %v1554_v15 = vld [vmem:[#allocation2 + $0xfc] ss:$24 sps:$4 sm:$0xff]   ;;  %v1556_v17 = vld [vmem:[#allocation2 + $0xf8] ss:$24 sps:$4 sm:$0xff]   ;;  %s341_s14 = scalar_lea.vmem %s1916_s2, %s1387_s11 }
  0x22   : > { %v1824_v0 = vld [vmem:[%s332_s10] sm:$0xff]  ;;  %v1826_v1 = vld [vmem:[%s332_s10 + $0x8] sm:$0xff]  ;;  %v1828_v2 = vld [vmem:[%s332_s10 + $0x10] sm:$0xff]  ;;  %s337_s17 = scalar_lea.vmem %s1915_s1, %s1387_s11  ;;  %s1501_s24 = smul.u32 48, %s1927_s18 }
  0x23   : > { %v368_v3 = vadd.f32 %v1826_v1, %v1824_v0  ;;  %v1832_v4 = vld [vmem:[%s332_s10 + $0x18] sm:$0xff]  ;;  %1047 = vmatpush1.bf16.msra.mxu0 %v1547_v12  ;;  %v1553_v16 = vld [vmem:[#allocation2 + $0xf0] ss:$24 sps:$4 sm:$0xff]   ;;  %v1560_v19 = vld [vmem:[#allocation2 + $0xcc] ss:$24 sps:$4 sm:$0xff]  }
  0x24   : > { %v371_v5 = vadd.f32 %v1832_v4, %v1828_v2  ;;  %1090 = vmatpush1.bf16.msra.mxu1 %v1550_v13  ;;  %1048 = vmatprep.subr.bf16.mxu0 %v1551_v14  ;;  %v1557_v18 = vld [vmem:[#allocation2 + $0xc4] ss:$24 sps:$4 sm:$0xff]   ;;  %v1559_v20 = vld [vmem:[#allocation2 + $0xc0] ss:$24 sps:$4 sm:$0xff]   ;;  %v1563_v22 = vld [vmem:[#allocation2 + $0x94] ss:$24 sps:$4 sm:$0xff]   ;;  %s1895_s27 = scalar_lea.vmem %s1919_s5, %s1501_s24 }
  0x25   : > { %369 = vadd.xlane.f32.xlu0 %v368_v3  ;;  %1091 = vmatprep.subr.bf16.mxu1 %v1554_v15  ;;  %v1562_v21 = vld [vmem:[#allocation2 + $0xc8] ss:$24 sps:$4 sm:$0xff]   ;;  %v1566_v23 = vld [vmem:[#allocation2 + $0x9c] ss:$24 sps:$4 sm:$0xff]   ;;  %v1568_v25 = vld [vmem:[#allocation2 + $0x98] ss:$24 sps:$4 sm:$0xff]  }
  0x26   : > { %v1565_v24 = vld [vmem:[#allocation2 + $0x90] ss:$24 sps:$4 sm:$0xff]   ;;  %v1569_v26 = vld [vmem:[#allocation2 + $0x64] ss:$24 sps:$4 sm:$0xff]   ;;  %v1571_v28 = vld [vmem:[#allocation2 + $0x60] ss:$24 sps:$4 sm:$0xff]  }
  0x27   : > { %1049 = vmatpush1.bf16.msra.mxu0 %v1553_v16  ;;  %v1572_v27 = vld [vmem:[#allocation2 + $0x6c] ss:$24 sps:$4 sm:$0xff]   ;;  %v1574_v29 = vld [vmem:[#allocation2 + $0x68] ss:$24 sps:$4 sm:$0xff]   ;;  %v1578_v31 = vld [vmem:[#allocation2 + $0x3c] ss:$24 sps:$4 sm:$0xff]  }
  0x28   : > { %1092 = vmatpush1.bf16.msra.mxu1 %v1556_v17  ;;  %1050 = vmatprep.subr.bf16.mxu0 %v1557_v18  ;;  %v1575_v30 = vld [vmem:[#allocation2 + $0x34] ss:$24 sps:$4 sm:$0xff]   ;;  %v1577_v32 = vld [vmem:[#allocation2 + $0x30] ss:$24 sps:$4 sm:$0xff]   ;;  %v1581_v34 = vld [vmem:[#allocation2 + $0x4] ss:$24 sps:$4 sm:$0xff]  }
  0x29   : > { %372 = vadd.xlane.f32.xlu0 %v371_v5  ;;  %1093 = vmatprep.subr.bf16.mxu1 %v1560_v19  ;;  %v1580_v33 = vld [vmem:[#allocation2 + $0x38] ss:$24 sps:$4 sm:$0xff]   ;;  %v1584_v35 = vld [vmem:[#allocation2 + $0xc] ss:$24 sps:$4 sm:$0xff]   ;;  %v1586_v37 = vld [vmem:[#allocation2 + $0x8] ss:$24 sps:$4 sm:$0xff]  }
  0x2a   : > { %v1583_v36 = vld [vmem:[#allocation2] ss:$24 sps:$4 sm:$0xff]   ;;  %v1587_v38 = vld [vmem:[#allocation2 + $0x2d4] ss:$24 sps:$4 sm:$0xff]   ;;  %v1589_v40 = vld [vmem:[#allocation2 + $0x2d0] ss:$24 sps:$4 sm:$0xff]  }
  0x2b   : > { %1051 = vmatpush1.bf16.msra.mxu0 %v1559_v20  ;;  %v1590_v39 = vld [vmem:[#allocation2 + $0x2dc] ss:$24 sps:$4 sm:$0xff]   ;;  %v1592_v55 = vld [vmem:[#allocation2 + $0x2d8] ss:$24 sps:$4 sm:$0xff]   ;;  %v1596_v58 = vld [vmem:[#allocation2 + $0x2ac] ss:$24 sps:$4 sm:$0xff]  }
  0x2c   : > { %1094 = vmatpush1.bf16.msra.mxu1 %v1562_v21  ;;  %1052 = vmatprep.subr.bf16.mxu0 %v1563_v22  ;;  %v1593_v56 = vld [vmem:[#allocation2 + $0x2a4] ss:$24 sps:$4 sm:$0xff]   ;;  %v1595_v57 = vld [vmem:[#allocation2 + $0x2a0] ss:$24 sps:$4 sm:$0xff]   ;;  %v1599_v60 = vld [vmem:[#allocation2 + $0x274] ss:$24 sps:$4 sm:$0xff]  }
  0x2d   : > { %1095 = vmatprep.subr.bf16.mxu1 %v1566_v23  ;;  %v1598_v59 = vld [vmem:[#allocation2 + $0x2a8] ss:$24 sps:$4 sm:$0xff]   ;;  %v1602_v62 = vld [vmem:[#allocation2 + $0x27c] ss:$24 sps:$4 sm:$0xff]   ;;  %v1604_v63 = vld [vmem:[#allocation2 + $0x278] ss:$24 sps:$4 sm:$0xff]  }
  0x2e   : > { %v1601_v61 = vld [vmem:[#allocation2 + $0x270] ss:$24 sps:$4 sm:$0xff]   ;;  %v1614_v5 = vld [vmem:[#allocation2 + $0x21c] ss:$24 sps:$4 sm:$0xff]   ;;  %v1620_v9 = vld [vmem:[#allocation2 + $0x1ec] ss:$24 sps:$4 sm:$0xff]  }
  0x2f   : > { %1053 = vmatpush1.bf16.msra.mxu0 %v1565_v24  ;;  %v1610_v3 = vld [vmem:[#allocation2 + $0x248] ss:$24 sps:$4 sm:$0xff]   ;;  %v1616_v7 = vld [vmem:[#allocation2 + $0x218] ss:$24 sps:$4 sm:$0xff]   ;;  %v1617_v8 = vld [vmem:[#allocation2 + $0x1e4] ss:$24 sps:$4 sm:$0xff]  }
  0x30   : > { %1096 = vmatpush1.bf16.msra.mxu1 %v1568_v25  ;;  %1054 = vmatprep.subr.bf16.mxu0 %v1569_v26  ;;  %v1613_v6 = vld [vmem:[#allocation2 + $0x210] ss:$24 sps:$4 sm:$0xff]   ;;  %v1619_v10 = vld [vmem:[#allocation2 + $0x1e0] ss:$24 sps:$4 sm:$0xff]   ;;  %v1623_v12 = vld [vmem:[#allocation2 + $0x1b4] ss:$24 sps:$4 sm:$0xff]  }
  0x31   : > { %1097 = vmatprep.subr.bf16.mxu1 %v1572_v27  ;;  %v1622_v11 = vld [vmem:[#allocation2 + $0x1e8] ss:$24 sps:$4 sm:$0xff]   ;;  %v1626_v13 = vld [vmem:[#allocation2 + $0x1bc] ss:$24 sps:$4 sm:$0xff]   ;;  %v1628_v15 = vld [vmem:[#allocation2 + $0x1b8] ss:$24 sps:$4 sm:$0xff]   ;;  %v404_v27 = vlaneseq }
  0x32   : > { %v1625_v14 = vld [vmem:[#allocation2 + $0x1b0] ss:$24 sps:$4 sm:$0xff]   ;;  %v1629_v16 = vld [vmem:[#allocation2 + $0x184] ss:$24 sps:$4 sm:$0xff]   ;;  %v1631_v18 = vld [vmem:[#allocation2 + $0x180] ss:$24 sps:$4 sm:$0xff]  }
  0x33   : > { %1055 = vmatpush1.bf16.msra.mxu0 %v1571_v28  ;;  %v1632_v17 = vld [vmem:[#allocation2 + $0x18c] ss:$24 sps:$4 sm:$0xff]   ;;  %v1634_v19 = vld [vmem:[#allocation2 + $0x188] ss:$24 sps:$4 sm:$0xff]   ;;  %v1860_v28 = vshrl.u32 %v404_v27, 7 }
  0x34   : > { %1098 = vmatpush1.bf16.msra.mxu1 %v1574_v29  ;;  %1056 = vmatprep.subr.bf16.mxu0 %v1575_v30  ;;  %v1637_v20 = vld [vmem:[#allocation2 + $0x164] ss:$24 sps:$4 sm:$0xff]   ;;  %v401_v29 = vld [vmem:[%s341_s14] sm:$0x3] }
  0x35   : > { %1099 = vmatprep.subr.bf16.mxu1 %v1578_v31  ;;  %v402_v30 = vadd.f32 1.0, %v401_v29  ;;  %v1863_v31 = vsub.s32 1, %v1860_v28 }
  0x37   : > { %1057 = vmatpush1.bf16.msra.mxu0 %v1577_v32  ;;  %v1866_v32 = vsub.s32 0, %v1860_v28 }
  0x38   : > { %1100 = vmatpush1.bf16.msra.mxu1 %v1580_v33  ;;  %1058 = vmatprep.subr.bf16.mxu0 %v1581_v34 }
  0x39   : > { %1101 = vmatprep.subr.bf16.mxu1 %v1584_v35  ;;  %v411_v35 = vrot.slane %v402_v30, %v1863_v31 }
  0x3b   : > { %1059 = vmatpush1.bf16.msra.mxu0 %v1583_v36  ;;  %v418_v36 = vld [vmem:[%s337_s17] sm:$0x3] }
  0x3c   : > { %1102 = vmatpush1.bf16.msra.mxu1 %v1586_v37  ;;  %1060 = vmatprep.subr.bf16.mxu0 %v1587_v38  ;;  %v407_v38 = vrot.slane %v402_v30, %v1866_v32 }
  0x3d   : > { %1103 = vmatprep.subr.bf16.mxu1 %v1590_v39 }
  0x3f   : > { %1061 = vmatpush2.bf16.msra.mxu0 %v1589_v40  ;;  %v427_v40 = vrot.slane %v418_v36, %v1863_v31 }
  0x40   : > { %1104 = vmatpush2.bf16.msra.mxu1 %v1592_v55  ;;  %1062 = vmatprep.subr.bf16.mxu0 %v1593_v56  ;;  %v1635_v55 = vld [vmem:[#allocation2 + $0x160] ss:$24 sps:$4 sm:$0xff]  }
  0x41   : > { %1105 = vmatprep.subr.bf16.mxu1 %v1596_v58  ;;  %v1641_v58 = vld [vmem:[#allocation2 + $0x100] ss:$24 sps:$4 sm:$0xff]  }
  0x43   : > { %1063 = vmatpush2.bf16.msra.mxu0 %v1595_v57  ;;  %v1640_v57 = vld [vmem:[#allocation2 + $0x134] ss:$24 sps:$4 sm:$0xff]  }
  0x44   : > { %1106 = vmatpush2.bf16.msra.mxu1 %v1598_v59  ;;  %1064 = vmatprep.subr.bf16.mxu0 %v1599_v60  ;;  %v1646_v59 = vld [vmem:[#allocation2 + $0xd4] ss:$24 sps:$4 sm:$0xff]   ;;  %v1644_v60 = vld [vmem:[#allocation2 + $0xd0] ss:$24 sps:$4 sm:$0xff]  }
  0x45   : > { %1107 = vmatprep.subr.bf16.mxu1 %v1602_v62  ;;  %v1647_v62 = vld [vmem:[#allocation2 + $0xa0] ss:$24 sps:$4 sm:$0xff]  }
  0x47   : > { %1065 = vmatpush2.bf16.msra.mxu0 %v1601_v61  ;;  %v1649_v61 = vld [vmem:[#allocation2 + $0xa4] ss:$24 sps:$4 sm:$0xff]  }
  0x48   : > { %1108 = vmatpush2.bf16.msra.mxu1 %v1604_v63  ;;  %v1652_v63 = vld [vmem:[#allocation2 + $0x74] ss:$24 sps:$4 sm:$0xff]  }
  0xae   : > { %v370_v41 = vpop.xlane.xlu0 %369 }
  0xaf   : > { %v375_v42 = vmul.f32 0.00390625, %v370_v41  ;;  %v423_v41 = vrot.slane %v418_v36, %v1866_v32 }
  0xb1   : > { %v1837_v43 = vsub.f32 %v1824_v0, %v375_v42  ;;  %v1840_v44 = vsub.f32 %v1826_v1, %v375_v42  ;;  %v1605_v0 = vld [vmem:[#allocation2 + $0x244] ss:$24 sps:$4 sm:$0xff]   ;;  %v1607_v1 = vld [vmem:[#allocation2 + $0x240] ss:$24 sps:$4 sm:$0xff]  }
  0xb2   : > { %v373_v45 = vpop.xlane.xlu0 %372  ;;  %1066 = vmatprep.subr.bf16.mxu0 %v1605_v0  ;;  %v1650_v0 = vld [vmem:[#allocation2 + $0x70] ss:$24 sps:$4 sm:$0xff]  }
  0xb3   : > { %v376_v46 = vmul.f32 0.00390625, %v373_v45  ;;  %v381_v47 = vmul.f32 %v1837_v43, %v1837_v43  ;;  %v382_v48 = vmul.f32 %v1840_v44, %v1840_v44  ;;  %1067 = vmatpush2.bf16.msra.mxu0 %v1607_v1  ;;  %v1655_v1 = vld [vmem:[#allocation2 + $0x44] ss:$24 sps:$4 sm:$0xff]  }
  0xb5   : > { %v1847_v49 = vsub.f32 %v1828_v2, %v376_v46  ;;  %v1850_v50 = vsub.f32 %v1832_v4, %v376_v46  ;;  %v385_v51 = vadd.f32 %v382_v48, %v381_v47  ;;  %v1608_v2 = vld [vmem:[#allocation2 + $0x24c] ss:$24 sps:$4 sm:$0xff]  }
  0xb6   : > { %v1611_v4 = vld [vmem:[#allocation2 + $0x214] ss:$24 sps:$4 sm:$0xff]   ;;  %1109 = vmatprep.subr.bf16.mxu1 %v1608_v2  ;;  %v1653_v2 = vld [vmem:[#allocation2 + $0x40] ss:$24 sps:$4 sm:$0xff]  }
  0xb7   : > { %386 = vadd.xlane.f32.xlu1 %v385_v51  ;;  %v383_v52 = vmul.f32 %v1847_v49, %v1847_v49  ;;  %v384_v53 = vmul.f32 %v1850_v50, %v1850_v50  ;;  %1110 = vmatpush2.bf16.msra.mxu1 %v1610_v3  ;;  %v1658_v3 = vld [vmem:[#allocation2 + $0x14] ss:$24 sps:$4 sm:$0xff]  }
  0xb8   : > { %1068 = vmatprep.subr.bf16.mxu0 %v1611_v4  ;;  %1111 = vmatprep.subr.bf16.mxu1 %v1614_v5  ;;  %v1656_v4 = vld [vmem:[#allocation2 + $0x10] ss:$24 sps:$4 sm:$0xff]   ;;  %v1661_v5 = vld [vmem:[#allocation2 + $0x2e4] ss:$24 sps:$4 sm:$0xff]  }
  0xb9   : > { %v388_v54 = vadd.f32 %v384_v53, %v383_v52  ;;  %1069 = vmatpush2.bf16.msra.mxu0 %v1613_v6  ;;  %v1659_v6 = vld [vmem:[#allocation2 + $0x2e0] ss:$24 sps:$4 sm:$0xff]  }
  0xba   : > { %1070 = vmatprep.subr.bf16.mxu0 %v1617_v8  ;;  %v1662_v8 = vld [vmem:[#allocation2 + $0x2b0] ss:$24 sps:$4 sm:$0xff]  }
  0xbb   : > { %389 = vadd.xlane.f32.xlu1 %v388_v54  ;;  %1112 = vmatpush2.bf16.msra.mxu1 %v1616_v7  ;;  %v1664_v7 = vld [vmem:[#allocation2 + $0x2b4] ss:$24 sps:$4 sm:$0xff]  }
  0xbc   : > { %1113 = vmatprep.subr.bf16.mxu1 %v1620_v9  ;;  %v1667_v9 = vld [vmem:[#allocation2 + $0x284] ss:$24 sps:$4 sm:$0xff]  }
  0xbd   : > { %1071 = vmatpush2.bf16.msra.mxu0 %v1619_v10  ;;  %v1665_v10 = vld [vmem:[#allocation2 + $0x280] ss:$24 sps:$4 sm:$0xff]  }
  0xbe   : > { %1072 = vmatprep.subr.bf16.mxu0 %v1623_v12  ;;  %v1668_v12 = vld [vmem:[#allocation2 + $0x250] ss:$24 sps:$4 sm:$0xff]  }
  0xbf   : > { %1114 = vmatpush2.bf16.msra.mxu1 %v1622_v11  ;;  %v1670_v11 = vld [vmem:[#allocation2 + $0x254] ss:$24 sps:$4 sm:$0xff]  }
  0xc0   : > { %1115 = vmatprep.subr.bf16.mxu1 %v1626_v13  ;;  %v1673_v13 = vld [vmem:[#allocation2 + $0x224] ss:$24 sps:$4 sm:$0xff]  }
  0xc1   : > { %1073 = vmatpush2.bf16.msra.mxu0 %v1625_v14  ;;  %v1671_v14 = vld [vmem:[#allocation2 + $0x220] ss:$24 sps:$4 sm:$0xff]  }
  0xc2   : > { %1074 = vmatprep.subr.bf16.mxu0 %v1629_v16  ;;  %v1674_v16 = vld [vmem:[#allocation2 + $0x1f0] ss:$24 sps:$4 sm:$0xff]  }
  0xc3   : > { %1116 = vmatpush2.bf16.msra.mxu1 %v1628_v15  ;;  %v1676_v15 = vld [vmem:[#allocation2 + $0x1f4] ss:$24 sps:$4 sm:$0xff]  }
  0xc4   : > { %1117 = vmatprep.subr.bf16.mxu1 %v1632_v17  ;;  %v1679_v17 = vld [vmem:[#allocation2 + $0x1c4] ss:$24 sps:$4 sm:$0xff]  }
  0xc5   : > { %1075 = vmatpush2.bf16.msra.mxu0 %v1631_v18  ;;  %v1677_v18 = vld [vmem:[#allocation2 + $0x1c0] ss:$24 sps:$4 sm:$0xff]  }
  0xc6   : > { %1130 = vmatprep.subr.bf16.mxu0 %v1637_v20  ;;  %v1680_v20 = vld [vmem:[#allocation2 + $0x190] ss:$24 sps:$4 sm:$0xff]  }
  0xc7   : > { %1118 = vmatpush2.bf16.msra.mxu1 %v1634_v19  ;;  %v1682_v19 = vld [vmem:[#allocation2 + $0x194] ss:$24 sps:$4 sm:$0xff]  }
 0x140   : > { %v387_v21 = vpop.xlane.xlu1 %386 }
 0x141   : > { %v391_v22 = vmul.f32 0.00390625, %v387_v21  ;;  %v544_v21 = vsub.s32 2, %v1860_v28 }
 0x143   : > { %v393_v23 = vadd.f32 1e-06, %v391_v22  ;;  %v548_v22 = vsub.s32 3, %v1860_v28 }
 0x144   : > { %v390_v24 = vpop.xlane.xlu1 %389 }
 0x145   : > { %1683 = vrsqrt.f32 %v393_v23  ;;  %v392_v25 = vmul.f32 0.00390625, %v390_v24  ;;  %v532_v23 = vld [vmem:[%s1918_s4] sm:$0x3f] }
 0x146   : > { %v537_v24 = vrot.slane %v532_v23, %v1866_v32  ;;  %v549_v27 = vrot.slane %v532_v23, %v548_v22 }
 0x147   : > { %v394_v26 = vadd.f32 1e-06, %v392_v25  ;;  %v545_v25 = vrot.slane %v532_v23, %v544_v21 }
 0x149   : > { %1685 = vrsqrt.f32 %v394_v26  ;;  %v541_v26 = vrot.slane %v532_v23, %v1863_v31 }
 0x152   : > { %v1684_v33 = vpop.eup %1683 }
 0x153   : > { %v398_v34 = vmul.f32 %v1684_v33, %v1840_v44  ;;  %v397_v37 = vmul.f32 %v1684_v33, %v1837_v43 }
 0x155   : > { %v415_v45 = vmul.f32 %v411_v35, %v398_v34  ;;  %v414_v47 = vmul.f32 %v407_v38, %v397_v37 }
 0x156   : > { %v1686_v39 = vpop.eup %1685 }
 0x157   : > { %v400_v42 = vmul.f32 %v1686_v39, %v1850_v50  ;;  %v399_v46 = vmul.f32 %v1686_v39, %v1847_v49  ;;  %v431_v51 = vadd.f32 %v427_v40, %v415_v45  ;;  %v430_v53 = vadd.f32 %v423_v41, %v414_v47  ;;  %v1638_v49 = vld [vmem:[#allocation2 + $0x130] ss:$24 sps:$4 sm:$0xff]   ;;  %v1643_v50 = vld [vmem:[#allocation2 + $0x104] ss:$24 sps:$4 sm:$0xff]  }
 0x159   : > { %v417_v48 = vmul.f32 %v411_v35, %v400_v42  ;;  %v416_v44 = vmul.f32 %v407_v38, %v399_v46 }
 0x15b   : > { %v433_v52 = vadd.f32 %v427_v40, %v417_v48  ;;  %v432_v54 = vadd.f32 %v423_v41, %v416_v44 }
 0x15d   : > { %v435_v43 = vpack.c.bf16 %v433_v52, %v431_v51  ;;  %v1879_v56 = vpack.c.bf16 %v432_v54, %v430_v53  ;;  %v552_v52 = vsub.s32 4, %v1860_v28  ;;  %v556_v53 = vsub.s32 5, %v1860_v28 }
 0x15f   : > { %1076 = vmatprep.mubr.bf16.mxu0 %v435_v43  ;;  %1119 = vmatprep.mubr.bf16.mxu1 %v435_v43  ;;  %v553_v54 = vrot.slane %v532_v23, %v552_v52 }
 0x160   : > { %1077 = vmatmul.mubr.bf16.vlgmr.msra.gmra.mxu0 %v1879_v56  ;;  %1120 = vmatmul.mubr.bf16.vlgmr.msra.gmra.mxu1 %v1879_v56 }
 0x161   : > { %1131 = vmatpush1.bf16.msra.mxu0 %v1635_v55  ;;  %1162 = vmatprep.mubr.bf16.mxu0 %v435_v43  ;;  %v557_v43 = vrot.slane %v532_v23, %v556_v53 }
 0x162   : > { %1132 = vmatprep.subr.bf16.mxu0 %v1640_v57 }
 0x165   : > { %1133 = vmatpush1.bf16.msra.mxu0 %v1638_v49 }
 0x166   : > { %1134 = vmatprep.subr.bf16.mxu0 %v1643_v50 }
 0x169   : > { %1135 = vmatpush1.bf16.msra.mxu0 %v1641_v58 }
 0x16a   : > { %1136 = vmatprep.subr.bf16.mxu0 %v1646_v59 }
 0x16d   : > { %1137 = vmatpush1.bf16.msra.mxu0 %v1644_v60 }
 0x16e   : > { %1138 = vmatprep.subr.bf16.mxu0 %v1649_v61 }
 0x171   : > { %1139 = vmatpush1.bf16.msra.mxu0 %v1647_v62 }
 0x172   : > { %1140 = vmatprep.subr.bf16.mxu0 %v1652_v63 }
 0x175   : > { %1141 = vmatpush1.bf16.msra.mxu0 %v1650_v0 }
 0x176   : > { %1142 = vmatprep.subr.bf16.mxu0 %v1655_v1 }
 0x179   : > { %1143 = vmatpush1.bf16.msra.mxu0 %v1653_v2 }
 0x17a   : > { %1144 = vmatprep.subr.bf16.mxu0 %v1658_v3 }
 0x17d   : > { %1145 = vmatpush1.bf16.msra.mxu0 %v1656_v4 }
 0x17e   : > { %1146 = vmatprep.subr.bf16.mxu0 %v1661_v5 }
 0x181   : > { %1147 = vmatpush2.bf16.msra.mxu0 %v1659_v6 }
 0x182   : > { %1148 = vmatprep.subr.bf16.mxu0 %v1664_v7 }
 0x185   : > { %1149 = vmatpush2.bf16.msra.mxu0 %v1662_v8 }
 0x186   : > { %1150 = vmatprep.subr.bf16.mxu0 %v1667_v9 }
 0x189   : > { %1151 = vmatpush2.bf16.msra.mxu0 %v1665_v10 }
 0x18a   : > { %1152 = vmatprep.subr.bf16.mxu0 %v1670_v11 }
 0x18d   : > { %1153 = vmatpush2.bf16.msra.mxu0 %v1668_v12 }
 0x18e   : > { %1154 = vmatprep.subr.bf16.mxu0 %v1673_v13 }
 0x191   : > { %1155 = vmatpush2.bf16.msra.mxu0 %v1671_v14 }
 0x192   : > { %1156 = vmatprep.subr.bf16.mxu0 %v1676_v15 }
 0x195   : > { %1157 = vmatpush2.bf16.msra.mxu0 %v1674_v16 }
 0x196   : > { %1158 = vmatprep.subr.bf16.mxu0 %v1679_v17 }
 0x199   : > { %1159 = vmatpush2.bf16.msra.mxu0 %v1677_v18 }
 0x19a   : > { %1160 = vmatprep.subr.bf16.mxu0 %v1682_v19 }
 0x19d   : > { %1161 = vmatpush2.bf16.msra.mxu0 %v1680_v20 }
 0x1a0   : > { %1163 = vmatmul.mubr.bf16.vlgmr.msra.gmra.mxu0 %v1879_v56 }
 0x220   : > { %v1078_v29 = vpop.f32.mrf.mxu0  ;;  %v1121_v30 = vpop.f32.mrf.mxu1 }
 0x221   : > { %v1079_v35 = vadd.f32 %v1078_v29, %v537_v24  ;;  %v1122_v36 = vadd.f32 %v1121_v30, %v545_v25 }
 0x222   : > { %v1080_v33 = vpop.f32.mrf.mxu0  ;;  %v1123_v34 = vpop.f32.mrf.mxu1 }
 0x223   : > { %v1081_v37 = vadd.f32 %v1080_v33, %v541_v26  ;;  %v1124_v38 = vadd.f32 %v1123_v34, %v549_v27 }
 0x224   : > { %v1082_v31 = vpop.f32.mrf.mxu0  ;;  %v1125_v32 = vpop.f32.mrf.mxu1 }
 0x225   : > { %v1495_v39 = vpack.c.bf16 %v1081_v37, %v1079_v35  ;;  %v1496_v40 = vpack.c.bf16 %v1124_v38, %v1122_v36  ;;  %v1083_v45 = vadd.f32 %v1082_v31, %v537_v24  ;;  %v1126_v46 = vadd.f32 %v1125_v32, %v545_v25 }
 0x226   : > { %v1084_v41 = vpop.f32.mrf.mxu0  ;;  %v1127_v42 = vpop.f32.mrf.mxu1 }
 0x227   : > { %1209 = vst [vmem:[%s1895_s27] sm:$0xff] %v1495_v39  ;;  %1210 = vst [vmem:[%s1895_s27 + $0x8] sm:$0xff] %v1496_v40  ;;  %v1085_v47 = vadd.f32 %v1084_v41, %v541_v26  ;;  %v1128_v48 = vadd.f32 %v1127_v42, %v549_v27 }
 0x229   : > { %v1498_v44 = vpack.c.bf16 %v1085_v47, %v1083_v45  ;;  %v1499_v51 = vpack.c.bf16 %v1128_v48, %v1126_v46 }
 0x22b   : > { %1212 = vst [vmem:[%s1895_s27 + $0x18] sm:$0xff] %v1498_v44  ;;  %1213 = vst [vmem:[%s1895_s27 + $0x20] sm:$0xff] %v1499_v51 }
 0x260   : > { %v1164_v55 = vpop.f32.mrf.mxu0 }
 0x261   : > { %v1165_v57 = vadd.f32 %v1164_v55, %v553_v54 }
 0x262   : > { %v1166_v56 = vpop.f32.mrf.mxu0 }
 0x263   : > { %v1167_v49 = vadd.f32 %v1166_v56, %v557_v43 }
 0x264   : > { %v1168_v50 = vpop.f32.mrf.mxu0 }
 0x265   : > { %v1497_v58 = vpack.c.bf16 %v1167_v49, %v1165_v57  ;;  %v1169_v60 = vadd.f32 %v1168_v50, %v553_v54 }
 0x266   : > { %v1170_v59 = vpop.f32.mrf.mxu0 }
 0x267   : > { %1211 = vst [vmem:[%s1895_s27 + $0x10] sm:$0xff] %v1497_v58  ;;  %v1171_v61 = vadd.f32 %v1170_v59, %v557_v43 }
 0x269   : > { %v1500_v62 = vpack.c.bf16 %v1171_v61, %v1169_v60 }
 0x26b   : > { %1214 = vst [vmem:[%s1895_s27 + $0x28] sm:$0xff] %v1500_v62 }
 0x26c PF: > { %s16_s20 = sadd.s32 1, %s1739_s20   ;;  %s1922_s18 = smov %s1735_s19 }
 0x26d   : > { %p13_p2 = scmp.ge.s32.totalorder %s16_s20, 4   ;;  %s1923_s19 = smov %s1925_s22 }
 0x26f   :  { %15 = sbr.rel (!%p13_p2) target bundleno = 2 (0x2), region = 85 }
 0x274   :  { %1256 = vsyncpa [#allocation3], 1 }
 0x275   :  { %1258 = vsyncpa [#allocation3 + $0x1], 1 }

// kernel: wan_attention_block.18
= control target key start
LH: loop header
LB: loop body
LE: loop exit
PB: predicated region body
PF: predicated region fallthrough
CT: control target
= control target key end

     0   :  { %s932_s12 = smov 0   ;;  %s934_s13 = smov 0   ;;  %s1074_s0 = inlined_call_operand.vmem [shape: f32[2,16,256], index: 0, kind: input, shape index: {}]   ;;  %s1075_s1 = inlined_call_operand.vmem [shape: bf16[256,256], index: 1, kind: input, shape index: {}]   ;;  %s1076_s2 = inlined_call_operand.vmem [shape: f32[1,256], index: 2, kind: input, shape index: {}]   ;;  %s1077_s3 = inlined_call_operand.vmem [shape: bf16[2,16,256], index: 3, kind: output, shape index: {}]  }
   0x1   :  { %s936_s14 = smov 0  }
   0x2 LB: > { %s39_s15 = sadd.s32 1, %s906_s13  ;;  %p771_p0 = scmp.ge.s32.totalorder %s910_s14, 1  ;;  %s910_s14 = sphi %s936_s14, %s13_s14   ;;  %s906_s13 = sphi %s934_s13, %s1079_s13   ;;  %s902_s12 = sphi %s932_s12, %s1078_s12  }
   0x3   : > { %p41_p1 = scmp.ge.s32.totalorder %s39_s15, 2  ;;  %p211_p2 = scmp.lt.s32.totalorder %s910_s14, 3 }
   0x5   : > { %s1081_s15 = smov (%p41_p1, %s39_s15), 0  ;;  %p212_p3 = pnand %p771_p0, %p211_p2 }
   0x6   : > { %p269_p4 = scmp.lt.s32.totalorder (!%p212_p3), %s902_s12, 1 }
   0x7   : > { %215 = sbr.rel (%p212_p3) target bundleno = 281 (0x119), region = 32 }
   0xc   : > { %v840_v0 = vld [vmem:[%s1075_s1 + $0x74] ss:$8 sps:$4 sm:$0xff]   ;;  %v842_v1 = vld [vmem:[%s1075_s1 + $0x70] ss:$8 sps:$4 sm:$0xff]   ;;  %v843_v2 = vld [vmem:[%s1075_s1 + $0x64] ss:$8 sps:$4 sm:$0xff]   ;;  %v586_v38 = vlaneseq }
   0xd   : > { %526 = vmatprep.subr.bf16.mxu0 %v840_v0  ;;  %v845_v3 = vld [vmem:[%s1075_s1 + $0x60] ss:$8 sps:$4 sm:$0xff]   ;;  %v846_v4 = vld [vmem:[%s1075_s1 + $0x54] ss:$8 sps:$4 sm:$0xff]   ;;  %v848_v5 = vld [vmem:[%s1075_s1 + $0x50] ss:$8 sps:$4 sm:$0xff]  }
   0xe   : > { %527 = vmatpush1.bf16.msra.mxu0 %v842_v1  ;;  %v849_v6 = vld [vmem:[%s1075_s1 + $0x44] ss:$8 sps:$4 sm:$0xff]   ;;  %v851_v7 = vld [vmem:[%s1075_s1 + $0x40] ss:$8 sps:$4 sm:$0xff]   ;;  %s1083_s12 = smov (!%p269_p4, %s902_s12), 1  ;;  %v587_v39 = vshrl.u32 %v586_v38, 7 }
   0xf   : > { %528 = vmatprep.subr.bf16.mxu0 %v843_v2  ;;  %v852_v8 = vld [vmem:[%s1075_s1 + $0x34] ss:$8 sps:$4 sm:$0xff]   ;;  %v854_v9 = vld [vmem:[%s1075_s1 + $0x30] ss:$8 sps:$4 sm:$0xff]   ;;  %s812_s9 = sshll.u32 %s1083_s12, 5  ;;  %s813_s19 = sshll.u32 %s1083_s12, 4 }
  0x10   : > { %v855_v10 = vld [vmem:[%s1075_s1 + $0x24] ss:$8 sps:$4 sm:$0xff]   ;;  %s989_s18 = scalar_lea.vmem %s1074_s0, %s812_s9  ;;  %v857_v11 = vld [vmem:[%s1075_s1 + $0x20] ss:$8 sps:$4 sm:$0xff]   ;;  %v858_v12 = vld [vmem:[%s1075_s1 + $0x14] ss:$8 sps:$4 sm:$0xff]   ;;  %s313_s21 = scalar_lea.vmem %s1077_s3, %s813_s19 }
  0x11   : > { %v329_v13 = vld [vmem:[%s989_s18 + $0x8] sm:$0xff]  ;;  %v331_v14 = vld [vmem:[%s989_s18 + $0x18] sm:$0xff]  ;;  %v328_v35 = vld [vmem:[%s989_s18] sm:$0xff]  ;;  %v588_v40 = vsub.s32 0, %v587_v39  ;;  %v592_v41 = vsub.s32 1, %v587_v39 }
  0x12   : > { %529 = vmatpush1.bf16.msra.mxu0 %v845_v3  ;;  %v333_v15 = vpack.c.bf16 %v331_v14, %v329_v13  ;;  %v860_v16 = vld [vmem:[%s1075_s1 + $0x10] ss:$8 sps:$4 sm:$0xff]   ;;  %v861_v17 = vld [vmem:[%s1075_s1 + $0x4] ss:$8 sps:$4 sm:$0xff]   ;;  %v863_v18 = vld [vmem:[%s1075_s1] ss:$8 sps:$4 sm:$0xff]  }
  0x13   : > { %530 = vmatprep.subr.bf16.mxu0 %v846_v4  ;;  %v864_v19 = vld [vmem:[%s1075_s1 + $0xf4] ss:$8 sps:$4 sm:$0xff]   ;;  %v866_v20 = vld [vmem:[%s1075_s1 + $0xf0] ss:$8 sps:$4 sm:$0xff]   ;;  %v867_v21 = vld [vmem:[%s1075_s1 + $0xe4] ss:$8 sps:$4 sm:$0xff]  }
  0x14   : > { %558 = vmatprep.mubr.bf16.mxu0 %v333_v15  ;;  %v869_v22 = vld [vmem:[%s1075_s1 + $0xe0] ss:$8 sps:$4 sm:$0xff]   ;;  %v870_v23 = vld [vmem:[%s1075_s1 + $0xd4] ss:$8 sps:$4 sm:$0xff]   ;;  %v872_v24 = vld [vmem:[%s1075_s1 + $0xd0] ss:$8 sps:$4 sm:$0xff]  }
  0x15   : > { %v873_v25 = vld [vmem:[%s1075_s1 + $0xc4] ss:$8 sps:$4 sm:$0xff]   ;;  %v875_v26 = vld [vmem:[%s1075_s1 + $0xc0] ss:$8 sps:$4 sm:$0xff]   ;;  %v876_v27 = vld [vmem:[%s1075_s1 + $0xb4] ss:$8 sps:$4 sm:$0xff]  }
  0x16   : > { %531 = vmatpush1.bf16.msra.mxu0 %v848_v5  ;;  %v878_v28 = vld [vmem:[%s1075_s1 + $0xb0] ss:$8 sps:$4 sm:$0xff]   ;;  %v879_v29 = vld [vmem:[%s1075_s1 + $0xa4] ss:$8 sps:$4 sm:$0xff]   ;;  %v881_v30 = vld [vmem:[%s1075_s1 + $0xa0] ss:$8 sps:$4 sm:$0xff]  }
  0x17   : > { %532 = vmatprep.subr.bf16.mxu0 %v849_v6  ;;  %v882_v31 = vld [vmem:[%s1075_s1 + $0x94] ss:$8 sps:$4 sm:$0xff]   ;;  %v884_v32 = vld [vmem:[%s1075_s1 + $0x90] ss:$8 sps:$4 sm:$0xff]   ;;  %v885_v33 = vld [vmem:[%s1075_s1 + $0x84] ss:$8 sps:$4 sm:$0xff]  }
  0x18   : > { %v887_v34 = vld [vmem:[%s1075_s1 + $0x80] ss:$8 sps:$4 sm:$0xff]   ;;  %v330_v36 = vld [vmem:[%s989_s18 + $0x10] sm:$0xff] }
  0x19   : > { %v332_v37 = vpack.c.bf16 %v330_v36, %v328_v35  ;;  %v584_v42 = vld [vmem:[%s1076_s2] sm:$0x3] }
  0x1a   : > { %533 = vmatpush1.bf16.msra.mxu0 %v851_v7  ;;  %v589_v43 = vrot.slane %v584_v42, %v588_v40  ;;  %v593_v44 = vrot.slane %v584_v42, %v592_v41 }
  0x1b   : > { %534 = vmatprep.subr.bf16.mxu0 %v852_v8 }
  0x1e   : > { %535 = vmatpush1.bf16.msra.mxu0 %v854_v9 }
  0x1f   : > { %536 = vmatprep.subr.bf16.mxu0 %v855_v10 }
  0x22   : > { %537 = vmatpush1.bf16.msra.mxu0 %v857_v11 }
  0x23   : > { %538 = vmatprep.subr.bf16.mxu0 %v858_v12 }
  0x26   : > { %539 = vmatpush1.bf16.msra.mxu0 %v860_v16 }
  0x27   : > { %540 = vmatprep.subr.bf16.mxu0 %v861_v17 }
  0x2a   : > { %541 = vmatpush1.bf16.msra.mxu0 %v863_v18 }
  0x2b   : > { %542 = vmatprep.subr.bf16.mxu0 %v864_v19 }
  0x2e   : > { %543 = vmatpush2.bf16.msra.mxu0 %v866_v20 }
  0x2f   : > { %544 = vmatprep.subr.bf16.mxu0 %v867_v21 }
  0x32   : > { %545 = vmatpush2.bf16.msra.mxu0 %v869_v22 }
  0x33   : > { %546 = vmatprep.subr.bf16.mxu0 %v870_v23 }
  0x36   : > { %547 = vmatpush2.bf16.msra.mxu0 %v872_v24 }
  0x37   : > { %548 = vmatprep.subr.bf16.mxu0 %v873_v25 }
  0x3a   : > { %549 = vmatpush2.bf16.msra.mxu0 %v875_v26 }
  0x3b   : > { %550 = vmatprep.subr.bf16.mxu0 %v876_v27 }
  0x3e   : > { %551 = vmatpush2.bf16.msra.mxu0 %v878_v28 }
  0x3f   : > { %552 = vmatprep.subr.bf16.mxu0 %v879_v29 }
  0x42   : > { %553 = vmatpush2.bf16.msra.mxu0 %v881_v30 }
  0x43   : > { %554 = vmatprep.subr.bf16.mxu0 %v882_v31 }
  0x46   : > { %555 = vmatpush2.bf16.msra.mxu0 %v884_v32 }
  0x47   : > { %556 = vmatprep.subr.bf16.mxu0 %v885_v33 }
  0x4a   : > { %557 = vmatpush2.bf16.msra.mxu0 %v887_v34 }
  0x4d   : > { %559 = vmatmul.mubr.bf16.vlgmr.msra.gmra.mxu0 %v332_v37 }
 0x10d   : > { %v560_v45 = vpop.f32.mrf.mxu0 }
 0x10e   : > { %v596_v47 = vadd.f32 %v589_v43, %v560_v45 }
 0x10f   : > { %v562_v46 = vpop.f32.mrf.mxu0 }
 0x110   : > { %v597_v48 = vadd.f32 %v593_v44, %v562_v46 }
 0x111   : > { %v564_v49 = vpop.f32.mrf.mxu0 }
 0x112   : > { %v814_v50 = vpack.c.bf16 %v597_v48, %v596_v47  ;;  %v598_v52 = vadd.f32 %v589_v43, %v564_v49 }
 0x113   : > { %v566_v51 = vpop.f32.mrf.mxu0 }
 0x114   : > { %612 = vst [vmem:[%s313_s21] sm:$0xff] %v814_v50  ;;  %v599_v53 = vadd.f32 %v593_v44, %v566_v51 }
 0x116   : > { %v815_v54 = vpack.c.bf16 %v599_v53, %v598_v52 }
 0x118   : > { %613 = vst [vmem:[%s313_s21 + $0x8] sm:$0xff] %v815_v54 }
 0x119 PF: > { %s13_s14 = sadd.s32 1, %s910_s14   ;;  %s1078_s12 = smov %s906_s13 }
 0x11a   : > { %p10_p5 = scmp.ge.s32.totalorder %s13_s14, 4   ;;  %s1079_s13 = smov %s1081_s15 }
 0x11c   :  { %12 = sbr.rel (!%p10_p5) target bundleno = 2 (0x2), region = 76 }

// kernel: wan_attention_block.20
= control target key start
LH: loop header
LB: loop body
LE: loop exit
PB: predicated region body
PF: predicated region fallthrough
CT: control target
= control target key end

     0   :  { %s425_s9 = smov 0   ;;  %s427_s10 = smov 0   ;;  %s468_s0 = inlined_call_operand.vmem [shape: bf16[2,16,256], index: 0, kind: input, shape index: {}]   ;;  %s469_s1 = inlined_call_operand.vmem [shape: f32[1,256], index: 1, kind: input, shape index: {}]   ;;  %s470_s2 = inlined_call_operand.vmem [shape: bf16[2,16,256], index: 2, kind: output, shape index: {}]  }
   0x1   :  { %s429_s11 = smov 0  }
   0x2 LB: > { %s24_s12 = sadd.s32 1, %s404_s10  ;;  %p345_p0 = scmp.ge.s32.totalorder %s408_s11, 1  ;;  %s408_s11 = sphi %s429_s11, %s12_s11   ;;  %s404_s10 = sphi %s427_s10, %s472_s10   ;;  %s400_s9 = sphi %s425_s9, %s471_s9  }
   0x3   : > { %p26_p1 = scmp.ge.s32.totalorder %s24_s12, 2  ;;  %p134_p2 = scmp.lt.s32.totalorder %s408_s11, 3 }
   0x5   : > { %s474_s12 = smov (%p26_p1, %s24_s12), 0  ;;  %p135_p3 = pnand %p345_p0, %p134_p2 }
   0x6   : > { %p167_p4 = scmp.lt.s32.totalorder (!%p135_p3), %s400_s9, 1 }
   0x7   : > { %138 = sbr.rel (%p135_p3) target bundleno = 189 (0xbd), region = 28 }
   0xc   : > { %s476_s9 = smov (!%p167_p4, %s400_s9), 1  ;;  %v217_v16 = vlaneseq  ;;  %v215_v22 = vld [vmem:[%s469_s1] sm:$0x3] }
   0xd   : > { %s354_s13 = sshll.u32 %s476_s9, 4 }
   0xe   : > { %s175_s16 = scalar_lea.vmem %s468_s0, %s354_s13  ;;  %v218_v19 = vshrl.u32 %v217_v16, 7  ;;  %s186_s21 = scalar_lea.vmem %s470_s2, %s354_s13 }
   0xf   : > { %v188_v0 = vld [vmem:[%s175_s16] sm:$0xff]  ;;  %v189_v1 = vld [vmem:[%s175_s16 + $0x8] sm:$0xff] }
  0x10   : > { %v190_v2 = vunpack.c.l.bf16 %v188_v0  ;;  %v191_v3 = vunpack.c.h.bf16 %v188_v0  ;;  %v192_v4 = vunpack.c.l.bf16 %v189_v1  ;;  %v193_v5 = vunpack.c.h.bf16 %v189_v1 }
  0x11   : > { %v219_v20 = vsub.s32 0, %v218_v19  ;;  %v223_v21 = vsub.s32 1, %v218_v19 }
  0x12   : > { %v194_v6 = vmul.f32 %v190_v2, %v190_v2  ;;  %v195_v7 = vmul.f32 %v191_v3, %v191_v3  ;;  %v196_v8 = vmul.f32 %v192_v4, %v192_v4  ;;  %v197_v9 = vmul.f32 %v193_v5, %v193_v5 }
  0x13   : > { %v220_v23 = vrot.slane %v215_v22, %v219_v20  ;;  %v224_v24 = vrot.slane %v215_v22, %v223_v21 }
  0x14   : > { %v198_v10 = vadd.f32 %v195_v7, %v194_v6  ;;  %v201_v11 = vadd.f32 %v197_v9, %v196_v8 }
  0x16   : > { %199 = vadd.xlane.f32.xlu0 %v198_v10 }
  0x1a   : > { %202 = vadd.xlane.f32.xlu0 %v201_v11 }
  0x9f   : > { %v200_v12 = vpop.xlane.xlu0 %199 }
  0xa0   : > { %v205_v13 = vmul.f32 0.00390625, %v200_v12 }
  0xa2   : > { %v207_v14 = vadd.f32 1e-06, %v205_v13 }
  0xa3   : > { %v203_v15 = vpop.xlane.xlu0 %202 }
  0xa4   : > { %382 = vrsqrt.f32 %v207_v14  ;;  %v206_v17 = vmul.f32 0.00390625, %v203_v15 }
  0xa6   : > { %v208_v18 = vadd.f32 1e-06, %v206_v17 }
  0xa8   : > { %384 = vrsqrt.f32 %v208_v18 }
  0xb1   : > { %v383_v25 = vpop.eup %382 }
  0xb2   : > { %v211_v26 = vmul.f32 %v383_v25, %v190_v2  ;;  %v212_v27 = vmul.f32 %v383_v25, %v191_v3 }
  0xb4   : > { %v227_v28 = vmul.f32 %v220_v23, %v211_v26  ;;  %v228_v29 = vmul.f32 %v224_v24, %v212_v27 }
  0xb5   : > { %v385_v30 = vpop.eup %384 }
  0xb6   : > { %v356_v31 = vpack.c.bf16 %v228_v29, %v227_v28  ;;  %v213_v32 = vmul.f32 %v385_v30, %v192_v4  ;;  %v214_v33 = vmul.f32 %v385_v30, %v193_v5 }
  0xb8   : > { %243 = vst [vmem:[%s186_s21] sm:$0xff] %v356_v31  ;;  %v229_v34 = vmul.f32 %v220_v23, %v213_v32  ;;  %v230_v35 = vmul.f32 %v224_v24, %v214_v33 }
  0xba   : > { %v357_v36 = vpack.c.bf16 %v230_v35, %v229_v34 }
  0xbc   : > { %244 = vst [vmem:[%s186_s21 + $0x8] sm:$0xff] %v357_v36 }
  0xbd PF: > { %s12_s11 = sadd.s32 1, %s408_s11   ;;  %s471_s9 = smov %s404_s10 }
  0xbe   : > { %p9_p5 = scmp.ge.s32.totalorder %s12_s11, 4   ;;  %s472_s10 = smov %s474_s12 }
  0xc0   :  { %11 = sbr.rel (!%p9_p5) target bundleno = 2 (0x2), region = 58 }

// kernel: wan_attention_block.17
= control target key start
LH: loop header
LB: loop body
LE: loop exit
PB: predicated region body
PF: predicated region fallthrough
CT: control target
= control target key end

     0   :  { %s1152_s18 = smov 0   ;;  %s1154_s19 = smov 0   ;;  %s1299_s0 = inlined_call_operand.vmem [shape: bf16[2,16,256], index: 0, kind: input, shape index: {}]   ;;  %s1300_s1 = inlined_call_operand.vmem [shape: bf16[256,256], index: 1, kind: input, shape index: {}]   ;;  %s1301_s2 = inlined_call_operand.vmem [shape: f32[1,256], index: 2, kind: input, shape index: {}]   ;;  %s1302_s3 = inlined_call_operand.vmem [shape: f32[2,16,256], index: 3, kind: input, shape index: {}]   ;;  %s1303_s4 = inlined_call_operand.vmem [shape: f32[2,1,256], index: 4, kind: input, shape index: {}]   ;;  %s1304_s5 = inlined_call_operand.vmem [shape: f32[2,16,256], index: 5, kind: output, shape index: {}]  }
   0x1   :  { %s1156_s20 = smov 0  }
   0x2 LB: > { %s41_s21 = sadd.s32 1, %s1116_s19  ;;  %p976_p0 = scmp.ge.s32.totalorder %s1120_s20, 1  ;;  %s1120_s20 = sphi %s1156_s20, %s15_s20   ;;  %s1116_s19 = sphi %s1154_s19, %s1306_s19   ;;  %s1112_s18 = sphi %s1152_s18, %s1305_s18  }
   0x3   : > { %p43_p1 = scmp.ge.s32.totalorder %s41_s21, 2  ;;  %p302_p2 = scmp.lt.s32.totalorder %s1120_s20, 3 }
   0x5   : > { %s1308_s21 = smov (%p43_p1, %s41_s21), 0  ;;  %p303_p3 = pnand %p976_p0, %p302_p2 }
   0x6   : > { %p386_p4 = scmp.lt.s32.totalorder (!%p303_p3), %s1112_s18, 1 }
   0x7   : > { %306 = sbr.rel (%p303_p3) target bundleno = 283 (0x11b), region = 40 }
   0xc   : > { %v1047_v0 = vld [vmem:[%s1300_s1 + $0x74] ss:$8 sps:$4 sm:$0xff]   ;;  %v1049_v1 = vld [vmem:[%s1300_s1 + $0x70] ss:$8 sps:$4 sm:$0xff]   ;;  %v1050_v2 = vld [vmem:[%s1300_s1 + $0x64] ss:$8 sps:$4 sm:$0xff]   ;;  %v738_v34 = vlaneseq }
   0xd   : > { %662 = vmatprep.subr.bf16.mxu0 %v1047_v0  ;;  %v1052_v3 = vld [vmem:[%s1300_s1 + $0x60] ss:$8 sps:$4 sm:$0xff]   ;;  %v1053_v4 = vld [vmem:[%s1300_s1 + $0x54] ss:$8 sps:$4 sm:$0xff]   ;;  %v1055_v5 = vld [vmem:[%s1300_s1 + $0x50] ss:$8 sps:$4 sm:$0xff]  }
   0xe   : > { %663 = vmatpush1.bf16.msra.mxu0 %v1049_v1  ;;  %v1056_v6 = vld [vmem:[%s1300_s1 + $0x44] ss:$8 sps:$4 sm:$0xff]   ;;  %v1058_v7 = vld [vmem:[%s1300_s1 + $0x40] ss:$8 sps:$4 sm:$0xff]   ;;  %v1059_v8 = vld [vmem:[%s1300_s1 + $0x34] ss:$8 sps:$4 sm:$0xff]  }
   0xf   : > { %664 = vmatprep.subr.bf16.mxu0 %v1050_v2  ;;  %s1310_s18 = smov (!%p386_p4, %s1112_s18), 1  ;;  %v1061_v9 = vld [vmem:[%s1300_s1 + $0x30] ss:$8 sps:$4 sm:$0xff]   ;;  %v1062_v10 = vld [vmem:[%s1300_s1 + $0x24] ss:$8 sps:$4 sm:$0xff]   ;;  %v739_v35 = vshrl.u32 %v738_v34, 7 }
  0x10   : > { %s1020_s23 = sshll.u32 %s1310_s18, 4  ;;  %v1064_v11 = vld [vmem:[%s1300_s1 + $0x20] ss:$8 sps:$4 sm:$0xff]   ;;  %v1065_v12 = vld [vmem:[%s1300_s1 + $0x14] ss:$8 sps:$4 sm:$0xff]   ;;  %s981_s29 = sshll.u32 %s1310_s18, 1 }
  0x11   : > { %s1212_s28 = scalar_lea.vmem %s1299_s0, %s1020_s23  ;;  %v1067_v14 = vld [vmem:[%s1300_s1 + $0x10] ss:$8 sps:$4 sm:$0xff]   ;;  %v1068_v15 = vld [vmem:[%s1300_s1 + $0x4] ss:$8 sps:$4 sm:$0xff]   ;;  %v1070_v16 = vld [vmem:[%s1300_s1] ss:$8 sps:$4 sm:$0xff]   ;;  %s440_s7 = scalar_lea.vmem %s1303_s4, %s981_s29 }
  0x12   : > { %665 = vmatpush1.bf16.msra.mxu0 %v1052_v3  ;;  %v1097_v13 = vld [vmem:[%s1212_s28 + $0x4] ss:$8 sps:$4 sm:$0xff]   ;;  %v1071_v17 = vld [vmem:[%s1300_s1 + $0xf4] ss:$8 sps:$4 sm:$0xff]   ;;  %v1073_v18 = vld [vmem:[%s1300_s1 + $0xf0] ss:$8 sps:$4 sm:$0xff]  }
  0x13   : > { %666 = vmatprep.subr.bf16.mxu0 %v1053_v4  ;;  %694 = vmatprep.mubr.bf16.mxu0 %v1097_v13  ;;  %v1074_v19 = vld [vmem:[%s1300_s1 + $0xe4] ss:$8 sps:$4 sm:$0xff]   ;;  %v1076_v20 = vld [vmem:[%s1300_s1 + $0xe0] ss:$8 sps:$4 sm:$0xff]   ;;  %v1077_v21 = vld [vmem:[%s1300_s1 + $0xd4] ss:$8 sps:$4 sm:$0xff]  }
  0x14   : > { %v1079_v22 = vld [vmem:[%s1300_s1 + $0xd0] ss:$8 sps:$4 sm:$0xff]   ;;  %v1080_v23 = vld [vmem:[%s1300_s1 + $0xc4] ss:$8 sps:$4 sm:$0xff]   ;;  %v1082_v24 = vld [vmem:[%s1300_s1 + $0xc0] ss:$8 sps:$4 sm:$0xff]  }
  0x15   : > { %v1083_v25 = vld [vmem:[%s1300_s1 + $0xb4] ss:$8 sps:$4 sm:$0xff]   ;;  %v1085_v26 = vld [vmem:[%s1300_s1 + $0xb0] ss:$8 sps:$4 sm:$0xff]   ;;  %v1086_v27 = vld [vmem:[%s1300_s1 + $0xa4] ss:$8 sps:$4 sm:$0xff]  }
  0x16   : > { %667 = vmatpush1.bf16.msra.mxu0 %v1055_v5  ;;  %v1088_v28 = vld [vmem:[%s1300_s1 + $0xa0] ss:$8 sps:$4 sm:$0xff]   ;;  %v1089_v29 = vld [vmem:[%s1300_s1 + $0x94] ss:$8 sps:$4 sm:$0xff]   ;;  %v1091_v30 = vld [vmem:[%s1300_s1 + $0x90] ss:$8 sps:$4 sm:$0xff]  }
  0x17   : > { %668 = vmatprep.subr.bf16.mxu0 %v1056_v6  ;;  %v1092_v31 = vld [vmem:[%s1300_s1 + $0x84] ss:$8 sps:$4 sm:$0xff]   ;;  %v1094_v32 = vld [vmem:[%s1300_s1 + $0x80] ss:$8 sps:$4 sm:$0xff]   ;;  %v740_v36 = vsub.s32 0, %v739_v35  ;;  %v744_v38 = vsub.s32 1, %v739_v35 }
  0x18   : > { %v1095_v33 = vld [vmem:[%s1212_s28] ss:$8 sps:$4 sm:$0xff]   ;;  %s1021_s10 = sshll.u32 %s1310_s18, 5 }
  0x19   : > { %v736_v37 = vld [vmem:[%s1301_s2] sm:$0x3]  ;;  %s430_s12 = scalar_lea.vmem %s1302_s3, %s1021_s10  ;;  %s455_s15 = scalar_lea.vmem %s1304_s5, %s1021_s10 }
  0x1a   : > { %669 = vmatpush1.bf16.msra.mxu0 %v1058_v7  ;;  %v752_v39 = vld [vmem:[%s440_s7] sm:$0x3]  ;;  %v741_v40 = vrot.slane %v736_v37, %v740_v36  ;;  %v745_v42 = vrot.slane %v736_v37, %v744_v38  ;;  %v769_v50 = vld [vmem:[%s430_s12 + $0x8] sm:$0xff]  ;;  %v770_v55 = vld [vmem:[%s430_s12 + $0x10] sm:$0xff] }
  0x1b   : > { %670 = vmatprep.subr.bf16.mxu0 %v1059_v8  ;;  %v757_v41 = vrot.slane %v752_v39, %v740_v36  ;;  %v761_v44 = vrot.slane %v752_v39, %v744_v38  ;;  %v768_v46 = vld [vmem:[%s430_s12] sm:$0xff]  ;;  %v771_v60 = vld [vmem:[%s430_s12 + $0x18] sm:$0xff] }
  0x1e   : > { %671 = vmatpush1.bf16.msra.mxu0 %v1061_v9 }
  0x1f   : > { %672 = vmatprep.subr.bf16.mxu0 %v1062_v10 }
  0x22   : > { %673 = vmatpush1.bf16.msra.mxu0 %v1064_v11 }
  0x23   : > { %674 = vmatprep.subr.bf16.mxu0 %v1065_v12 }
  0x26   : > { %675 = vmatpush1.bf16.msra.mxu0 %v1067_v14 }
  0x27   : > { %676 = vmatprep.subr.bf16.mxu0 %v1068_v15 }
  0x2a   : > { %677 = vmatpush1.bf16.msra.mxu0 %v1070_v16 }
  0x2b   : > { %678 = vmatprep.subr.bf16.mxu0 %v1071_v17 }
  0x2e   : > { %679 = vmatpush2.bf16.msra.mxu0 %v1073_v18 }
  0x2f   : > { %680 = vmatprep.subr.bf16.mxu0 %v1074_v19 }
  0x32   : > { %681 = vmatpush2.bf16.msra.mxu0 %v1076_v20 }
  0x33   : > { %682 = vmatprep.subr.bf16.mxu0 %v1077_v21 }
  0x36   : > { %683 = vmatpush2.bf16.msra.mxu0 %v1079_v22 }
  0x37   : > { %684 = vmatprep.subr.bf16.mxu0 %v1080_v23 }
  0x3a   : > { %685 = vmatpush2.bf16.msra.mxu0 %v1082_v24 }
  0x3b   : > { %686 = vmatprep.subr.bf16.mxu0 %v1083_v25 }
  0x3e   : > { %687 = vmatpush2.bf16.msra.mxu0 %v1085_v26 }
  0x3f   : > { %688 = vmatprep.subr.bf16.mxu0 %v1086_v27 }
  0x42   : > { %689 = vmatpush2.bf16.msra.mxu0 %v1088_v28 }
  0x43   : > { %690 = vmatprep.subr.bf16.mxu0 %v1089_v29 }
  0x46   : > { %691 = vmatpush2.bf16.msra.mxu0 %v1091_v30 }
  0x47   : > { %692 = vmatprep.subr.bf16.mxu0 %v1092_v31 }
  0x4a   : > { %693 = vmatpush2.bf16.msra.mxu0 %v1094_v32 }
  0x4d   : > { %695 = vmatmul.mubr.bf16.vlgmr.msra.gmra.mxu0 %v1095_v33 }
 0x10d   : > { %v696_v43 = vpop.f32.mrf.mxu0 }
 0x10e   : > { %v748_v45 = vadd.f32 %v741_v40, %v696_v43 }
 0x10f   : > { %v698_v47 = vpop.f32.mrf.mxu0 }
 0x110   : > { %v764_v48 = vmul.f32 %v757_v41, %v748_v45  ;;  %v749_v49 = vadd.f32 %v745_v42, %v698_v47 }
 0x111   : > { %v700_v51 = vpop.f32.mrf.mxu0 }
 0x112   : > { %v772_v52 = vadd.f32 %v768_v46, %v764_v48  ;;  %v765_v53 = vmul.f32 %v761_v44, %v749_v49  ;;  %v750_v54 = vadd.f32 %v741_v40, %v700_v51 }
 0x113   : > { %v702_v56 = vpop.f32.mrf.mxu0 }
 0x114   : > { %776 = vst [vmem:[%s455_s15] sm:$0xff] %v772_v52  ;;  %v773_v57 = vadd.f32 %v769_v50, %v765_v53  ;;  %v766_v58 = vmul.f32 %v757_v41, %v750_v54  ;;  %v751_v59 = vadd.f32 %v745_v42, %v702_v56 }
 0x116   : > { %777 = vst [vmem:[%s455_s15 + $0x8] sm:$0xff] %v773_v57  ;;  %v774_v61 = vadd.f32 %v770_v55, %v766_v58  ;;  %v767_v62 = vmul.f32 %v761_v44, %v751_v59 }
 0x118   : > { %778 = vst [vmem:[%s455_s15 + $0x10] sm:$0xff] %v774_v61  ;;  %v775_v63 = vadd.f32 %v771_v60, %v767_v62 }
 0x11a   : > { %779 = vst [vmem:[%s455_s15 + $0x18] sm:$0xff] %v775_v63 }
 0x11b PF: > { %s15_s20 = sadd.s32 1, %s1120_s20   ;;  %s1305_s18 = smov %s1116_s19 }
 0x11c   : > { %p12_p5 = scmp.ge.s32.totalorder %s15_s20, 4   ;;  %s1306_s19 = smov %s1308_s21 }
 0x11e   :  { %14 = sbr.rel (!%p12_p5) target bundleno = 2 (0x2), region = 94 }

// kernel: wan_attention_block.21
= control target key start
LH: loop header
LB: loop body
LE: loop exit
PB: predicated region body
PF: predicated region fallthrough
CT: control target
= control target key end

     0   :  { %s486_s9 = smov 0   ;;  %s488_s10 = smov 0   ;;  %s555_s0 = inlined_call_operand.vmem [shape: bf16[2,16,512], index: 0, kind: input, shape index: {}]   ;;  %s556_s1 = inlined_call_operand.vmem [shape: f32[1,256], index: 1, kind: input, shape index: {}]   ;;  %s557_s2 = inlined_call_operand.vmem [shape: bf16[2,16,256], index: 2, kind: output, shape index: {}]  }
   0x1   :  { %s490_s11 = smov 0   ;;  %s492_s12 = smov 0  }
   0x2   :  { %s494_s13 = smov 0  }
   0x3 LB: > { %s24_s14 = sadd.s32 1, %s465_s12  ;;  %p40_p1 = scmp.ne.s32.totalorder %s457_s10, %s453_s9  ;;  %s469_s13 = sphi %s494_s13, %s12_s13   ;;  %s465_s12 = sphi %s492_s12, %s561_s12   ;;  %s461_s11 = sphi %s490_s11, %s560_s11   ;;  %s457_s10 = sphi %s488_s10, %s559_s10   ;;  %s453_s9 = sphi %s486_s9, %s558_s9  }
   0x4   : > { %p26_p0 = scmp.ge.s32.totalorder %s24_s14, 2  ;;  %p41_p2 = scmp.eq.s32.totalorder %s469_s13, 0 }
   0x5   : > { %s33_s16 = sadd.s32 1, %s457_s10  ;;  %p371_p5 = scmp.ge.s32.totalorder %s469_s13, 2 }
   0x6   : > { %s563_s14 = smov (%p26_p0, %s24_s14), 0  ;;  %p42_p3 = por %p41_p2, %p40_p1 }
   0x7   : > { %s28_s15 = ssub.s32 %s465_s12, %s563_s14  ;;  %118 = sbr.rel (%p371_p5) target bundleno = 17 (0x11), region = 20 }
   0x8   : > { %p31_p4 = scmp.eq.s32.totalorder %s28_s15, 0 }
   0xa   : > { %s521_s17 = scalar_select %p31_p4, %s457_s10, %s33_s16  }
   0xc   : > { %121 = sbr.rel (!%p42_p3) target bundleno = 17 (0x11), region = 24  ;;  %s123_s18 = sand.u32 (%p42_p3), 1, %s457_s10  }
   0xd   : > { %s383_s19 = sshll.u32 (%p42_p3), %s465_s12, 5  ;;  %s372_s20 = sshll.u32 (%p42_p3), %s123_s18, 4 }
   0xe   : > { %s131_s23 = scalar_lea.vmem (%p42_p3), %s555_s0, %s383_s19  ;;  %s125_s24 = scalar_lea.vmem (%p42_p3), [#allocation2], %s372_s20 }
   0xf   : > { %v162_v0 = vld [vmem:[%s131_s23] sm:$0xff] (%p42_p3)  ;;  %v164_v1 = vld [vmem:[%s131_s23 + $0x10] sm:$0xff] (%p42_p3) }
  0x10   : > { %163 = vst [vmem:[%s125_s24] sm:$0xff] (%p42_p3), %v162_v0  ;;  %165 = vst [vmem:[%s125_s24 + $0x8] sm:$0xff] (%p42_p3), %v164_v1 }
  0x11 PF: > { %p375_p6 = scmp.ge.s32.totalorder %s469_s13, 1  ;;  %p170_p7 = scmp.lt.s32.totalorder %s469_s13, 3 }
  0x13   : > { %p171_p8 = pnand %p375_p6, %p170_p7 }
  0x14   : > { %s177_s25 = sand.u32 (!%p171_p8), 1, %s453_s9   ;;  %p205_p9 = scmp.lt.s32.totalorder (!%p171_p8), %s461_s11, 1 }
  0x15   : > { %174 = sbr.rel (%p171_p8) target bundleno = 200 (0xc8), region = 62  ;;  %s376_s26 = sshll.u32 (!%p171_p8), %s177_s25, 4 }
  0x16   : > { %s179_s27 = scalar_lea.vmem (!%p171_p8), [#allocation2], %s376_s26 }
  0x1a   : > { %v215_v2 = vld [vmem:[%s179_s27] sm:$0xff]  ;;  %v216_v3 = vld [vmem:[%s179_s27 + $0x8] sm:$0xff]  ;;  %v244_v18 = vlaneseq  ;;  %s565_s11 = smov (!%p205_p9, %s461_s11), 1 }
  0x1b   : > { %v217_v4 = vunpack.c.l.bf16 %v215_v2  ;;  %v218_v5 = vunpack.c.h.bf16 %v215_v2  ;;  %v219_v6 = vunpack.c.l.bf16 %v216_v3  ;;  %v220_v7 = vunpack.c.h.bf16 %v216_v3  ;;  %v242_v24 = vld [vmem:[%s556_s1] sm:$0x3]  ;;  %s384_s30 = sshll.u32 %s565_s11, 4 }
  0x1c   : > { %v245_v21 = vshrl.u32 %v244_v18, 7  ;;  %s213_s5 = scalar_lea.vmem %s557_s2, %s384_s30 }
  0x1d   : > { %v221_v8 = vmul.f32 %v217_v4, %v217_v4  ;;  %v222_v9 = vmul.f32 %v218_v5, %v218_v5  ;;  %v223_v10 = vmul.f32 %v219_v6, %v219_v6  ;;  %v224_v11 = vmul.f32 %v220_v7, %v220_v7 }
  0x1e   : > { %v246_v22 = vsub.s32 0, %v245_v21  ;;  %v250_v23 = vsub.s32 1, %v245_v21 }
  0x1f   : > { %v225_v12 = vadd.f32 %v222_v9, %v221_v8  ;;  %v228_v13 = vadd.f32 %v224_v11, %v223_v10 }
  0x20   : > { %v247_v25 = vrot.slane %v242_v24, %v246_v22  ;;  %v251_v26 = vrot.slane %v242_v24, %v250_v23 }
  0x21   : > { %226 = vadd.xlane.f32.xlu0 %v225_v12 }
  0x25   : > { %229 = vadd.xlane.f32.xlu0 %v228_v13 }
  0xaa   : > { %v227_v14 = vpop.xlane.xlu0 %226 }
  0xab   : > { %v232_v15 = vmul.f32 0.00390625, %v227_v14 }
  0xad   : > { %v234_v16 = vadd.f32 1e-06, %v232_v15 }
  0xae   : > { %v230_v17 = vpop.xlane.xlu0 %229 }
  0xaf   : > { %427 = vrsqrt.f32 %v234_v16  ;;  %v233_v19 = vmul.f32 0.00390625, %v230_v17 }
  0xb1   : > { %v235_v20 = vadd.f32 1e-06, %v233_v19 }
  0xb3   : > { %429 = vrsqrt.f32 %v235_v20 }
  0xbc   : > { %v428_v27 = vpop.eup %427 }
  0xbd   : > { %v238_v28 = vmul.f32 %v428_v27, %v217_v4  ;;  %v239_v29 = vmul.f32 %v428_v27, %v218_v5 }
  0xbf   : > { %v254_v30 = vmul.f32 %v247_v25, %v238_v28  ;;  %v255_v31 = vmul.f32 %v251_v26, %v239_v29 }
  0xc0   : > { %v430_v32 = vpop.eup %429 }
  0xc1   : > { %v385_v33 = vpack.c.bf16 %v255_v31, %v254_v30  ;;  %v240_v34 = vmul.f32 %v430_v32, %v219_v6  ;;  %v241_v35 = vmul.f32 %v430_v32, %v220_v7 }
  0xc3   : > { %270 = vst [vmem:[%s213_s5] sm:$0xff] %v385_v33  ;;  %v256_v36 = vmul.f32 %v247_v25, %v240_v34  ;;  %v257_v37 = vmul.f32 %v251_v26, %v241_v35 }
  0xc5   : > { %v386_v38 = vpack.c.bf16 %v257_v37, %v256_v36 }
  0xc7   : > { %271 = vst [vmem:[%s213_s5 + $0x8] sm:$0xff] %v386_v38 }
  0xc8 PF: > { %s12_s13 = sadd.s32 1, %s469_s13   ;;  %s558_s9 = smov %s457_s10 }
  0xc9   : > { %p9_p10 = scmp.ge.s32.totalorder %s12_s13, 4   ;;  %s559_s10 = smov %s521_s17 }
  0xca   : > { %s560_s11 = smov %s465_s12  ;;  %s561_s12 = smov %s563_s14 }
  0xcb   :  { %11 = sbr.rel (!%p9_p10) target bundleno = 3 (0x3), region = 101 }

// kernel: wan_attention_block.19
= control target key start
LH: loop header
LB: loop body
LE: loop exit
PB: predicated region body
PF: predicated region fallthrough
CT: control target
= control target key end

     0   :  { %s1299_s12 = smov 0   ;;  %s1301_s13 = smov 0   ;;  %s1544_s0 = inlined_call_operand.vmem [shape: f32[2,16,256], index: 0, kind: input, shape index: {}]   ;;  %s1545_s1 = inlined_call_operand.vmem [shape: bf16[256,512], index: 1, kind: input, shape index: {}]   ;;  %s1546_s2 = inlined_call_operand.vmem [shape: f32[1,512], index: 2, kind: input, shape index: {}]   ;;  %s1547_s3 = inlined_call_operand.vmem [shape: bf16[2,16,512], index: 3, kind: output, shape index: {}]  }
   0x1   :  { %s1303_s14 = smov 0  }
   0x2 LB: > { %s39_s15 = sadd.s32 1, %s1273_s13  ;;  %p1054_p0 = scmp.ge.s32.totalorder %s1277_s14, 1  ;;  %s1277_s14 = sphi %s1303_s14, %s13_s14   ;;  %s1273_s13 = sphi %s1301_s13, %s1549_s13   ;;  %s1269_s12 = sphi %s1299_s12, %s1548_s12  }
   0x3   : > { %p41_p1 = scmp.ge.s32.totalorder %s39_s15, 2  ;;  %p211_p2 = scmp.lt.s32.totalorder %s1277_s14, 3 }
   0x5   : > { %s1551_s15 = smov (%p41_p1, %s39_s15), 0  ;;  %p212_p3 = pnand %p1054_p0, %p211_p2 }
   0x6   : > { %p269_p4 = scmp.lt.s32.totalorder (!%p212_p3), %s1269_s12, 1 }
   0x7   : > { %215 = sbr.rel (%p212_p3) target bundleno = 281 (0x119), region = 32 }
   0xc   : > { %v1159_v0 = vld [vmem:[%s1545_s1 + $0xe4] ss:$16 sps:$4 sm:$0xff]   ;;  %v1161_v1 = vld [vmem:[%s1545_s1 + $0xec] ss:$16 sps:$4 sm:$0xff]   ;;  %v1163_v2 = vld [vmem:[%s1545_s1 + $0xe0] ss:$16 sps:$4 sm:$0xff]  }
   0xd   : > { %726 = vmatprep.subr.bf16.mxu0 %v1159_v0  ;;  %v1164_v3 = vld [vmem:[%s1545_s1 + $0xe8] ss:$16 sps:$4 sm:$0xff]   ;;  %769 = vmatprep.subr.bf16.mxu1 %v1161_v1  ;;  %v1165_v4 = vld [vmem:[%s1545_s1 + $0xc4] ss:$16 sps:$4 sm:$0xff]   ;;  %v1167_v5 = vld [vmem:[%s1545_s1 + $0xcc] ss:$16 sps:$4 sm:$0xff]  }
   0xe   : > { %727 = vmatpush1.bf16.msra.mxu0 %v1163_v2  ;;  %770 = vmatpush1.bf16.msra.mxu1 %v1164_v3  ;;  %v1169_v6 = vld [vmem:[%s1545_s1 + $0xc0] ss:$16 sps:$4 sm:$0xff]   ;;  %v1170_v7 = vld [vmem:[%s1545_s1 + $0xc8] ss:$16 sps:$4 sm:$0xff]   ;;  %v1171_v8 = vld [vmem:[%s1545_s1 + $0xa4] ss:$16 sps:$4 sm:$0xff]  }
   0xf   : > { %728 = vmatprep.subr.bf16.mxu0 %v1165_v4  ;;  %771 = vmatprep.subr.bf16.mxu1 %v1167_v5  ;;  %v1173_v9 = vld [vmem:[%s1545_s1 + $0xac] ss:$16 sps:$4 sm:$0xff]   ;;  %v1175_v10 = vld [vmem:[%s1545_s1 + $0xa0] ss:$16 sps:$4 sm:$0xff]   ;;  %v1176_v11 = vld [vmem:[%s1545_s1 + $0xa8] ss:$16 sps:$4 sm:$0xff]  }
  0x10   : > { %v1177_v12 = vld [vmem:[%s1545_s1 + $0x84] ss:$16 sps:$4 sm:$0xff]   ;;  %v1179_v13 = vld [vmem:[%s1545_s1 + $0x8c] ss:$16 sps:$4 sm:$0xff]   ;;  %v1181_v14 = vld [vmem:[%s1545_s1 + $0x80] ss:$16 sps:$4 sm:$0xff]  }
  0x11   : > { %v1182_v15 = vld [vmem:[%s1545_s1 + $0x88] ss:$16 sps:$4 sm:$0xff]   ;;  %v1183_v16 = vld [vmem:[%s1545_s1 + $0x64] ss:$16 sps:$4 sm:$0xff]   ;;  %v1185_v17 = vld [vmem:[%s1545_s1 + $0x6c] ss:$16 sps:$4 sm:$0xff]  }
  0x12   : > { %729 = vmatpush1.bf16.msra.mxu0 %v1169_v6  ;;  %772 = vmatpush1.bf16.msra.mxu1 %v1170_v7  ;;  %v1187_v18 = vld [vmem:[%s1545_s1 + $0x60] ss:$16 sps:$4 sm:$0xff]   ;;  %v1188_v19 = vld [vmem:[%s1545_s1 + $0x68] ss:$16 sps:$4 sm:$0xff]   ;;  %v1189_v20 = vld [vmem:[%s1545_s1 + $0x44] ss:$16 sps:$4 sm:$0xff]   ;;  %v841_v6 = vlaneseq }
  0x13   : > { %730 = vmatprep.subr.bf16.mxu0 %v1171_v8  ;;  %773 = vmatprep.subr.bf16.mxu1 %v1173_v9  ;;  %v1191_v21 = vld [vmem:[%s1545_s1 + $0x4c] ss:$16 sps:$4 sm:$0xff]   ;;  %v1193_v22 = vld [vmem:[%s1545_s1 + $0x40] ss:$16 sps:$4 sm:$0xff]   ;;  %v1194_v23 = vld [vmem:[%s1545_s1 + $0x48] ss:$16 sps:$4 sm:$0xff]  }
  0x14   : > { %v1195_v24 = vld [vmem:[%s1545_s1 + $0x24] ss:$16 sps:$4 sm:$0xff]   ;;  %v1197_v25 = vld [vmem:[%s1545_s1 + $0x2c] ss:$16 sps:$4 sm:$0xff]   ;;  %v1199_v26 = vld [vmem:[%s1545_s1 + $0x20] ss:$16 sps:$4 sm:$0xff]  }
  0x15   : > { %v1200_v27 = vld [vmem:[%s1545_s1 + $0x28] ss:$16 sps:$4 sm:$0xff]   ;;  %v1201_v28 = vld [vmem:[%s1545_s1 + $0x4] ss:$16 sps:$4 sm:$0xff]   ;;  %v1203_v29 = vld [vmem:[%s1545_s1 + $0xc] ss:$16 sps:$4 sm:$0xff]  }
  0x16   : > { %731 = vmatpush1.bf16.msra.mxu0 %v1175_v10  ;;  %774 = vmatpush1.bf16.msra.mxu1 %v1176_v11  ;;  %v1205_v30 = vld [vmem:[%s1545_s1] ss:$16 sps:$4 sm:$0xff]   ;;  %v1206_v31 = vld [vmem:[%s1545_s1 + $0x8] ss:$16 sps:$4 sm:$0xff]   ;;  %v1207_v32 = vld [vmem:[%s1545_s1 + $0x1e4] ss:$16 sps:$4 sm:$0xff]  }
  0x17   : > { %732 = vmatprep.subr.bf16.mxu0 %v1177_v12  ;;  %775 = vmatprep.subr.bf16.mxu1 %v1179_v13  ;;  %v1209_v33 = vld [vmem:[%s1545_s1 + $0x1ec] ss:$16 sps:$4 sm:$0xff]   ;;  %v1211_v34 = vld [vmem:[%s1545_s1 + $0x1e0] ss:$16 sps:$4 sm:$0xff]   ;;  %v1212_v35 = vld [vmem:[%s1545_s1 + $0x1e8] ss:$16 sps:$4 sm:$0xff]  }
  0x18   : > { %v1213_v36 = vld [vmem:[%s1545_s1 + $0x1c4] ss:$16 sps:$4 sm:$0xff]   ;;  %s1553_s12 = smov (!%p269_p4, %s1269_s12), 1  ;;  %v1215_v37 = vld [vmem:[%s1545_s1 + $0x1cc] ss:$16 sps:$4 sm:$0xff]   ;;  %v842_v7 = vshrl.u32 %v841_v6, 7 }
  0x19   : > { %v1217_v38 = vld [vmem:[%s1545_s1 + $0x1c0] ss:$16 sps:$4 sm:$0xff]   ;;  %v1218_v39 = vld [vmem:[%s1545_s1 + $0x1c8] ss:$16 sps:$4 sm:$0xff]   ;;  %v1219_v40 = vld [vmem:[%s1545_s1 + $0x1a4] ss:$16 sps:$4 sm:$0xff]  }
  0x1a   : > { %733 = vmatpush1.bf16.msra.mxu0 %v1181_v14  ;;  %776 = vmatpush1.bf16.msra.mxu1 %v1182_v15  ;;  %s1129_s29 = sshll.u32 %s1553_s12, 5  ;;  %v1221_v41 = vld [vmem:[%s1545_s1 + $0x1ac] ss:$16 sps:$4 sm:$0xff]   ;;  %v1223_v42 = vld [vmem:[%s1545_s1 + $0x1a0] ss:$16 sps:$4 sm:$0xff]   ;;  %v843_v8 = vsub.s32 0, %v842_v7 }
  0x1b   : > { %734 = vmatprep.subr.bf16.mxu0 %v1183_v16  ;;  %777 = vmatprep.subr.bf16.mxu1 %v1185_v17  ;;  %v1224_v43 = vld [vmem:[%s1545_s1 + $0x1a8] ss:$16 sps:$4 sm:$0xff]   ;;  %s1461_s11 = scalar_lea.vmem %s1544_s0, %s1129_s29  ;;  %v1225_v44 = vld [vmem:[%s1545_s1 + $0x184] ss:$16 sps:$4 sm:$0xff]   ;;  %v1227_v45 = vld [vmem:[%s1545_s1 + $0x18c] ss:$16 sps:$4 sm:$0xff]   ;;  %s313_s17 = scalar_lea.vmem %s1547_s3, %s1129_s29 }
  0x1c   : > { %v337_v46 = vld [vmem:[%s1461_s11 + $0x8] sm:$0xff]  ;;  %v339_v47 = vld [vmem:[%s1461_s11 + $0x18] sm:$0xff]  ;;  %v1229_v48 = vld [vmem:[%s1545_s1 + $0x180] ss:$16 sps:$4 sm:$0xff]   ;;  %v851_v9 = vsub.s32 2, %v842_v7  ;;  %v847_v10 = vsub.s32 1, %v842_v7 }
  0x1d   : > { %v1230_v49 = vld [vmem:[%s1545_s1 + $0x188] ss:$16 sps:$4 sm:$0xff]   ;;  %v341_v50 = vpack.c.bf16 %v339_v47, %v337_v46  ;;  %v1231_v51 = vld [vmem:[%s1545_s1 + $0x164] ss:$16 sps:$4 sm:$0xff]   ;;  %v1233_v52 = vld [vmem:[%s1545_s1 + $0x16c] ss:$16 sps:$4 sm:$0xff]  }
  0x1e   : > { %735 = vmatpush1.bf16.msra.mxu0 %v1187_v18  ;;  %778 = vmatpush1.bf16.msra.mxu1 %v1188_v19  ;;  %v1235_v53 = vld [vmem:[%s1545_s1 + $0x160] ss:$16 sps:$4 sm:$0xff]   ;;  %v1236_v54 = vld [vmem:[%s1545_s1 + $0x168] ss:$16 sps:$4 sm:$0xff]   ;;  %v1237_v55 = vld [vmem:[%s1545_s1 + $0x144] ss:$16 sps:$4 sm:$0xff]  }
  0x1f   : > { %736 = vmatprep.subr.bf16.mxu0 %v1189_v20  ;;  %779 = vmatprep.subr.bf16.mxu1 %v1191_v21  ;;  %v1239_v56 = vld [vmem:[%s1545_s1 + $0x14c] ss:$16 sps:$4 sm:$0xff]   ;;  %v1241_v57 = vld [vmem:[%s1545_s1 + $0x140] ss:$16 sps:$4 sm:$0xff]   ;;  %v1242_v58 = vld [vmem:[%s1545_s1 + $0x148] ss:$16 sps:$4 sm:$0xff]  }
  0x20   : > { %758 = vmatprep.mubr.bf16.mxu0 %v341_v50  ;;  %801 = vmatprep.mubr.bf16.mxu1 %v341_v50  ;;  %v1243_v59 = vld [vmem:[%s1545_s1 + $0x124] ss:$16 sps:$4 sm:$0xff]   ;;  %v1245_v60 = vld [vmem:[%s1545_s1 + $0x12c] ss:$16 sps:$4 sm:$0xff]   ;;  %v1247_v61 = vld [vmem:[%s1545_s1 + $0x120] ss:$16 sps:$4 sm:$0xff]  }
  0x21   : > { %v1248_v62 = vld [vmem:[%s1545_s1 + $0x128] ss:$16 sps:$4 sm:$0xff]   ;;  %v1249_v63 = vld [vmem:[%s1545_s1 + $0x104] ss:$16 sps:$4 sm:$0xff]   ;;  %v1251_v0 = vld [vmem:[%s1545_s1 + $0x10c] ss:$16 sps:$4 sm:$0xff]  }
  0x22   : > { %737 = vmatpush1.bf16.msra.mxu0 %v1193_v22  ;;  %780 = vmatpush1.bf16.msra.mxu1 %v1194_v23  ;;  %v1253_v1 = vld [vmem:[%s1545_s1 + $0x100] ss:$16 sps:$4 sm:$0xff]   ;;  %v1254_v2 = vld [vmem:[%s1545_s1 + $0x108] ss:$16 sps:$4 sm:$0xff]   ;;  %v855_v11 = vsub.s32 3, %v842_v7 }
  0x23   : > { %738 = vmatprep.subr.bf16.mxu0 %v1195_v24  ;;  %781 = vmatprep.subr.bf16.mxu1 %v1197_v25  ;;  %v336_v3 = vld [vmem:[%s1461_s11] sm:$0xff]  ;;  %v338_v4 = vld [vmem:[%s1461_s11 + $0x10] sm:$0xff] }
  0x24   : > { %v340_v5 = vpack.c.bf16 %v338_v4, %v336_v3  ;;  %v839_v12 = vld [vmem:[%s1546_s2] sm:$0xf] }
  0x25   : > { %v844_v13 = vrot.slane %v839_v12, %v843_v8  ;;  %v852_v14 = vrot.slane %v839_v12, %v851_v9  ;;  %v848_v15 = vrot.slane %v839_v12, %v847_v10  ;;  %v856_v16 = vrot.slane %v839_v12, %v855_v11 }
  0x26   : > { %739 = vmatpush1.bf16.msra.mxu0 %v1199_v26  ;;  %782 = vmatpush1.bf16.msra.mxu1 %v1200_v27 }
  0x27   : > { %740 = vmatprep.subr.bf16.mxu0 %v1201_v28  ;;  %783 = vmatprep.subr.bf16.mxu1 %v1203_v29 }
  0x2a   : > { %741 = vmatpush1.bf16.msra.mxu0 %v1205_v30  ;;  %784 = vmatpush1.bf16.msra.mxu1 %v1206_v31 }
  0x2b   : > { %742 = vmatprep.subr.bf16.mxu0 %v1207_v32  ;;  %785 = vmatprep.subr.bf16.mxu1 %v1209_v33 }
  0x2e   : > { %743 = vmatpush2.bf16.msra.mxu0 %v1211_v34  ;;  %786 = vmatpush2.bf16.msra.mxu1 %v1212_v35 }
  0x2f   : > { %744 = vmatprep.subr.bf16.mxu0 %v1213_v36  ;;  %787 = vmatprep.subr.bf16.mxu1 %v1215_v37 }
  0x32   : > { %745 = vmatpush2.bf16.msra.mxu0 %v1217_v38  ;;  %788 = vmatpush2.bf16.msra.mxu1 %v1218_v39 }
  0x33   : > { %746 = vmatprep.subr.bf16.mxu0 %v1219_v40  ;;  %789 = vmatprep.subr.bf16.mxu1 %v1221_v41 }
  0x36   : > { %747 = vmatpush2.bf16.msra.mxu0 %v1223_v42  ;;  %790 = vmatpush2.bf16.msra.mxu1 %v1224_v43 }
  0x37   : > { %748 = vmatprep.subr.bf16.mxu0 %v1225_v44  ;;  %791 = vmatprep.subr.bf16.mxu1 %v1227_v45 }
  0x3a   : > { %749 = vmatpush2.bf16.msra.mxu0 %v1229_v48  ;;  %792 = vmatpush2.bf16.msra.mxu1 %v1230_v49 }
  0x3b   : > { %750 = vmatprep.subr.bf16.mxu0 %v1231_v51  ;;  %793 = vmatprep.subr.bf16.mxu1 %v1233_v52 }
  0x3e   : > { %751 = vmatpush2.bf16.msra.mxu0 %v1235_v53  ;;  %794 = vmatpush2.bf16.msra.mxu1 %v1236_v54 }
  0x3f   : > { %752 = vmatprep.subr.bf16.mxu0 %v1237_v55  ;;  %795 = vmatprep.subr.bf16.mxu1 %v1239_v56 }
  0x42   : > { %753 = vmatpush2.bf16.msra.mxu0 %v1241_v57  ;;  %796 = vmatpush2.bf16.msra.mxu1 %v1242_v58 }
  0x43   : > { %754 = vmatprep.subr.bf16.mxu0 %v1243_v59  ;;  %797 = vmatprep.subr.bf16.mxu1 %v1245_v60 }
  0x46   : > { %755 = vmatpush2.bf16.msra.mxu0 %v1247_v61  ;;  %798 = vmatpush2.bf16.msra.mxu1 %v1248_v62 }
  0x47   : > { %756 = vmatprep.subr.bf16.mxu0 %v1249_v63  ;;  %799 = vmatprep.subr.bf16.mxu1 %v1251_v0 }
  0x4a   : > { %757 = vmatpush2.bf16.msra.mxu0 %v1253_v1  ;;  %800 = vmatpush2.bf16.msra.mxu1 %v1254_v2 }
  0x4d   : > { %759 = vmatmul.mubr.bf16.vlgmr.msra.gmra.mxu0 %v340_v5  ;;  %802 = vmatmul.mubr.bf16.vlgmr.msra.gmra.mxu1 %v340_v5 }
 0x10d   : > { %v760_v17 = vpop.f32.mrf.mxu0  ;;  %v803_v18 = vpop.f32.mrf.mxu1 }
 0x10e   : > { %v861_v21 = vadd.f32 %v844_v13, %v760_v17  ;;  %v863_v22 = vadd.f32 %v852_v14, %v803_v18 }
 0x10f   : > { %v762_v19 = vpop.f32.mrf.mxu0  ;;  %v805_v20 = vpop.f32.mrf.mxu1 }
 0x110   : > { %v862_v23 = vadd.f32 %v848_v15, %v762_v19  ;;  %v864_v24 = vadd.f32 %v856_v16, %v805_v20 }
 0x111   : > { %v764_v25 = vpop.f32.mrf.mxu0  ;;  %v807_v26 = vpop.f32.mrf.mxu1 }
 0x112   : > { %v1131_v27 = vpack.c.bf16 %v862_v23, %v861_v21  ;;  %v1132_v28 = vpack.c.bf16 %v864_v24, %v863_v22  ;;  %v865_v31 = vadd.f32 %v844_v13, %v764_v25  ;;  %v867_v32 = vadd.f32 %v852_v14, %v807_v26 }
 0x113   : > { %v766_v29 = vpop.f32.mrf.mxu0  ;;  %v809_v30 = vpop.f32.mrf.mxu1 }
 0x114   : > { %893 = vst [vmem:[%s313_s17] sm:$0xff] %v1131_v27  ;;  %894 = vst [vmem:[%s313_s17 + $0x8] sm:$0xff] %v1132_v28  ;;  %v866_v33 = vadd.f32 %v848_v15, %v766_v29  ;;  %v868_v34 = vadd.f32 %v856_v16, %v809_v30 }
 0x116   : > { %v1133_v35 = vpack.c.bf16 %v866_v33, %v865_v31  ;;  %v1134_v36 = vpack.c.bf16 %v868_v34, %v867_v32 }
 0x118   : > { %895 = vst [vmem:[%s313_s17 + $0x10] sm:$0xff] %v1133_v35  ;;  %896 = vst [vmem:[%s313_s17 + $0x18] sm:$0xff] %v1134_v36 }
 0x119 PF: > { %s13_s14 = sadd.s32 1, %s1277_s14   ;;  %s1548_s12 = smov %s1273_s13 }
 0x11a   : > { %p10_p5 = scmp.ge.s32.totalorder %s13_s14, 4   ;;  %s1549_s13 = smov %s1551_s15 }
 0x11c   :  { %12 = sbr.rel (!%p10_p5) target bundleno = 2 (0x2), region = 76 }

// kernel: wan_attention_block.22
= control target key start
LH: loop header
LB: loop body
LE: loop exit
PB: predicated region body
PF: predicated region fallthrough
CT: control target
= control target key end

     0   :  { %s1298_s0 = inlined_call_operand.vmem [shape: s32[2], index: 0, kind: input, shape index: {}]   ;;  %s1299_s1 = inlined_call_operand.vmem [shape: bf16[2,16,256], index: 1, kind: input, shape index: {}]   ;;  %s1300_s2 = inlined_call_operand.vmem [shape: bf16[2,16,256], index: 2, kind: input, shape index: {}]   ;;  %s1301_s3 = inlined_call_operand.vmem [shape: bf16[2,16,512], index: 3, kind: input, shape index: {}]   ;;  %s1302_s4 = inlined_call_operand.vmem [shape: bf16[2,16,256], index: 4, kind: output, shape index: {}]  }
   0x1   :  { %s9_s17 = sshll.u32 %s1298_s0, 4  ;;  %s10_s17 = int_to_ptr.vmem [resolvable:$true] %s9_s17 }
   0x2   :  { %s996_s18 = scalar_lea.vmem %s10_s17, 16  ;;  %p1001_p1 = scmp.lt.s32.totalorder %s10_s17, %s10_s17 }
   0x3   :  { %p997_p0 = scmp.ne.s32.totalorder %s10_s17, %s996_s18  ;;  %p1002_p2 = scmp.lt.s32.totalorder %s996_s18, %s996_s18 }
   0x5   :  { %p1003_p3 = por %p1002_p2, %p1001_p1 }
   0x7   :  { %p1004_p4 = pnand %p1003_p3, %p997_p0 }
   0x9   :  { %1007 = shalt.err (!%p1004_p4)  }
   0xa   :  { %s1082_s19 = smov [#allocation6]  }
   0xb   :  { %12 = dma.vmem_to_smem %s10_s17, 16, %s1082_s19, [#allocation5] }
   0xc   :  { %1044 = dma.done.wait [#allocation5], 16 }
   0xd   :  { %1045 = vsyncadd [#allocation5], 4294967280 }
   0xe   :  { %14 = sfence }
   0xf   :  { %s1117_s20 = smov 0   ;;  %s1119_s21 = smov 0  }
  0x10   :  { %s1121_s22 = smov 0   ;;  %s1123_s0 = smov 0  }
  0x11   :  { %s1125_s23 = smov 0   ;;  %s1127_s24 = smov 0  }
  0x12   :  { %s1129_s25 = smov 0   ;;  %s1131_s26 = smov 0  }
  0x13   :  { %s1133_s27 = smov 0  }
  0x14 LB: > { %s843_s28 = sadd.s32 4294967295, %s1080_s27   ;;  %s42_s29 = sadd.s32 1, %s1072_s25  ;;  %s1080_s27 = sphi %s1133_s27, %s20_s27   ;;  %s1076_s26 = sphi %s1131_s26, %s1316_s26   ;;  %s1072_s25 = sphi %s1129_s25, %s1315_s25   ;;  %s1068_s24 = sphi %s1127_s24, %s1314_s24   ;;  %s1064_s23 = sphi %s1125_s23, %s1313_s23   ;;  %s1060_s0 = sphi %s1123_s0, %s1312_s0   ;;  %s1056_s22 = sphi %s1121_s22, %s1311_s22   ;;  %s1052_s21 = sphi %s1119_s21, %s1310_s21   ;;  %s1048_s20 = sphi %s1117_s20, %s1309_s20  }
  0x15   : > { %p44_p5 = scmp.ge.s32.totalorder %s42_s29, 2  ;;  %s46_s30 = sadd.s32 1, %s1076_s26 }
  0x16   : > { %s57_s5 = sadd.s32 1, %s1060_s0  ;;  %p64_p6 = scmp.ne.s32.totalorder %s1060_s0, %s1056_s22 }
  0x17   : > { %s1318_s29 = smov (%p44_p5, %s42_s29), 0  ;;  %s1320_s30 = smov (!%p44_p5, %s46_s30), %s1076_s26 }
  0x18   : > { %s53_s6 = ssub.s32 %s1072_s25, %s1318_s29  ;;  %p65_p7 = scmp.eq.s32.totalorder %s1080_s27, 0 }
  0x19   : > { %p48_p8 = scmp.ge.s32.totalorder %s1320_s30, 2  ;;  %s110_s7 = sadd.s32 2, %s1072_s25 }
  0x1a   : > { %p1180_p9 = por %p65_p7, %p64_p6  ;;  %s111_s9 = sadd.s32 2, %s1318_s29 }
  0x1b   : > { %s1322_s30 = smov (%p48_p8, %s1320_s30), 0  ;;  %s115_s10 = ssub.s32 %s110_s7, %s111_s9 }
  0x1c   : > { %1305 = sst [smem:[#allocation12_spill]] %s1322_s30  ;;  %s119_s11 = sadd.s32 1, %s1052_s21 }
  0x1d   : > { %s50_s12 = ssub.s32 %s1076_s26, %s1322_s30  ;;  %p126_p10 = scmp.ne.s32.totalorder %s1052_s21, %s1048_s20 }
  0x1e   : > { %s54_s13 = sor.u32 %s53_s6, %s50_s12  ;;  %s116_s14 = sor.u32 %s115_s10, %s50_s12 }
  0x1f   : > { %p55_p11 = scmp.eq.s32.totalorder %s54_s13, 0  ;;  %p117_p12 = scmp.eq.s32.totalorder %s116_s14, 0 }
  0x20   : > { %p1194_p13 = por %p126_p10, %p65_p7  ;;  %p160_p0 = scmp.eq.s32.totalorder %s843_s28, 3 }
  0x21   : > { %s1199_s16 = scalar_select %p55_p11, %s1060_s0, %s57_s5  }
  0x22   : > { %s1202_s17 = scalar_select %p117_p12, %s1052_s21, %s119_s11  }
  0x23   : > { %p1207_p1 = por %p160_p0, %p64_p6  ;;  %p846_p2 = scmp.ge.s32.totalorder %s1080_s27, 4 }
  0x25   : > { %182 = sbr.rel (%p846_p2) target bundleno = 63 (0x3f), region = 16 }
  0x2a   : > { %185 = sbr.rel (!%p1180_p9) target bundleno = 49 (0x31), region = 20  ;;  %s187_s19 = sand.u32 (%p1180_p9), 1, %s1060_s0  }
  0x2b   : > { %s848_s28 = sshll.u32 (%p1180_p9), %s1076_s26, 2  ;;  %s847_s5 = sshll.u32 (%p1180_p9), %s187_s19, 3 }
  0x2c   : > { %s194_s6 = sadd.s32 (%p1180_p9), %s1072_s25, %s848_s28  ;;  %s189_s12 = scalar_lea.vmem (%p1180_p9), [#allocation7], %s847_s5 }
  0x2d   : > { %s849_s7 = sshll.u32 (%p1180_p9), %s194_s6, 2 }
  0x2e   : > { %s196_s11 = scalar_lea.vmem (%p1180_p9), %s1299_s1, %s849_s7 }
  0x2f   : > { %v213_v0 = vld [vmem:[%s196_s11] sm:$0xf]  ;;  %v215_v1 = vld [vmem:[%s196_s11 + $0x8] sm:$0xf] }
  0x30   : > { %214 = vst [vmem:[%s189_s12] sm:$0xf] %v213_v0  ;;  %216 = vst [vmem:[%s189_s12 + $0x4] sm:$0xf] %v215_v1 }
  0x31 PF: > { %244 = sbr.rel (!%p1180_p9) target bundleno = 56 (0x38), region = 61  ;;  %s246_s13 = sand.u32 (%p1180_p9), 1, %s1060_s0  }
  0x32   : > { %s851_s14 = sshll.u32 (%p1180_p9), %s1076_s26, 2  ;;  %s850_s19 = sshll.u32 (%p1180_p9), %s246_s13, 3 }
  0x33   : > { %s253_s28 = sadd.s32 (%p1180_p9), %s1072_s25, %s851_s14  ;;  %s248_s5 = scalar_lea.vmem (%p1180_p9), [#allocation8], %s850_s19 }
  0x34   : > { %s852_s6 = sshll.u32 (%p1180_p9), %s253_s28, 2 }
  0x35   : > { %s255_s7 = scalar_lea.vmem (%p1180_p9), %s1300_s2, %s852_s6 }
  0x36   : > { %v272_v2 = vld [vmem:[%s255_s7] sm:$0xf]  ;;  %v274_v3 = vld [vmem:[%s255_s7 + $0x8] sm:$0xf] }
  0x37   : > { %273 = vst [vmem:[%s248_s5] sm:$0xf] %v272_v2  ;;  %275 = vst [vmem:[%s248_s5 + $0x4] sm:$0xf] %v274_v3 }
  0x38 PF: > { %303 = sbr.rel (!%p1194_p13) target bundleno = 63 (0x3f), region = 102  ;;  %s305_s8 = sand.u32 (%p1194_p13), 1, %s1052_s21  }
  0x39   : > { %s854_s10 = sshll.u32 (%p1194_p13), %s1076_s26, 3  ;;  %s853_s11 = sshll.u32 (%p1194_p13), %s305_s8, 3 }
  0x3a   : > { %s749_s12 = sadd.s32 (%p1194_p13), %s1072_s25, %s854_s10  ;;  %s307_s19 = scalar_lea.vmem (%p1194_p13), [#allocation9], %s853_s11 }
  0x3b   : > { %s855_s13 = sshll.u32 (%p1194_p13), %s749_s12, 2 }
  0x3c   : > { %s751_s28 = scalar_lea.vmem (%p1194_p13), %s1301_s3, %s855_s13 }
  0x3d   : > { %v856_v4 = vld [vmem:[%s751_s28 + $0x8] sm:$0xf]  ;;  %v857_v5 = vld [vmem:[%s751_s28 + $0x18] sm:$0xf] }
  0x3e   : > { %333 = vst [vmem:[%s307_s19] sm:$0xf] %v856_v4  ;;  %335 = vst [vmem:[%s307_s19 + $0x4] sm:$0xf] %v857_v5 }
  0x3f PF: > { %p858_p3 = scmp.ge.s32.totalorder %s1080_s27, 1  ;;  %p362_p4 = scmp.lt.s32.totalorder %s1080_s27, 5 }
  0x41   : > { %p363_p5 = pnand %p858_p3, %p362_p4 }
  0x42   : > { %s369_s15 = sand.u32 (!%p363_p5), 1, %s1056_s22   ;;  %s383_s6 = sand.u32 (!%p363_p5), 1, %s1048_s20  }
  0x43   : > { %366 = sbr.rel (%p363_p5) target bundleno = 931 (0x3a3), region = 143  ;;  %s859_s9 = sshll.u32 (!%p363_p5), %s369_s15, 3 }
  0x44   : > { %s1240_s7 = sshll.u32 (!%p363_p5), %s383_s6, 3  ;;  %s419_s5 = sld [smem:[#allocation6 + %s1068_s24]] (!%p363_p5) }
  0x45   : > { %s371_s22 = scalar_lea.vmem (!%p363_p5), [#allocation7], %s859_s9  ;;  %s378_s20 = scalar_lea.vmem (!%p363_p5), [#allocation8], %s859_s9 }
  0x46   : > { %s385_s8 = scalar_lea.vmem (!%p363_p5), [#allocation9], %s1240_s7  ;;  %s1248_s10 = scalar_lea.vmem (!%p363_p5), [#allocation10], %s859_s9 }
  0x48   : > { %vm424_vm0 = vcmask 7168   ;;  %v1083_v6 = vmov -inf   ;;  %v1084_v7 = vmov 0.0  }
  0x49   : > { %425 = vst.msk [vmem:[#allocation2] sm:$0xff] %vm424_vm0, %v1083_v6  ;;  %426 = vst.msk [vmem:[#allocation2 + $0x8] sm:$0xff] %vm424_vm0, %v1083_v6 }
  0x4a   : > { %427 = vst.msk [vmem:[#allocation3] sm:$0xff] %vm424_vm0, %v1084_v7  ;;  %428 = vst.msk [vmem:[#allocation3 + $0x8] sm:$0xff] %vm424_vm0, %v1084_v7  ;;  %p864_p6 = scmp.le.s32.totalorder %s419_s5, 0 }
  0x4b   : > { %429 = vst [vmem:[#allocation4] sm:$0xff] %v1084_v7  ;;  %430 = vst [vmem:[#allocation4 + $0x8] sm:$0xff] %v1084_v7 }
  0x4c   : > { %435 = sbr.rel (%p864_p6) target bundleno = 773 (0x305), region = 163 }
  0x51   : > { %v980_v8 = vld [vmem:[%s378_s20] sm:$0xff]   ;;  %v1085_v9 = vmov 0.0   ;;  %vm1086_vm1 = vmmov 0   ;;  %v981_v10 = vld [vmem:[%s371_s22] sm:$0xff]   ;;  %v493_v11 = vlaneseq  ;;  %v497_v13 = vstv %s419_s5 }
  0x52   : > { %887 = vmatprep.subr.bf16.mxu0 %v1085_v9  ;;  %893 = vmatprep.subr.bf16.mxu1 %v1085_v9  ;;  %vm503_vm3 = vcmask 130048   ;;  %v1087_v22 = vmov 0   ;;  %v501_v23 = vld [vmem:[#allocation2] sm:$0xff]  ;;  %v502_v26 = vld [vmem:[#allocation2 + $0x8] sm:$0xff]  ;;  %v982_v31 = vld [vmem:[%s385_s8] sm:$0xff]  }
  0x53   : > { %888 = vmatpush3.bf16.xpose.msra.mxu0 %v980_v8  ;;  %889 = vmatprep.mubr.msk.bf16.mxu0 %vm1086_vm1, %v1085_v9  ;;  %v494_v12 = vand.u32 127, %v493_v11  ;;  %v534_v47 = vld [vmem:[#allocation3] sm:$0xff]  ;;  %v535_v50 = vld [vmem:[#allocation3 + $0x8] sm:$0xff]  ;;  %v549_v55 = vld [vmem:[#allocation4] sm:$0xff] }
  0x54   : > { %895 = vmatprep.mubr.msk.bf16.mxu1 %vm1086_vm1, %v1085_v9  ;;  %978 = vset.pattern.permute.xlu1 %v1087_v22  ;;  %v550_v58 = vld [vmem:[#allocation4 + $0x8] sm:$0xff] }
  0x55   : > { %vm498_vm2 = vcmp.lt.s32.totalorder %v494_v12, %v497_v13  ;;  %979 = vset.pattern.permute.xlu0 %v1087_v22  ;;  %894 = vmatpush3.bf16.msra.mxu1 %v982_v31 }
  0x5a   : > { %890 = vmatmul.mubr.bf16.vlgmr.msra.gmra.mxu0 %v981_v10 }
 0x11a   : > { %v486_v14 = vpop.f32.mrf.mxu0 }
 0x11b   : > { %v499_v15 = vsel %vm498_vm2, %v486_v14, -1e+30 }
 0x11c   : > { %v891_v16 = vpop.f32.mrf.mxu0  ;;  %v504_v17 = vsel %vm503_vm3, %v499_v15, -inf }
 0x11d   : > { %505 = vmax.xlane.f32.xlu0 %v504_v17 }
 0x11e   : > { %v489_v18 = vpop.f32.mrf.mxu0 }
 0x11f   : > { %v500_v19 = vsel %vm498_vm2, %v489_v18, -1e+30 }
 0x120   : > { %v892_v20 = vpop.f32.mrf.mxu0  ;;  %v507_v21 = vsel %vm503_vm3, %v500_v19, -inf }
 0x121   : > { %508 = vmax.xlane.f32.xlu0 %v507_v21 }
 0x1a6   : > { %v506_v24 = vpop.xlane.xlu0 %505 }
 0x1a7   : > { %v510_v25 = vmax.f32 %v501_v23, %v506_v24 }
 0x1a9   : > { %v512_v27 = vsub.f32 %v501_v23, %v510_v25  ;;  %620 = vst.msk [vmem:[#allocation2] sm:$0xff] %vm424_vm0, %v510_v25  ;;  %520 = vperm.xlu1 %978, %v510_v25  }
 0x1aa   : > { %v509_v28 = vpop.xlane.xlu0 %508 }
 0x1ab   : > { %v511_v29 = vmax.f32 %v502_v26, %v509_v28  ;;  %v514_v44 = vmul.f32 1.442695, %v512_v27 }
 0x1ad   : > { %v513_v30 = vsub.f32 %v502_v26, %v511_v29  ;;  %621 = vst.msk [vmem:[#allocation2 + $0x8] sm:$0xff] %vm424_vm0, %v511_v29  ;;  %525 = vperm.xlu1 %978, %v511_v29  }
 0x1af   : > { %v516_v41 = vmul.f32 1.442695, %v513_v30 }
 0x224   : > { %v521_v32 = vpop.permute.xlu1 %520 }
 0x225   : > { %v528_v33 = vsub.f32 %v499_v15, %v521_v32 }
 0x227   : > { %v530_v34 = vmul.f32 1.442695, %v528_v33 }
 0x228   : > { %v526_v35 = vpop.permute.xlu1 %525 }
 0x229   : > { %983 = vpow2.f32 %v530_v34  ;;  %v529_v36 = vsub.f32 %v500_v19, %v526_v35 }
 0x22b   : > { %v532_v37 = vmul.f32 1.442695, %v529_v36 }
 0x22d   : > { %985 = vpow2.f32 %v532_v37 }
 0x22e   : > { %987 = vpow2.f32 %v516_v41 }
 0x22f   : > { %989 = vpow2.f32 %v514_v44 }
 0x236   : > { %v984_v38 = vpop.eup %983 }
 0x237   : > { %v538_v39 = vsel %vm503_vm3, %v984_v38, 0.0 }
 0x238   : > { %539 = vadd.xlane.f32.xlu0 %v538_v39 }
 0x23a   : > { %v986_v40 = vpop.eup %985 }
 0x23b   : > { %v541_v42 = vsel %vm503_vm3, %v986_v40, 0.0  ;;  %v563_v43 = vpack.c.bf16 %v986_v40, %v984_v38  ;;  %v988_v45 = vpop.eup %987 }
 0x23c   : > { %542 = vadd.xlane.f32.xlu1 %v541_v42  ;;  %v990_v46 = vpop.eup %989  ;;  %v537_v52 = vmul.f32 %v988_v45, %v535_v50 }
 0x23d   : > { %896 = vmatmul.mubr.msk.bf16.vlgmr.msra.gmra.mxu1 %vm503_vm3, %v563_v43  ;;  %v536_v48 = vmul.f32 %v990_v46, %v534_v47 }
 0x24d   : > { %558 = vperm.xlu1 %978, %v988_v45  }
 0x24e   : > { %553 = vperm.xlu0 %979, %v990_v46  }
 0x2c1   : > { %v540_v49 = vpop.xlane.xlu0 %539 }
 0x2c2   : > { %v544_v51 = vadd.f32 %v540_v49, %v536_v48 }
 0x2c4   : > { %547 = vst.msk [vmem:[#allocation3] sm:$0xff] %vm424_vm0, %v544_v51 }
 0x2c5   : > { %v543_v53 = vpop.xlane.xlu1 %542 }
 0x2c6   : > { %v545_v54 = vadd.f32 %v543_v53, %v537_v52 }
 0x2c8   : > { %548 = vst.msk [vmem:[#allocation3 + $0x8] sm:$0xff] %vm424_vm0, %v545_v54 }
 0x2c9   : > { %v554_v56 = vpop.permute.xlu0 %553  ;;  %v559_v59 = vpop.permute.xlu1 %558 }
 0x2ca   : > { %v561_v57 = vmul.f32 %v554_v56, %v549_v55  ;;  %v562_v63 = vmul.f32 %v559_v59, %v550_v58 }
 0x2fd   : > { %v609_v60 = vpop.f32.mrf.mxu1 }
 0x2fe   : > { %v616_v61 = vadd.f32 %v609_v60, %v561_v57 }
 0x2ff   : > { %v897_v62 = vpop.f32.mrf.mxu1 }
 0x300   : > { %618 = vst [vmem:[#allocation4] sm:$0xff] %v616_v61 }
 0x301   : > { %v612_v0 = vpop.f32.mrf.mxu1 }
 0x302   : > { %v617_v1 = vadd.f32 %v612_v0, %v562_v63 }
 0x303   : > { %v898_v2 = vpop.f32.mrf.mxu1 }
 0x304   : > { %619 = vst [vmem:[#allocation4 + $0x8] sm:$0xff] %v617_v1 }
 0x305 PF: > { %v625_v3 = vld [vmem:[#allocation3] sm:$0xff]  ;;  %v626_v4 = vld [vmem:[#allocation3 + $0x8] sm:$0xff]  ;;  %v1088_v5 = vmov 0   ;;  %s872_s11 = sshll.u32 (%p1207_p1), %s1068_s24, 2 }
 0x306   : > { %991 = vset.pattern.permute.xlu0 %v1088_v5  ;;  %vm627_vm4 = vcmp.gt.f32.partialorder %v625_v3, 0.0  ;;  %vm628_vm5 = vcmp.gt.f32.partialorder %v626_v4, 0.0  ;;  %s668_s12 = sadd.s32 (%p1207_p1), %s1064_s23, %s872_s11 }
 0x307   : > { %v629_v6 = vsel %vm627_vm4, %v625_v3, 1.0  ;;  %v630_v7 = vsel %vm628_vm5, %v626_v4, 1.0  ;;  %v631_v11 = vld [vmem:[#allocation4] sm:$0xff]  ;;  %s873_s13 = sshll.u32 (%p1207_p1), %s668_s12, 2 }
 0x308   : > { %992 = vrcp.f32 %v629_v6  ;;  %s670_s28 = scalar_lea.vmem (%p1207_p1), %s1302_s4, %s873_s13 }
 0x309   : > { %994 = vrcp.f32 %v630_v7 }
 0x30b   : > { %v632_v12 = vld [vmem:[#allocation4 + $0x8] sm:$0xff] }
 0x315   : > { %v993_v8 = vpop.eup %992 }
 0x316   : > { %637 = vperm.xlu0 %991, %v993_v8   ;;  %v995_v9 = vpop.eup %994 }
 0x31a   : > { %642 = vperm.xlu0 %991, %v995_v9  }
 0x391   : > { %v638_v10 = vpop.permute.xlu0 %637 }
 0x392   : > { %v645_v14 = vmul.f32 %v638_v10, %v631_v11 }
 0x395   : > { %v643_v13 = vpop.permute.xlu0 %642 }
 0x396   : > { %v646_v15 = vmul.f32 %v643_v13, %v632_v12  ;;  %663 = sbr.rel (!%p1207_p1) target bundleno = 931 (0x3a3), region = 171 }
 0x398   : > { %v881_v16 = vpack.c.bf16 %v646_v15, %v645_v14 }
 0x39a   : > { %882 = vst [vmem:[%s1248_s10] sm:$0xff] %v881_v16  }
 0x3a1   : > { %v687_v17 = vld [vmem:[%s1248_s10] sm:$0xf]  ;;  %v689_v18 = vld [vmem:[%s1248_s10 + $0x4] sm:$0xf] }
 0x3a2   : > { %688 = vst [vmem:[%s670_s28] sm:$0xf] %v687_v17  ;;  %690 = vst [vmem:[%s670_s28 + $0x8] sm:$0xf] %v689_v18 }
 0x3a3 PF: > { %s20_s27 = sadd.s32 1, %s1080_s27   ;;  %s1308_s18 = sld [smem:[#allocation12_spill]] }
 0x3a4   : > { %p17_p7 = scmp.ge.s32.totalorder %s20_s27, 6   ;;  %s1309_s20 = smov %s1052_s21 }
 0x3a5   : > { %s1310_s21 = smov %s1202_s17  ;;  %s1311_s22 = smov %s1060_s0 }
 0x3a6   : > { %s1312_s0 = smov %s1199_s16  ;;  %s1313_s23 = smov %s1072_s25 }
 0x3a7   : > { %s1314_s24 = smov %s1076_s26  ;;  %s1315_s25 = smov %s1318_s29 }
 0x3a8   :  { %19 = sbr.rel (!%p17_p7) target bundleno = 20 (0x14), region = 259 }
 0x3a9   : > { %s1316_s26 = smov %s1308_s18 }

// kernel: wan_attention_block.23
= control target key start
LH: loop header
LB: loop body
LE: loop exit
PB: predicated region body
PF: predicated region fallthrough
CT: control target
= control target key end

     0   :  { %s1055_s15 = smov 0   ;;  %s1057_s16 = smov 0   ;;  %s1198_s0 = inlined_call_operand.vmem [shape: bf16[2,16,256], index: 0, kind: input, shape index: {}]   ;;  %s1199_s1 = inlined_call_operand.vmem [shape: bf16[256,256], index: 1, kind: input, shape index: {}]   ;;  %s1200_s2 = inlined_call_operand.vmem [shape: f32[1,256], index: 2, kind: input, shape index: {}]   ;;  %s1201_s3 = inlined_call_operand.vmem [shape: f32[2,16,256], index: 3, kind: input, shape index: {}]   ;;  %s1202_s4 = inlined_call_operand.vmem [shape: f32[2,16,256], index: 4, kind: output, shape index: {}]  }
   0x1   :  { %s1059_s17 = smov 0  }
   0x2 LB: > { %s40_s18 = sadd.s32 1, %s1024_s16  ;;  %p885_p0 = scmp.ge.s32.totalorder %s1028_s17, 1  ;;  %s1028_s17 = sphi %s1059_s17, %s14_s17   ;;  %s1024_s16 = sphi %s1057_s16, %s1204_s16   ;;  %s1020_s15 = sphi %s1055_s15, %s1203_s15  }
   0x3   : > { %p42_p1 = scmp.ge.s32.totalorder %s40_s18, 2  ;;  %p261_p2 = scmp.lt.s32.totalorder %s1028_s17, 3 }
   0x5   : > { %s1206_s18 = smov (%p42_p1, %s40_s18), 0  ;;  %p262_p3 = pnand %p885_p0, %p261_p2 }
   0x6   : > { %p335_p4 = scmp.lt.s32.totalorder (!%p262_p3), %s1020_s15, 1 }
   0x7   : > { %265 = sbr.rel (%p262_p3) target bundleno = 281 (0x119), region = 36 }
   0xc   : > { %v955_v0 = vld [vmem:[%s1199_s1 + $0x74] ss:$8 sps:$4 sm:$0xff]   ;;  %v957_v1 = vld [vmem:[%s1199_s1 + $0x70] ss:$8 sps:$4 sm:$0xff]   ;;  %v958_v2 = vld [vmem:[%s1199_s1 + $0x64] ss:$8 sps:$4 sm:$0xff]   ;;  %v678_v34 = vlaneseq }
   0xd   : > { %602 = vmatprep.subr.bf16.mxu0 %v955_v0  ;;  %v960_v3 = vld [vmem:[%s1199_s1 + $0x60] ss:$8 sps:$4 sm:$0xff]   ;;  %v961_v4 = vld [vmem:[%s1199_s1 + $0x54] ss:$8 sps:$4 sm:$0xff]   ;;  %v963_v5 = vld [vmem:[%s1199_s1 + $0x50] ss:$8 sps:$4 sm:$0xff]  }
   0xe   : > { %603 = vmatpush1.bf16.msra.mxu0 %v957_v1  ;;  %v964_v6 = vld [vmem:[%s1199_s1 + $0x44] ss:$8 sps:$4 sm:$0xff]   ;;  %v966_v7 = vld [vmem:[%s1199_s1 + $0x40] ss:$8 sps:$4 sm:$0xff]   ;;  %v967_v8 = vld [vmem:[%s1199_s1 + $0x34] ss:$8 sps:$4 sm:$0xff]  }
   0xf   : > { %604 = vmatprep.subr.bf16.mxu0 %v958_v2  ;;  %s1208_s15 = smov (!%p335_p4, %s1020_s15), 1  ;;  %v969_v9 = vld [vmem:[%s1199_s1 + $0x30] ss:$8 sps:$4 sm:$0xff]   ;;  %v970_v10 = vld [vmem:[%s1199_s1 + $0x24] ss:$8 sps:$4 sm:$0xff]   ;;  %v679_v35 = vshrl.u32 %v678_v34, 7 }
  0x10   : > { %s928_s19 = sshll.u32 %s1208_s15, 4  ;;  %v972_v11 = vld [vmem:[%s1199_s1 + $0x20] ss:$8 sps:$4 sm:$0xff]   ;;  %v973_v12 = vld [vmem:[%s1199_s1 + $0x14] ss:$8 sps:$4 sm:$0xff]   ;;  %s929_s22 = sshll.u32 %s1208_s15, 5 }
  0x11   : > { %s1115_s24 = scalar_lea.vmem %s1198_s0, %s928_s19  ;;  %v975_v14 = vld [vmem:[%s1199_s1 + $0x10] ss:$8 sps:$4 sm:$0xff]   ;;  %v976_v15 = vld [vmem:[%s1199_s1 + $0x4] ss:$8 sps:$4 sm:$0xff]   ;;  %v978_v16 = vld [vmem:[%s1199_s1] ss:$8 sps:$4 sm:$0xff]   ;;  %s379_s28 = scalar_lea.vmem %s1201_s3, %s929_s22 }
  0x12   : > { %605 = vmatpush1.bf16.msra.mxu0 %v960_v3  ;;  %v1005_v13 = vld [vmem:[%s1115_s24 + $0x4] ss:$8 sps:$4 sm:$0xff]   ;;  %v979_v17 = vld [vmem:[%s1199_s1 + $0xf4] ss:$8 sps:$4 sm:$0xff]   ;;  %v981_v18 = vld [vmem:[%s1199_s1 + $0xf0] ss:$8 sps:$4 sm:$0xff]   ;;  %s395_s30 = scalar_lea.vmem %s1202_s4, %s929_s22 }
  0x13   : > { %606 = vmatprep.subr.bf16.mxu0 %v961_v4  ;;  %634 = vmatprep.mubr.bf16.mxu0 %v1005_v13  ;;  %v982_v19 = vld [vmem:[%s1199_s1 + $0xe4] ss:$8 sps:$4 sm:$0xff]   ;;  %v984_v20 = vld [vmem:[%s1199_s1 + $0xe0] ss:$8 sps:$4 sm:$0xff]   ;;  %v985_v21 = vld [vmem:[%s1199_s1 + $0xd4] ss:$8 sps:$4 sm:$0xff]  }
  0x14   : > { %v987_v22 = vld [vmem:[%s1199_s1 + $0xd0] ss:$8 sps:$4 sm:$0xff]   ;;  %v988_v23 = vld [vmem:[%s1199_s1 + $0xc4] ss:$8 sps:$4 sm:$0xff]   ;;  %v990_v24 = vld [vmem:[%s1199_s1 + $0xc0] ss:$8 sps:$4 sm:$0xff]  }
  0x15   : > { %v991_v25 = vld [vmem:[%s1199_s1 + $0xb4] ss:$8 sps:$4 sm:$0xff]   ;;  %v993_v26 = vld [vmem:[%s1199_s1 + $0xb0] ss:$8 sps:$4 sm:$0xff]   ;;  %v994_v27 = vld [vmem:[%s1199_s1 + $0xa4] ss:$8 sps:$4 sm:$0xff]  }
  0x16   : > { %607 = vmatpush1.bf16.msra.mxu0 %v963_v5  ;;  %v996_v28 = vld [vmem:[%s1199_s1 + $0xa0] ss:$8 sps:$4 sm:$0xff]   ;;  %v997_v29 = vld [vmem:[%s1199_s1 + $0x94] ss:$8 sps:$4 sm:$0xff]   ;;  %v999_v30 = vld [vmem:[%s1199_s1 + $0x90] ss:$8 sps:$4 sm:$0xff]  }
  0x17   : > { %608 = vmatprep.subr.bf16.mxu0 %v964_v6  ;;  %v1000_v31 = vld [vmem:[%s1199_s1 + $0x84] ss:$8 sps:$4 sm:$0xff]   ;;  %v1002_v32 = vld [vmem:[%s1199_s1 + $0x80] ss:$8 sps:$4 sm:$0xff]   ;;  %v680_v36 = vsub.s32 0, %v679_v35  ;;  %v684_v38 = vsub.s32 1, %v679_v35 }
  0x18   : > { %v1003_v33 = vld [vmem:[%s1115_s24] ss:$8 sps:$4 sm:$0xff]   ;;  %v694_v48 = vld [vmem:[%s379_s28 + $0x10] sm:$0xff]  ;;  %v695_v52 = vld [vmem:[%s379_s28 + $0x18] sm:$0xff] }
  0x19   : > { %v676_v37 = vld [vmem:[%s1200_s2] sm:$0x3]  ;;  %v693_v44 = vld [vmem:[%s379_s28 + $0x8] sm:$0xff] }
  0x1a   : > { %609 = vmatpush1.bf16.msra.mxu0 %v966_v7  ;;  %v681_v39 = vrot.slane %v676_v37, %v680_v36  ;;  %v685_v40 = vrot.slane %v676_v37, %v684_v38  ;;  %v692_v41 = vld [vmem:[%s379_s28] sm:$0xff] }
  0x1b   : > { %610 = vmatprep.subr.bf16.mxu0 %v967_v8 }
  0x1e   : > { %611 = vmatpush1.bf16.msra.mxu0 %v969_v9 }
  0x1f   : > { %612 = vmatprep.subr.bf16.mxu0 %v970_v10 }
  0x22   : > { %613 = vmatpush1.bf16.msra.mxu0 %v972_v11 }
  0x23   : > { %614 = vmatprep.subr.bf16.mxu0 %v973_v12 }
  0x26   : > { %615 = vmatpush1.bf16.msra.mxu0 %v975_v14 }
  0x27   : > { %616 = vmatprep.subr.bf16.mxu0 %v976_v15 }
  0x2a   : > { %617 = vmatpush1.bf16.msra.mxu0 %v978_v16 }
  0x2b   : > { %618 = vmatprep.subr.bf16.mxu0 %v979_v17 }
  0x2e   : > { %619 = vmatpush2.bf16.msra.mxu0 %v981_v18 }
  0x2f   : > { %620 = vmatprep.subr.bf16.mxu0 %v982_v19 }
  0x32   : > { %621 = vmatpush2.bf16.msra.mxu0 %v984_v20 }
  0x33   : > { %622 = vmatprep.subr.bf16.mxu0 %v985_v21 }
  0x36   : > { %623 = vmatpush2.bf16.msra.mxu0 %v987_v22 }
  0x37   : > { %624 = vmatprep.subr.bf16.mxu0 %v988_v23 }
  0x3a   : > { %625 = vmatpush2.bf16.msra.mxu0 %v990_v24 }
  0x3b   : > { %626 = vmatprep.subr.bf16.mxu0 %v991_v25 }
  0x3e   : > { %627 = vmatpush2.bf16.msra.mxu0 %v993_v26 }
  0x3f   : > { %628 = vmatprep.subr.bf16.mxu0 %v994_v27 }
  0x42   : > { %629 = vmatpush2.bf16.msra.mxu0 %v996_v28 }
  0x43   : > { %630 = vmatprep.subr.bf16.mxu0 %v997_v29 }
  0x46   : > { %631 = vmatpush2.bf16.msra.mxu0 %v999_v30 }
  0x47   : > { %632 = vmatprep.subr.bf16.mxu0 %v1000_v31 }
  0x4a   : > { %633 = vmatpush2.bf16.msra.mxu0 %v1002_v32 }
  0x4d   : > { %635 = vmatmul.mubr.bf16.vlgmr.msra.gmra.mxu0 %v1003_v33 }
 0x10d   : > { %v636_v42 = vpop.f32.mrf.mxu0 }
 0x10e   : > { %v688_v43 = vadd.f32 %v681_v39, %v636_v42 }
 0x10f   : > { %v638_v45 = vpop.f32.mrf.mxu0 }
 0x110   : > { %v696_v46 = vadd.f32 %v692_v41, %v688_v43  ;;  %v689_v47 = vadd.f32 %v685_v40, %v638_v45 }
 0x111   : > { %v640_v49 = vpop.f32.mrf.mxu0 }
 0x112   : > { %700 = vst [vmem:[%s395_s30] sm:$0xff] %v696_v46  ;;  %v697_v50 = vadd.f32 %v693_v44, %v689_v47  ;;  %v690_v51 = vadd.f32 %v681_v39, %v640_v49 }
 0x113   : > { %v642_v53 = vpop.f32.mrf.mxu0 }
 0x114   : > { %701 = vst [vmem:[%s395_s30 + $0x8] sm:$0xff] %v697_v50  ;;  %v698_v54 = vadd.f32 %v694_v48, %v690_v51  ;;  %v691_v55 = vadd.f32 %v685_v40, %v642_v53 }
 0x116   : > { %702 = vst [vmem:[%s395_s30 + $0x10] sm:$0xff] %v698_v54  ;;  %v699_v56 = vadd.f32 %v695_v52, %v691_v55 }
 0x118   : > { %703 = vst [vmem:[%s395_s30 + $0x18] sm:$0xff] %v699_v56 }
 0x119 PF: > { %s14_s17 = sadd.s32 1, %s1028_s17   ;;  %s1203_s15 = smov %s1024_s16 }
 0x11a   : > { %p11_p5 = scmp.ge.s32.totalorder %s14_s17, 4   ;;  %s1204_s16 = smov %s1206_s18 }
 0x11c   :  { %13 = sbr.rel (!%p11_p5) target bundleno = 2 (0x2), region = 87 }

// kernel: wan_attention_block.24
= control target key start
LH: loop header
LB: loop body
LE: loop exit
PB: predicated region body
PF: predicated region fallthrough
CT: control target
= control target key end

     0   :  { %s1472_s18 = smov 0   ;;  %s1474_s19 = smov 0   ;;  %s1785_s0 = inlined_call_operand.vmem [shape: f32[2,16,256], index: 0, kind: input, shape index: {}]   ;;  %s1786_s1 = inlined_call_operand.vmem [shape: f32[2,1,256], index: 1, kind: input, shape index: {}]   ;;  %s1787_s2 = inlined_call_operand.vmem [shape: f32[2,1,256], index: 2, kind: input, shape index: {}]   ;;  %s1788_s3 = inlined_call_operand.vmem [shape: bf16[256,512], index: 3, kind: input, shape index: {}]   ;;  %s1789_s4 = inlined_call_operand.vmem [shape: f32[1,512], index: 4, kind: input, shape index: {}]   ;;  %s1790_s5 = inlined_call_operand.vmem [shape: bf16[2,16,512], index: 5, kind: output, shape index: {}]  }
   0x1   :  { %s1476_s20 = smov 0  }
   0x2 LB: > { %s34_s21 = sadd.s32 1, %s1436_s19  ;;  %p1195_p0 = scmp.ge.s32.totalorder %s1440_s20, 1  ;;  %s1440_s20 = sphi %s1476_s20, %s15_s20   ;;  %s1436_s19 = sphi %s1474_s19, %s1792_s19   ;;  %s1432_s18 = sphi %s1472_s18, %s1791_s18  }
   0x3   : > { %p36_p1 = scmp.ge.s32.totalorder %s34_s21, 2  ;;  %p257_p2 = scmp.lt.s32.totalorder %s1440_s20, 3 }
   0x5   : > { %s1794_s21 = smov (%p36_p1, %s34_s21), 0  ;;  %p258_p3 = pnand %p1195_p0, %p257_p2 }
   0x6   : > { %p317_p4 = scmp.lt.s32.totalorder (!%p258_p3), %s1432_s18, 1 }
   0x7   : > { %261 = sbr.rel (%p258_p3) target bundleno = 567 (0x237), region = 40 }
   0xc   : > { %s1796_s18 = smov (!%p317_p4, %s1432_s18), 1  ;;  %v1302_v6 = vld [vmem:[%s1788_s3 + $0xe4] ss:$16 sps:$4 sm:$0xff]   ;;  %v1304_v7 = vld [vmem:[%s1788_s3 + $0xec] ss:$16 sps:$4 sm:$0xff]  }
   0xd   : > { %s1272_s22 = sshll.u32 %s1796_s18, 5  ;;  %v1306_v8 = vld [vmem:[%s1788_s3 + $0xe0] ss:$16 sps:$4 sm:$0xff]   ;;  %v1307_v9 = vld [vmem:[%s1788_s3 + $0xe8] ss:$16 sps:$4 sm:$0xff]   ;;  %840 = vmatprep.subr.bf16.mxu0 %v1302_v6  ;;  %883 = vmatprep.subr.bf16.mxu1 %v1304_v7  ;;  %s1198_s9 = sshll.u32 %s1796_s18, 1 }
   0xe   : > { %s325_s25 = scalar_lea.vmem %s1785_s0, %s1272_s22  ;;  %v1308_v10 = vld [vmem:[%s1788_s3 + $0xc4] ss:$16 sps:$4 sm:$0xff]   ;;  %v1310_v11 = vld [vmem:[%s1788_s3 + $0xcc] ss:$16 sps:$4 sm:$0xff]   ;;  %841 = vmatpush1.bf16.msra.mxu0 %v1306_v8  ;;  %884 = vmatpush1.bf16.msra.mxu1 %v1307_v9  ;;  %v1312_v12 = vld [vmem:[%s1788_s3 + $0xc0] ss:$16 sps:$4 sm:$0xff]   ;;  %s334_s12 = scalar_lea.vmem %s1787_s2, %s1198_s9 }
   0xf   : > { %v1498_v0 = vld [vmem:[%s325_s25] sm:$0xff]  ;;  %v1500_v1 = vld [vmem:[%s325_s25 + $0x8] sm:$0xff]  ;;  %v1502_v2 = vld [vmem:[%s325_s25 + $0x10] sm:$0xff]  ;;  %842 = vmatprep.subr.bf16.mxu0 %v1308_v10  ;;  %885 = vmatprep.subr.bf16.mxu1 %v1310_v11  ;;  %s330_s15 = scalar_lea.vmem %s1786_s1, %s1198_s9 }
  0x10   : > { %v366_v3 = vadd.f32 %v1500_v1, %v1498_v0  ;;  %v1506_v4 = vld [vmem:[%s325_s25 + $0x18] sm:$0xff]  ;;  %v1314_v14 = vld [vmem:[%s1788_s3 + $0xa4] ss:$16 sps:$4 sm:$0xff]   ;;  %v1318_v16 = vld [vmem:[%s1788_s3 + $0xa0] ss:$16 sps:$4 sm:$0xff]   ;;  %s359_s25 = scalar_lea.vmem %s1790_s5, %s1272_s22 }
  0x11   : > { %v369_v5 = vadd.f32 %v1506_v4, %v1502_v2  ;;  %v1313_v13 = vld [vmem:[%s1788_s3 + $0xc8] ss:$16 sps:$4 sm:$0xff]   ;;  %v1316_v15 = vld [vmem:[%s1788_s3 + $0xac] ss:$16 sps:$4 sm:$0xff]   ;;  %v1320_v18 = vld [vmem:[%s1788_s3 + $0x84] ss:$16 sps:$4 sm:$0xff]  }
  0x12   : > { %367 = vadd.xlane.f32.xlu0 %v366_v3  ;;  %843 = vmatpush1.bf16.msra.mxu0 %v1312_v12  ;;  %v1319_v17 = vld [vmem:[%s1788_s3 + $0xa8] ss:$16 sps:$4 sm:$0xff]   ;;  %v1322_v19 = vld [vmem:[%s1788_s3 + $0x8c] ss:$16 sps:$4 sm:$0xff]   ;;  %v1324_v20 = vld [vmem:[%s1788_s3 + $0x80] ss:$16 sps:$4 sm:$0xff]  }
  0x13   : > { %886 = vmatpush1.bf16.msra.mxu1 %v1313_v13  ;;  %844 = vmatprep.subr.bf16.mxu0 %v1314_v14  ;;  %v1325_v21 = vld [vmem:[%s1788_s3 + $0x88] ss:$16 sps:$4 sm:$0xff]   ;;  %v1326_v22 = vld [vmem:[%s1788_s3 + $0x64] ss:$16 sps:$4 sm:$0xff]   ;;  %v1328_v23 = vld [vmem:[%s1788_s3 + $0x6c] ss:$16 sps:$4 sm:$0xff]  }
  0x14   : > { %887 = vmatprep.subr.bf16.mxu1 %v1316_v15  ;;  %v1330_v24 = vld [vmem:[%s1788_s3 + $0x60] ss:$16 sps:$4 sm:$0xff]   ;;  %v1331_v25 = vld [vmem:[%s1788_s3 + $0x68] ss:$16 sps:$4 sm:$0xff]   ;;  %v1332_v26 = vld [vmem:[%s1788_s3 + $0x44] ss:$16 sps:$4 sm:$0xff]  }
  0x15   : > { %v1334_v27 = vld [vmem:[%s1788_s3 + $0x4c] ss:$16 sps:$4 sm:$0xff]   ;;  %v1336_v28 = vld [vmem:[%s1788_s3 + $0x40] ss:$16 sps:$4 sm:$0xff]   ;;  %v1337_v29 = vld [vmem:[%s1788_s3 + $0x48] ss:$16 sps:$4 sm:$0xff]  }
  0x16   : > { %370 = vadd.xlane.f32.xlu0 %v369_v5  ;;  %845 = vmatpush1.bf16.msra.mxu0 %v1318_v16  ;;  %v1338_v30 = vld [vmem:[%s1788_s3 + $0x24] ss:$16 sps:$4 sm:$0xff]   ;;  %v1340_v31 = vld [vmem:[%s1788_s3 + $0x2c] ss:$16 sps:$4 sm:$0xff]   ;;  %v1342_v32 = vld [vmem:[%s1788_s3 + $0x20] ss:$16 sps:$4 sm:$0xff]  }
  0x17   : > { %888 = vmatpush1.bf16.msra.mxu1 %v1319_v17  ;;  %846 = vmatprep.subr.bf16.mxu0 %v1320_v18  ;;  %v1343_v33 = vld [vmem:[%s1788_s3 + $0x28] ss:$16 sps:$4 sm:$0xff]   ;;  %v1344_v34 = vld [vmem:[%s1788_s3 + $0x4] ss:$16 sps:$4 sm:$0xff]   ;;  %v1346_v35 = vld [vmem:[%s1788_s3 + $0xc] ss:$16 sps:$4 sm:$0xff]  }
  0x18   : > { %889 = vmatprep.subr.bf16.mxu1 %v1322_v19  ;;  %v1348_v36 = vld [vmem:[%s1788_s3] ss:$16 sps:$4 sm:$0xff]   ;;  %v1349_v37 = vld [vmem:[%s1788_s3 + $0x8] ss:$16 sps:$4 sm:$0xff]   ;;  %v1350_v38 = vld [vmem:[%s1788_s3 + $0x1e4] ss:$16 sps:$4 sm:$0xff]  }
  0x19   : > { %v1352_v39 = vld [vmem:[%s1788_s3 + $0x1ec] ss:$16 sps:$4 sm:$0xff]   ;;  %v1354_v54 = vld [vmem:[%s1788_s3 + $0x1e0] ss:$16 sps:$4 sm:$0xff]   ;;  %v1355_v55 = vld [vmem:[%s1788_s3 + $0x1e8] ss:$16 sps:$4 sm:$0xff]  }
  0x1a   : > { %847 = vmatpush1.bf16.msra.mxu0 %v1324_v20  ;;  %v1356_v56 = vld [vmem:[%s1788_s3 + $0x1c4] ss:$16 sps:$4 sm:$0xff]   ;;  %v1358_v57 = vld [vmem:[%s1788_s3 + $0x1cc] ss:$16 sps:$4 sm:$0xff]   ;;  %v1360_v58 = vld [vmem:[%s1788_s3 + $0x1c0] ss:$16 sps:$4 sm:$0xff]  }
  0x1b   : > { %890 = vmatpush1.bf16.msra.mxu1 %v1325_v21  ;;  %848 = vmatprep.subr.bf16.mxu0 %v1326_v22  ;;  %v1361_v59 = vld [vmem:[%s1788_s3 + $0x1c8] ss:$16 sps:$4 sm:$0xff]   ;;  %v1362_v60 = vld [vmem:[%s1788_s3 + $0x1a4] ss:$16 sps:$4 sm:$0xff]   ;;  %v1364_v61 = vld [vmem:[%s1788_s3 + $0x1ac] ss:$16 sps:$4 sm:$0xff]  }
  0x1c   : > { %891 = vmatprep.subr.bf16.mxu1 %v1328_v23  ;;  %v1366_v62 = vld [vmem:[%s1788_s3 + $0x1a0] ss:$16 sps:$4 sm:$0xff]   ;;  %v1367_v63 = vld [vmem:[%s1788_s3 + $0x1a8] ss:$16 sps:$4 sm:$0xff]   ;;  %v1376_v5 = vld [vmem:[%s1788_s3 + $0x16c] ss:$16 sps:$4 sm:$0xff]  }
  0x1d   : > { %v1373_v3 = vld [vmem:[%s1788_s3 + $0x188] ss:$16 sps:$4 sm:$0xff]   ;;  %v1378_v6 = vld [vmem:[%s1788_s3 + $0x160] ss:$16 sps:$4 sm:$0xff]   ;;  %v1380_v8 = vld [vmem:[%s1788_s3 + $0x144] ss:$16 sps:$4 sm:$0xff]  }
  0x1e   : > { %849 = vmatpush1.bf16.msra.mxu0 %v1330_v24  ;;  %v1379_v7 = vld [vmem:[%s1788_s3 + $0x168] ss:$16 sps:$4 sm:$0xff]   ;;  %v1382_v9 = vld [vmem:[%s1788_s3 + $0x14c] ss:$16 sps:$4 sm:$0xff]   ;;  %v1384_v10 = vld [vmem:[%s1788_s3 + $0x140] ss:$16 sps:$4 sm:$0xff]  }
  0x1f   : > { %892 = vmatpush1.bf16.msra.mxu1 %v1331_v25  ;;  %850 = vmatprep.subr.bf16.mxu0 %v1332_v26  ;;  %v1385_v11 = vld [vmem:[%s1788_s3 + $0x148] ss:$16 sps:$4 sm:$0xff]   ;;  %v1386_v12 = vld [vmem:[%s1788_s3 + $0x124] ss:$16 sps:$4 sm:$0xff]   ;;  %v1388_v13 = vld [vmem:[%s1788_s3 + $0x12c] ss:$16 sps:$4 sm:$0xff]   ;;  %v402_v26 = vlaneseq }
  0x20   : > { %893 = vmatprep.subr.bf16.mxu1 %v1334_v27  ;;  %v1390_v14 = vld [vmem:[%s1788_s3 + $0x120] ss:$16 sps:$4 sm:$0xff]   ;;  %v1391_v15 = vld [vmem:[%s1788_s3 + $0x128] ss:$16 sps:$4 sm:$0xff]   ;;  %v1392_v16 = vld [vmem:[%s1788_s3 + $0x104] ss:$16 sps:$4 sm:$0xff]  }
  0x21   : > { %v1394_v17 = vld [vmem:[%s1788_s3 + $0x10c] ss:$16 sps:$4 sm:$0xff]   ;;  %v1396_v18 = vld [vmem:[%s1788_s3 + $0x100] ss:$16 sps:$4 sm:$0xff]   ;;  %v1397_v19 = vld [vmem:[%s1788_s3 + $0x108] ss:$16 sps:$4 sm:$0xff]  }
  0x22   : > { %851 = vmatpush1.bf16.msra.mxu0 %v1336_v28  ;;  %v403_v27 = vshrl.u32 %v402_v26, 7  ;;  %v399_v28 = vld [vmem:[%s334_s12] sm:$0x3] }
  0x23   : > { %894 = vmatpush1.bf16.msra.mxu1 %v1337_v29  ;;  %852 = vmatprep.subr.bf16.mxu0 %v1338_v30  ;;  %v400_v29 = vadd.f32 1.0, %v399_v28 }
  0x24   : > { %895 = vmatprep.subr.bf16.mxu1 %v1340_v31  ;;  %v404_v30 = vsub.s32 0, %v403_v27  ;;  %v408_v31 = vsub.s32 1, %v403_v27 }
  0x26   : > { %853 = vmatpush1.bf16.msra.mxu0 %v1342_v32 }
  0x27   : > { %896 = vmatpush1.bf16.msra.mxu1 %v1343_v33  ;;  %854 = vmatprep.subr.bf16.mxu0 %v1344_v34  ;;  %v409_v34 = vrot.slane %v400_v29, %v408_v31 }
  0x28   : > { %897 = vmatprep.subr.bf16.mxu1 %v1346_v35  ;;  %v416_v35 = vld [vmem:[%s330_s15] sm:$0x3] }
  0x2a   : > { %855 = vmatpush1.bf16.msra.mxu0 %v1348_v36 }
  0x2b   : > { %898 = vmatpush1.bf16.msra.mxu1 %v1349_v37  ;;  %856 = vmatprep.subr.bf16.mxu0 %v1350_v38  ;;  %v405_v37 = vrot.slane %v400_v29, %v404_v30 }
  0x2c   : > { %899 = vmatprep.subr.bf16.mxu1 %v1352_v39  ;;  %v421_v39 = vrot.slane %v416_v35, %v404_v30 }
  0x2e   : > { %857 = vmatpush2.bf16.msra.mxu0 %v1354_v54 }
  0x2f   : > { %900 = vmatpush2.bf16.msra.mxu1 %v1355_v55  ;;  %858 = vmatprep.subr.bf16.mxu0 %v1356_v56  ;;  %v514_v56 = vsub.s32 3, %v403_v27 }
  0x30   : > { %901 = vmatprep.subr.bf16.mxu1 %v1358_v57 }
  0x32   : > { %859 = vmatpush2.bf16.msra.mxu0 %v1360_v58 }
  0x33   : > { %902 = vmatpush2.bf16.msra.mxu1 %v1361_v59  ;;  %860 = vmatprep.subr.bf16.mxu0 %v1362_v60 }
  0x34   : > { %903 = vmatprep.subr.bf16.mxu1 %v1364_v61 }
  0x36   : > { %861 = vmatpush2.bf16.msra.mxu0 %v1366_v62 }
  0x37   : > { %904 = vmatpush2.bf16.msra.mxu1 %v1367_v63 }
  0x9b   : > { %v368_v40 = vpop.xlane.xlu0 %367 }
  0x9c   : > { %v373_v41 = vmul.f32 0.00390625, %v368_v40  ;;  %v425_v40 = vrot.slane %v416_v35, %v408_v31 }
  0x9e   : > { %v1613_v42 = vsub.f32 %v1498_v0, %v373_v41  ;;  %v1616_v43 = vsub.f32 %v1500_v1, %v373_v41  ;;  %v1368_v0 = vld [vmem:[%s1788_s3 + $0x184] ss:$16 sps:$4 sm:$0xff]   ;;  %v1370_v1 = vld [vmem:[%s1788_s3 + $0x18c] ss:$16 sps:$4 sm:$0xff]  }
  0x9f   : > { %v371_v44 = vpop.xlane.xlu0 %370  ;;  %862 = vmatprep.subr.bf16.mxu0 %v1368_v0  ;;  %905 = vmatprep.subr.bf16.mxu1 %v1370_v1 }
  0xa0   : > { %v374_v45 = vmul.f32 0.00390625, %v371_v44  ;;  %v379_v46 = vmul.f32 %v1613_v42, %v1613_v42  ;;  %v380_v47 = vmul.f32 %v1616_v43, %v1616_v43  ;;  %906 = vmatpush2.bf16.msra.mxu1 %v1373_v3 }
  0xa1   : > { %907 = vmatprep.subr.bf16.mxu1 %v1376_v5 }
  0xa2   : > { %v1623_v48 = vsub.f32 %v1502_v2, %v374_v45  ;;  %v1626_v49 = vsub.f32 %v1506_v4, %v374_v45  ;;  %v383_v50 = vadd.f32 %v380_v47, %v379_v46  ;;  %v1372_v2 = vld [vmem:[%s1788_s3 + $0x180] ss:$16 sps:$4 sm:$0xff]   ;;  %v1374_v4 = vld [vmem:[%s1788_s3 + $0x164] ss:$16 sps:$4 sm:$0xff]  }
  0xa3   : > { %863 = vmatpush2.bf16.msra.mxu0 %v1372_v2 }
  0xa4   : > { %384 = vadd.xlane.f32.xlu1 %v383_v50  ;;  %v381_v51 = vmul.f32 %v1623_v48, %v1623_v48  ;;  %v382_v52 = vmul.f32 %v1626_v49, %v1626_v49  ;;  %864 = vmatprep.subr.bf16.mxu0 %v1374_v4 }
  0xa5   : > { %908 = vmatpush2.bf16.msra.mxu1 %v1379_v7 }
  0xa6   : > { %v386_v53 = vadd.f32 %v382_v52, %v381_v51  ;;  %909 = vmatprep.subr.bf16.mxu1 %v1382_v9 }
  0xa7   : > { %865 = vmatpush2.bf16.msra.mxu0 %v1378_v6 }
  0xa8   : > { %387 = vadd.xlane.f32.xlu1 %v386_v53  ;;  %866 = vmatprep.subr.bf16.mxu0 %v1380_v8 }
  0xa9   : > { %910 = vmatpush2.bf16.msra.mxu1 %v1385_v11 }
  0xaa   : > { %911 = vmatprep.subr.bf16.mxu1 %v1388_v13 }
  0xab   : > { %867 = vmatpush2.bf16.msra.mxu0 %v1384_v10 }
  0xac   : > { %868 = vmatprep.subr.bf16.mxu0 %v1386_v12 }
  0xad   : > { %912 = vmatpush2.bf16.msra.mxu1 %v1391_v15 }
  0xae   : > { %913 = vmatprep.subr.bf16.mxu1 %v1394_v17 }
  0xaf   : > { %869 = vmatpush2.bf16.msra.mxu0 %v1390_v14 }
  0xb0   : > { %870 = vmatprep.subr.bf16.mxu0 %v1392_v16 }
  0xb1   : > { %914 = vmatpush2.bf16.msra.mxu1 %v1397_v19 }
  0xb3   : > { %871 = vmatpush2.bf16.msra.mxu0 %v1396_v18 }
 0x12d   : > { %v385_v20 = vpop.xlane.xlu1 %384 }
 0x12e   : > { %v389_v21 = vmul.f32 0.00390625, %v385_v20 }
 0x130   : > { %v391_v22 = vadd.f32 1e-06, %v389_v21 }
 0x131   : > { %v388_v23 = vpop.xlane.xlu1 %387 }
 0x132   : > { %1398 = vrsqrt.f32 %v391_v22  ;;  %v390_v24 = vmul.f32 0.00390625, %v388_v23 }
 0x134   : > { %v392_v25 = vadd.f32 1e-06, %v390_v24 }
 0x136   : > { %1400 = vrsqrt.f32 %v392_v25 }
 0x13f   : > { %v1399_v32 = vpop.eup %1398 }
 0x140   : > { %v396_v33 = vmul.f32 %v1399_v32, %v1616_v43  ;;  %v395_v36 = vmul.f32 %v1399_v32, %v1613_v42  ;;  %v510_v42 = vsub.s32 2, %v403_v27 }
 0x142   : > { %v413_v44 = vmul.f32 %v409_v34, %v396_v33  ;;  %v412_v46 = vmul.f32 %v405_v37, %v395_v36 }
 0x143   : > { %v1401_v38 = vpop.eup %1400 }
 0x144   : > { %v398_v41 = vmul.f32 %v1401_v38, %v1626_v49  ;;  %v397_v45 = vmul.f32 %v1401_v38, %v1623_v48  ;;  %v429_v51 = vadd.f32 %v425_v40, %v413_v44  ;;  %v428_v53 = vadd.f32 %v421_v39, %v412_v46  ;;  %v498_v49 = vld [vmem:[%s1789_s4] sm:$0xf] }
 0x145   : > { %v503_v48 = vrot.slane %v498_v49, %v404_v30  ;;  %v511_v57 = vrot.slane %v498_v49, %v510_v42  ;;  %v507_v60 = vrot.slane %v498_v49, %v408_v31  ;;  %v515_v61 = vrot.slane %v498_v49, %v514_v56 }
 0x146   : > { %v415_v47 = vmul.f32 %v409_v34, %v398_v41  ;;  %v414_v50 = vmul.f32 %v405_v37, %v397_v45 }
 0x148   : > { %v431_v52 = vadd.f32 %v425_v40, %v415_v47  ;;  %v430_v43 = vadd.f32 %v421_v39, %v414_v50 }
 0x14a   : > { %v433_v54 = vpack.c.bf16 %v431_v52, %v429_v51  ;;  %v432_v55 = vpack.c.bf16 %v430_v43, %v428_v53 }
 0x14c   : > { %872 = vmatprep.mubr.bf16.mxu0 %v433_v54  ;;  %915 = vmatprep.mubr.bf16.mxu1 %v433_v54 }
 0x14d   : > { %873 = vmatmul.mubr.bf16.vlgmr.msra.gmra.mxu0 %v432_v55  ;;  %916 = vmatmul.mubr.bf16.vlgmr.msra.gmra.mxu1 %v432_v55 }
 0x20d   : > { %v874_v58 = vpop.f32.mrf.mxu0  ;;  %v917_v59 = vpop.f32.mrf.mxu1 }
 0x20e   : > { %v1736_v62 = vadd.f32 %v874_v58, %v503_v48  ;;  %v1738_v63 = vadd.f32 %v917_v59, %v511_v57 }
 0x20f   : > { %v876_v0 = vpop.f32.mrf.mxu0  ;;  %v919_v1 = vpop.f32.mrf.mxu1 }
 0x210   : > { %v934_v2 = vmul.f32 0.044715, %v1736_v62  ;;  %v936_v3 = vmul.f32 0.044715, %v1738_v63  ;;  %v877_v4 = vadd.f32 %v876_v0, %v507_v60  ;;  %v1742_v5 = vadd.f32 %v919_v1, %v515_v61 }
 0x211   : > { %v878_v6 = vpop.f32.mrf.mxu0  ;;  %v921_v7 = vpop.f32.mrf.mxu1  ;;  %v926_v58 = vmul.f32 0.5, %v1736_v62 }
 0x212   : > { %v942_v8 = vmul.f32 %v934_v2, %v1736_v62  ;;  %v944_v9 = vmul.f32 %v936_v3, %v1738_v63  ;;  %v1746_v10 = vadd.f32 %v878_v6, %v503_v48  ;;  %v1748_v11 = vadd.f32 %v921_v7, %v511_v57 }
 0x213   : > { %v935_v12 = vmul.f32 0.044715, %v877_v4  ;;  %v937_v13 = vmul.f32 0.044715, %v1742_v5  ;;  %v880_v14 = vpop.f32.mrf.mxu0  ;;  %v923_v18 = vpop.f32.mrf.mxu1  ;;  %v927_v59 = vmul.f32 0.5, %v877_v4  ;;  %v929_v0 = vmul.f32 0.5, %v1742_v5 }
 0x214   : > { %v950_v15 = vmul.f32 %v942_v8, %v1736_v62  ;;  %v952_v16 = vmul.f32 %v944_v9, %v1738_v63  ;;  %v938_v17 = vmul.f32 0.044715, %v1746_v10  ;;  %v940_v21 = vmul.f32 0.044715, %v1748_v11 }
 0x215   : > { %v943_v19 = vmul.f32 %v935_v12, %v877_v4  ;;  %v945_v20 = vmul.f32 %v937_v13, %v1742_v5  ;;  %v881_v25 = vadd.f32 %v880_v14, %v507_v60  ;;  %v924_v29 = vadd.f32 %v923_v18, %v515_v61 }
 0x216   : > { %v958_v22 = vadd.f32 %v950_v15, %v1736_v62  ;;  %v960_v23 = vadd.f32 %v952_v16, %v1738_v63  ;;  %v946_v24 = vmul.f32 %v938_v17, %v1746_v10  ;;  %v948_v28 = vmul.f32 %v940_v21, %v1748_v11 }
 0x217   : > { %v951_v26 = vmul.f32 %v943_v19, %v877_v4  ;;  %v953_v27 = vmul.f32 %v945_v20, %v1742_v5  ;;  %v939_v36 = vmul.f32 0.044715, %v881_v25  ;;  %v941_v38 = vmul.f32 0.044715, %v924_v29 }
 0x218   : > { %v966_v30 = vmul.f32 0.7978846, %v958_v22  ;;  %v968_v31 = vmul.f32 0.7978846, %v960_v23  ;;  %v954_v32 = vmul.f32 %v946_v24, %v1746_v10  ;;  %v956_v35 = vmul.f32 %v948_v28, %v1748_v11 }
 0x219   : > { %v959_v33 = vadd.f32 %v951_v26, %v877_v4  ;;  %v961_v34 = vadd.f32 %v953_v27, %v1742_v5  ;;  %v947_v45 = vmul.f32 %v939_v36, %v881_v25  ;;  %v949_v46 = vmul.f32 %v941_v38, %v924_v29 }
 0x21a   : > { %1402 = vtanh.f32 %v966_v30  ;;  %v962_v37 = vadd.f32 %v954_v32, %v1746_v10  ;;  %v964_v41 = vadd.f32 %v956_v35, %v1748_v11  ;;  %v928_v61 = vmul.f32 0.5, %v1738_v63 }
 0x21b   : > { %1404 = vtanh.f32 %v968_v31  ;;  %v967_v39 = vmul.f32 0.7978846, %v959_v33  ;;  %v969_v40 = vmul.f32 0.7978846, %v961_v34  ;;  %v955_v50 = vmul.f32 %v947_v45, %v881_v25 }
 0x21c   : > { %v970_v44 = vmul.f32 0.7978846, %v962_v37  ;;  %v972_v47 = vmul.f32 0.7978846, %v964_v41  ;;  %v957_v51 = vmul.f32 %v949_v46, %v924_v29  ;;  %v930_v5 = vmul.f32 0.5, %v1746_v10 }
 0x21d   : > { %1406 = vtanh.f32 %v967_v39  ;;  %v963_v52 = vadd.f32 %v955_v50, %v881_v25  ;;  %v931_v15 = vmul.f32 0.5, %v881_v25  ;;  %v932_v17 = vmul.f32 0.5, %v1748_v11 }
 0x21e   : > { %1408 = vtanh.f32 %v969_v40  ;;  %v965_v53 = vadd.f32 %v957_v51, %v924_v29  ;;  %v933_v18 = vmul.f32 0.5, %v924_v29 }
 0x21f   : > { %1410 = vtanh.f32 %v970_v44  ;;  %v971_v43 = vmul.f32 0.7978846, %v963_v52 }
 0x220   : > { %1412 = vtanh.f32 %v972_v47  ;;  %v973_v54 = vmul.f32 0.7978846, %v965_v53 }
 0x221   : > { %1414 = vtanh.f32 %v971_v43 }
 0x222   : > { %1416 = vtanh.f32 %v973_v54 }
 0x227   : > { %v1403_v55 = vpop.eup %1402 }
 0x228   : > { %v1405_v42 = vpop.eup %1404  ;;  %v982_v49 = vadd.f32 1.0, %v1403_v55 }
 0x229   : > { %v984_v48 = vadd.f32 1.0, %v1405_v42 }
 0x22a   : > { %v1407_v56 = vpop.eup %1406  ;;  %v990_v3 = vmul.f32 %v982_v49, %v926_v58 }
 0x22b   : > { %v1409_v57 = vpop.eup %1408  ;;  %v983_v60 = vadd.f32 1.0, %v1407_v56  ;;  %v992_v8 = vmul.f32 %v984_v48, %v928_v61 }
 0x22c   : > { %v985_v1 = vadd.f32 1.0, %v1409_v57  ;;  %v1411_v2 = vpop.eup %1410 }
 0x22d   : > { %v991_v6 = vmul.f32 %v983_v60, %v927_v59  ;;  %v1413_v7 = vpop.eup %1412  ;;  %v986_v4 = vadd.f32 1.0, %v1411_v2 }
 0x22e   : > { %v993_v9 = vmul.f32 %v985_v1, %v929_v0  ;;  %v1415_v13 = vpop.eup %1414  ;;  %v988_v63 = vadd.f32 1.0, %v1413_v7 }
 0x22f   : > { %v1274_v12 = vpack.c.bf16 %v991_v6, %v990_v3  ;;  %v1417_v14 = vpop.eup %1416  ;;  %v987_v16 = vadd.f32 1.0, %v1415_v13  ;;  %v994_v20 = vmul.f32 %v986_v4, %v930_v5 }
 0x230   : > { %v1275_v62 = vpack.c.bf16 %v993_v9, %v992_v8  ;;  %v989_v19 = vadd.f32 1.0, %v1417_v14  ;;  %v996_v22 = vmul.f32 %v988_v63, %v932_v17 }
 0x231   : > { %1022 = vst [vmem:[%s359_s25] sm:$0xff] %v1274_v12  ;;  %v995_v21 = vmul.f32 %v987_v16, %v931_v15 }
 0x232   : > { %1023 = vst [vmem:[%s359_s25 + $0x8] sm:$0xff] %v1275_v62  ;;  %v997_v23 = vmul.f32 %v989_v19, %v933_v18 }
 0x233   : > { %v1276_v24 = vpack.c.bf16 %v995_v21, %v994_v20 }
 0x234   : > { %v1277_v26 = vpack.c.bf16 %v997_v23, %v996_v22 }
 0x235   : > { %1024 = vst [vmem:[%s359_s25 + $0x10] sm:$0xff] %v1276_v24 }
 0x236   : > { %1025 = vst [vmem:[%s359_s25 + $0x18] sm:$0xff] %v1277_v26 }
 0x237 PF: > { %s15_s20 = sadd.s32 1, %s1440_s20   ;;  %s1791_s18 = smov %s1436_s19 }
 0x238   : > { %p12_p5 = scmp.ge.s32.totalorder %s15_s20, 4   ;;  %s1792_s19 = smov %s1794_s21 }
 0x23a   :  { %14 = sbr.rel (!%p12_p5) target bundleno = 2 (0x2), region = 82 }

// kernel: wan_attention_block.25
= control target key start
LH: loop header
LB: loop body
LE: loop exit
PB: predicated region body
PF: predicated region fallthrough
CT: control target
= control target key end

     0   :  { %10 = vsyncpa [#allocation3], 0  ;;  %s1889_s0 = inlined_call_operand.vmem [shape: bf16[2,16,512], index: 0, kind: input, shape index: {}]   ;;  %s1890_s1 = inlined_call_operand.vmem [shape: bf16[512,256], index: 1, kind: input, shape index: {}]   ;;  %s1891_s2 = inlined_call_operand.vmem [shape: f32[1,256], index: 2, kind: input, shape index: {}]   ;;  %s1892_s3 = inlined_call_operand.vmem [shape: f32[2,16,256], index: 3, kind: input, shape index: {}]   ;;  %s1893_s4 = inlined_call_operand.vmem [shape: f32[2,1,256], index: 4, kind: input, shape index: {}]   ;;  %s1894_s5 = inlined_call_operand.hbm [shape: f32[2,16,256], index: 5, kind: output, shape index: {}]  }
   0x1   :  { %12 = vsyncpa [#allocation3 + $0x1], 0  ;;  %s1550_s18 = smov 0   ;;  %s1552_s19 = smov 0  }
   0x2   :  { %s1554_s20 = smov 0   ;;  %s1556_s21 = smov 0  }
   0x3   :  { %s1558_s22 = smov 0   ;;  %s1560_s23 = smov 0  }
   0x4 LB: > { %s1191_s24 = sadd.s32 4294967295, %s1515_s23   ;;  %s1192_s25 = sadd.s32 4294967294, %s1515_s23   ;;  %s1515_s23 = sphi %s1560_s23, %s18_s23   ;;  %s1511_s22 = sphi %s1558_s22, %s1901_s22   ;;  %s1507_s21 = sphi %s1556_s21, %s1900_s21   ;;  %s1503_s20 = sphi %s1554_s20, %s1899_s20   ;;  %s1499_s19 = sphi %s1552_s19, %s1898_s19   ;;  %s1495_s18 = sphi %s1550_s18, %s1897_s18  }
   0x5   : > { %s44_s26 = sadd.s32 1, %s1511_s22  ;;  %s197_s27 = sadd.s32 1, %s1503_s20 }
   0x6   : > { %p46_p0 = scmp.ge.s32.totalorder %s44_s26, 2  ;;  %p207_p1 = scmp.ne.s32.totalorder %s1503_s20, %s1499_s19 }
   0x7   : > { %p208_p2 = scmp.eq.s32.totalorder %s1191_s24, 1  ;;  %p213_p3 = scmp.ne.s32.totalorder %s1499_s19, %s1495_s18 }
   0x8   : > { %s1903_s26 = smov (%p46_p0, %s44_s26), 0  ;;  %p214_p5 = scmp.eq.s32.totalorder %s1192_s25, 1 }
   0x9   : > { %p1590_p4 = por %p208_p2, %p207_p1  ;;  %s190_s29 = ssub.s32 %s1511_s22, %s1903_s26 }
   0xa   : > { %p1197_p6 = scmp.ge.s32.totalorder %s1515_s23, 1  ;;  %p195_p7 = scmp.eq.s32.totalorder %s190_s29, 0 }
   0xb   : > { %p1597_p8 = por %p214_p5, %p213_p3  ;;  %p305_p9 = scmp.lt.s32.totalorder %s1515_s23, 3 }
   0xc   : > { %s1603_s6 = scalar_select %p195_p7, %s1503_s20, %s197_s27  }
   0xd   : > { %p306_p10 = pnand %p1197_p6, %p305_p9 }
   0xe   : > { %p380_p11 = scmp.lt.s32.totalorder (!%p306_p10), %s1507_s21, 1 }
   0xf   : > { %309 = sbr.rel (%p306_p10) target bundleno = 307 (0x133), region = 40 }
  0x14   : > { %v1337_v0 = vld [vmem:[%s1890_s1 + $0x74] ss:$8 sps:$4 sm:$0xff]   ;;  %v1341_v2 = vld [vmem:[%s1890_s1 + $0x70] ss:$8 sps:$4 sm:$0xff]   ;;  %v1343_v4 = vld [vmem:[%s1890_s1 + $0x64] ss:$8 sps:$4 sm:$0xff]  }
  0x15   : > { %v1339_v1 = vld [vmem:[%s1890_s1 + $0x174] ss:$8 sps:$4 sm:$0xff]   ;;  %846 = vmatprep.subr.bf16.mxu0 %v1337_v0  ;;  %v1342_v3 = vld [vmem:[%s1890_s1 + $0x170] ss:$8 sps:$4 sm:$0xff]   ;;  %v1345_v5 = vld [vmem:[%s1890_s1 + $0x164] ss:$8 sps:$4 sm:$0xff]  }
  0x16   : > { %889 = vmatprep.subr.bf16.mxu1 %v1339_v1  ;;  %847 = vmatpush1.bf16.msra.mxu0 %v1341_v2  ;;  %v1347_v6 = vld [vmem:[%s1890_s1 + $0x60] ss:$8 sps:$4 sm:$0xff]   ;;  %v1349_v8 = vld [vmem:[%s1890_s1 + $0x54] ss:$8 sps:$4 sm:$0xff]   ;;  %v1353_v10 = vld [vmem:[%s1890_s1 + $0x50] ss:$8 sps:$4 sm:$0xff]  }
  0x17   : > { %890 = vmatpush1.bf16.msra.mxu1 %v1342_v3  ;;  %848 = vmatprep.subr.bf16.mxu0 %v1343_v4  ;;  %v1348_v7 = vld [vmem:[%s1890_s1 + $0x160] ss:$8 sps:$4 sm:$0xff]   ;;  %v1351_v9 = vld [vmem:[%s1890_s1 + $0x154] ss:$8 sps:$4 sm:$0xff]   ;;  %v1354_v11 = vld [vmem:[%s1890_s1 + $0x150] ss:$8 sps:$4 sm:$0xff]   ;;  %v965_v4 = vlaneseq }
  0x18   : > { %891 = vmatprep.subr.bf16.mxu1 %v1345_v5  ;;  %v1355_v12 = vld [vmem:[%s1890_s1 + $0x44] ss:$8 sps:$4 sm:$0xff]   ;;  %v1359_v14 = vld [vmem:[%s1890_s1 + $0x40] ss:$8 sps:$4 sm:$0xff]   ;;  %v1361_v16 = vld [vmem:[%s1890_s1 + $0x34] ss:$8 sps:$4 sm:$0xff]  }
  0x19   : > { %v1357_v13 = vld [vmem:[%s1890_s1 + $0x144] ss:$8 sps:$4 sm:$0xff]   ;;  %v1360_v15 = vld [vmem:[%s1890_s1 + $0x140] ss:$8 sps:$4 sm:$0xff]   ;;  %v1363_v17 = vld [vmem:[%s1890_s1 + $0x134] ss:$8 sps:$4 sm:$0xff]  }
  0x1a   : > { %849 = vmatpush1.bf16.msra.mxu0 %v1347_v6  ;;  %v1365_v18 = vld [vmem:[%s1890_s1 + $0x30] ss:$8 sps:$4 sm:$0xff]   ;;  %v1367_v20 = vld [vmem:[%s1890_s1 + $0x24] ss:$8 sps:$4 sm:$0xff]   ;;  %v1371_v22 = vld [vmem:[%s1890_s1 + $0x20] ss:$8 sps:$4 sm:$0xff]  }
  0x1b   : > { %892 = vmatpush1.bf16.msra.mxu1 %v1348_v7  ;;  %850 = vmatprep.subr.bf16.mxu0 %v1349_v8  ;;  %v1366_v19 = vld [vmem:[%s1890_s1 + $0x130] ss:$8 sps:$4 sm:$0xff]   ;;  %v1369_v21 = vld [vmem:[%s1890_s1 + $0x124] ss:$8 sps:$4 sm:$0xff]   ;;  %v1372_v23 = vld [vmem:[%s1890_s1 + $0x120] ss:$8 sps:$4 sm:$0xff]  }
  0x1c   : > { %893 = vmatprep.subr.bf16.mxu1 %v1351_v9  ;;  %v1373_v24 = vld [vmem:[%s1890_s1 + $0x14] ss:$8 sps:$4 sm:$0xff]   ;;  %v1377_v26 = vld [vmem:[%s1890_s1 + $0x10] ss:$8 sps:$4 sm:$0xff]   ;;  %v1379_v28 = vld [vmem:[%s1890_s1 + $0x4] ss:$8 sps:$4 sm:$0xff]  }
  0x1d   : > { %v1375_v25 = vld [vmem:[%s1890_s1 + $0x114] ss:$8 sps:$4 sm:$0xff]   ;;  %v1378_v27 = vld [vmem:[%s1890_s1 + $0x110] ss:$8 sps:$4 sm:$0xff]   ;;  %v1381_v29 = vld [vmem:[%s1890_s1 + $0x104] ss:$8 sps:$4 sm:$0xff]  }
  0x1e   : > { %851 = vmatpush1.bf16.msra.mxu0 %v1353_v10  ;;  %v1383_v30 = vld [vmem:[%s1890_s1] ss:$8 sps:$4 sm:$0xff]   ;;  %v1385_v32 = vld [vmem:[%s1890_s1 + $0xf4] ss:$8 sps:$4 sm:$0xff]   ;;  %v1389_v34 = vld [vmem:[%s1890_s1 + $0xf0] ss:$8 sps:$4 sm:$0xff]  }
  0x1f   : > { %894 = vmatpush1.bf16.msra.mxu1 %v1354_v11  ;;  %852 = vmatprep.subr.bf16.mxu0 %v1355_v12  ;;  %v1384_v31 = vld [vmem:[%s1890_s1 + $0x100] ss:$8 sps:$4 sm:$0xff]   ;;  %v1387_v33 = vld [vmem:[%s1890_s1 + $0x1f4] ss:$8 sps:$4 sm:$0xff]   ;;  %v1390_v35 = vld [vmem:[%s1890_s1 + $0x1f0] ss:$8 sps:$4 sm:$0xff]  }
  0x20   : > { %895 = vmatprep.subr.bf16.mxu1 %v1357_v13  ;;  %v1391_v36 = vld [vmem:[%s1890_s1 + $0xe4] ss:$8 sps:$4 sm:$0xff]   ;;  %s1721_s8 = scalar_select %p380_p11, %s1507_s21, 1  ;;  %v1395_v38 = vld [vmem:[%s1890_s1 + $0xe0] ss:$8 sps:$4 sm:$0xff]   ;;  %v966_v5 = vshrl.u32 %v965_v4, 7 }
  0x21   : > { %v1393_v37 = vld [vmem:[%s1890_s1 + $0x1e4] ss:$8 sps:$4 sm:$0xff]   ;;  %v1396_v39 = vld [vmem:[%s1890_s1 + $0x1e0] ss:$8 sps:$4 sm:$0xff]   ;;  %v1397_v40 = vld [vmem:[%s1890_s1 + $0xd4] ss:$8 sps:$4 sm:$0xff]  }
  0x22   : > { %853 = vmatpush1.bf16.msra.mxu0 %v1359_v14  ;;  %v1399_v41 = vld [vmem:[%s1890_s1 + $0x1d4] ss:$8 sps:$4 sm:$0xff]   ;;  %s1277_s17 = sshll.u32 %s1721_s8, 5  ;;  %v1401_v42 = vld [vmem:[%s1890_s1 + $0xd0] ss:$8 sps:$4 sm:$0xff]   ;;  %s1203_s15 = sshll.u32 %s1721_s8, 1 }
  0x23   : > { %896 = vmatpush1.bf16.msra.mxu1 %v1360_v15  ;;  %854 = vmatprep.subr.bf16.mxu0 %v1361_v16  ;;  %v1402_v43 = vld [vmem:[%s1890_s1 + $0x1d0] ss:$8 sps:$4 sm:$0xff]   ;;  %v1403_v44 = vld [vmem:[%s1890_s1 + $0xc4] ss:$8 sps:$4 sm:$0xff]   ;;  %s1750_s12 = scalar_lea.vmem %s1889_s0, %s1277_s17  ;;  %v1407_v47 = vld [vmem:[%s1890_s1 + $0xc0] ss:$8 sps:$4 sm:$0xff]   ;;  %s434_s25 = scalar_lea.vmem %s1893_s4, %s1203_s15 }
  0x24   : > { %897 = vmatprep.subr.bf16.mxu1 %v1363_v17  ;;  %v1405_v45 = vld [vmem:[%s1890_s1 + $0x1c4] ss:$8 sps:$4 sm:$0xff]   ;;  %v1408_v48 = vld [vmem:[%s1890_s1 + $0x1c0] ss:$8 sps:$4 sm:$0xff]   ;;  %v1409_v49 = vld [vmem:[%s1890_s1 + $0xb4] ss:$8 sps:$4 sm:$0xff]   ;;  %s1826_s10 = scalar_lea.vmem %s1892_s3, %s1277_s17 }
  0x25   : > { %v1435_v46 = vld [vmem:[%s1750_s12 + $0x4] ss:$16 sps:$4 sm:$0xff]   ;;  %v1438_v51 = vld [vmem:[%s1750_s12 + $0xc] ss:$16 sps:$4 sm:$0xff]   ;;  %v1413_v52 = vld [vmem:[%s1890_s1 + $0xb0] ss:$8 sps:$4 sm:$0xff]  }
  0x26   : > { %855 = vmatpush1.bf16.msra.mxu0 %v1365_v18  ;;  %v1411_v50 = vld [vmem:[%s1890_s1 + $0x1b4] ss:$8 sps:$4 sm:$0xff]   ;;  %878 = vmatprep.mubr.bf16.mxu0 %v1435_v46  ;;  %v1414_v53 = vld [vmem:[%s1890_s1 + $0x1b0] ss:$8 sps:$4 sm:$0xff]   ;;  %v1415_v54 = vld [vmem:[%s1890_s1 + $0xa4] ss:$8 sps:$4 sm:$0xff]  }
  0x27   : > { %898 = vmatpush1.bf16.msra.mxu1 %v1366_v19  ;;  %856 = vmatprep.subr.bf16.mxu0 %v1367_v20  ;;  %v1417_v55 = vld [vmem:[%s1890_s1 + $0x1a4] ss:$8 sps:$4 sm:$0xff]   ;;  %v1419_v56 = vld [vmem:[%s1890_s1 + $0xa0] ss:$8 sps:$4 sm:$0xff]   ;;  %v1421_v58 = vld [vmem:[%s1890_s1 + $0x94] ss:$8 sps:$4 sm:$0xff]  }
  0x28   : > { %899 = vmatprep.subr.bf16.mxu1 %v1369_v21  ;;  %921 = vmatprep.mubr.bf16.mxu1 %v1438_v51  ;;  %v1420_v57 = vld [vmem:[%s1890_s1 + $0x1a0] ss:$8 sps:$4 sm:$0xff]   ;;  %v1423_v59 = vld [vmem:[%s1890_s1 + $0x194] ss:$8 sps:$4 sm:$0xff]   ;;  %v1425_v60 = vld [vmem:[%s1890_s1 + $0x90] ss:$8 sps:$4 sm:$0xff]  }
  0x29   : > { %v1426_v61 = vld [vmem:[%s1890_s1 + $0x190] ss:$8 sps:$4 sm:$0xff]   ;;  %v1427_v62 = vld [vmem:[%s1890_s1 + $0x84] ss:$8 sps:$4 sm:$0xff]   ;;  %v1431_v0 = vld [vmem:[%s1890_s1 + $0x80] ss:$8 sps:$4 sm:$0xff]  }
  0x2a   : > { %857 = vmatpush1.bf16.msra.mxu0 %v1371_v22  ;;  %v1429_v63 = vld [vmem:[%s1890_s1 + $0x184] ss:$8 sps:$4 sm:$0xff]   ;;  %v1432_v1 = vld [vmem:[%s1890_s1 + $0x180] ss:$8 sps:$4 sm:$0xff]   ;;  %v967_v6 = vsub.s32 0, %v966_v5  ;;  %v971_v8 = vsub.s32 1, %v966_v5 }
  0x2b   : > { %900 = vmatpush1.bf16.msra.mxu1 %v1372_v23  ;;  %858 = vmatprep.subr.bf16.mxu0 %v1373_v24  ;;  %v1433_v2 = vld [vmem:[%s1750_s12] ss:$16 sps:$4 sm:$0xff]   ;;  %v1436_v3 = vld [vmem:[%s1750_s12 + $0x8] ss:$16 sps:$4 sm:$0xff]   ;;  %s375_s12 = sand.u32 1, %s1499_s19   ;;  %s1279_s17 = sshll.u32 %s1507_s21, 9 }
  0x2c   : > { %901 = vmatprep.subr.bf16.mxu1 %v1375_v25  ;;  %v963_v7 = vld [vmem:[%s1891_s2] sm:$0x3]  ;;  %s1198_s11 = sshll.u32 %s375_s12, 5  ;;  %s1838_s16 = scalar_lea.hbm %s1894_s5, %s1279_s17 }
  0x2d   : > { %v979_v9 = vld [vmem:[%s434_s25] sm:$0x3]  ;;  %v968_v10 = vrot.slane %v963_v7, %v967_v6  ;;  %v972_v15 = vrot.slane %v963_v7, %v971_v8  ;;  %s377_s8 = scalar_lea.vmem [#allocation2], %s1198_s11  ;;  %s1844_s21 = scalar_lea.sflag [#allocation3], %s375_s12 }
  0x2e   : > { %859 = vmatpush1.bf16.msra.mxu0 %v1377_v26  ;;  %v984_v13 = vrot.slane %v979_v9, %v967_v6  ;;  %v988_v18 = vrot.slane %v979_v9, %v971_v8  ;;  %v995_v21 = vld [vmem:[%s1826_s10] sm:$0xff]  ;;  %s1026_s13 = sshll.u32 %s377_s8, 4  ;;  %s1517_s25 = smov [#allocation2]   ;;  %s1840_s13 = int_to_ptr.vmem [resolvable:$true] %s1026_s13 }
  0x2f   : > { %902 = vmatpush1.bf16.msra.mxu1 %v1378_v27  ;;  %860 = vmatprep.subr.bf16.mxu0 %v1379_v28  ;;  %v996_v27 = vld [vmem:[%s1826_s10 + $0x8] sm:$0xff]  ;;  %s1439_s24 = scalar_lea.vmem %s1840_s13, 512  ;;  %s1443_s27 = sshll.u32 %s1517_s25, 4  ;;  %s1444_s27 = int_to_ptr.vmem [resolvable:$false] %s1443_s27 }
  0x30   : > { %903 = vmatprep.subr.bf16.mxu1 %v1381_v29  ;;  %p1440_p12 = scmp.ne.s32.totalorder %s1840_s13, %s1439_s24  ;;  %s1445_s29 = scalar_lea.vmem %s1444_s27, 1024 }
  0x31   : > { %p1446_p1 = scmp.lt.s32.totalorder %s1840_s13, %s1444_s27  ;;  %p1447_p2 = scmp.lt.s32.totalorder %s1445_s29, %s1439_s24 }
  0x32   : > { %861 = vmatpush1.bf16.msra.mxu0 %v1383_v30  ;;  %p1441_p13 = pnand %p1440_p12, %p1590_p4 }
  0x33   : > { %904 = vmatpush1.bf16.msra.mxu1 %v1384_v31  ;;  %862 = vmatprep.subr.bf16.mxu0 %v1385_v32  ;;  %p1448_p3 = por %p1447_p2, %p1446_p1 }
  0x34   : > { %905 = vmatprep.subr.bf16.mxu1 %v1387_v33  ;;  %p1442_p0 = pneg %p1441_p13 }
  0x36   : > { %863 = vmatpush2.bf16.msra.mxu0 %v1389_v34  ;;  %v997_v34 = vld [vmem:[%s1826_s10 + $0x10] sm:$0xff]  ;;  %p1449_p5 = pnand %p1448_p3, %p1442_p0 }
  0x37   : > { %906 = vmatpush2.bf16.msra.mxu1 %v1390_v35  ;;  %864 = vmatprep.subr.bf16.mxu0 %v1391_v36 }
  0x38   : > { %907 = vmatprep.subr.bf16.mxu1 %v1393_v37 }
  0x3a   : > { %865 = vmatpush2.bf16.msra.mxu0 %v1395_v38  ;;  %v998_v38 = vld [vmem:[%s1826_s10 + $0x18] sm:$0xff] }
  0x3b   : > { %908 = vmatpush2.bf16.msra.mxu1 %v1396_v39  ;;  %866 = vmatprep.subr.bf16.mxu0 %v1397_v40 }
  0x3c   : > { %909 = vmatprep.subr.bf16.mxu1 %v1399_v41 }
  0x3e   : > { %867 = vmatpush2.bf16.msra.mxu0 %v1401_v42 }
  0x3f   : > { %910 = vmatpush2.bf16.msra.mxu1 %v1402_v43  ;;  %868 = vmatprep.subr.bf16.mxu0 %v1403_v44 }
  0x40   : > { %911 = vmatprep.subr.bf16.mxu1 %v1405_v45 }
  0x42   : > { %869 = vmatpush2.bf16.msra.mxu0 %v1407_v47 }
  0x43   : > { %912 = vmatpush2.bf16.msra.mxu1 %v1408_v48  ;;  %870 = vmatprep.subr.bf16.mxu0 %v1409_v49 }
  0x44   : > { %913 = vmatprep.subr.bf16.mxu1 %v1411_v50 }
  0x46   : > { %871 = vmatpush2.bf16.msra.mxu0 %v1413_v52 }
  0x47   : > { %914 = vmatpush2.bf16.msra.mxu1 %v1414_v53  ;;  %872 = vmatprep.subr.bf16.mxu0 %v1415_v54 }
  0x48   : > { %915 = vmatprep.subr.bf16.mxu1 %v1417_v55 }
  0x4a   : > { %873 = vmatpush2.bf16.msra.mxu0 %v1419_v56 }
  0x4b   : > { %916 = vmatpush2.bf16.msra.mxu1 %v1420_v57  ;;  %874 = vmatprep.subr.bf16.mxu0 %v1421_v58 }
  0x4c   : > { %917 = vmatprep.subr.bf16.mxu1 %v1423_v59 }
  0x4e   : > { %875 = vmatpush2.bf16.msra.mxu0 %v1425_v60 }
  0x4f   : > { %918 = vmatpush2.bf16.msra.mxu1 %v1426_v61  ;;  %876 = vmatprep.subr.bf16.mxu0 %v1427_v62 }
  0x50   : > { %919 = vmatprep.subr.bf16.mxu1 %v1429_v63 }
  0x52   : > { %877 = vmatpush2.bf16.msra.mxu0 %v1431_v0 }
  0x53   : > { %920 = vmatpush2.bf16.msra.mxu1 %v1432_v1 }
  0x55   : > { %879 = vmatmul.mubr.bf16.vlgmr.msra.gmra.mxu0 %v1433_v2 }
  0x56   : > { %922 = vmatmul.mubr.bf16.vlgmr.msra.gmra.mxu1 %v1436_v3 }
 0x115   : > { %v880_v11 = vpop.f32.mrf.mxu0 }
 0x116   : > { %v923_v12 = vpop.f32.mrf.mxu1 }
 0x117   : > { %v924_v14 = vadd.f32 %v923_v12, %v880_v11  ;;  %v882_v16 = vpop.f32.mrf.mxu0 }
 0x118   : > { %v925_v17 = vpop.f32.mrf.mxu1 }
 0x119   : > { %v975_v19 = vadd.f32 %v968_v10, %v924_v14  ;;  %v926_v20 = vadd.f32 %v925_v17, %v882_v16  ;;  %v884_v22 = vpop.f32.mrf.mxu0 }
 0x11a   : > { %v927_v23 = vpop.f32.mrf.mxu1 }
 0x11b   : > { %v991_v24 = vmul.f32 %v984_v13, %v975_v19  ;;  %v976_v25 = vadd.f32 %v972_v15, %v926_v20  ;;  %v928_v26 = vadd.f32 %v927_v23, %v884_v22  ;;  %v886_v28 = vpop.f32.mrf.mxu0 }
 0x11c   : > { %v929_v29 = vpop.f32.mrf.mxu1 }
 0x11d   : > { %v999_v30 = vadd.f32 %v995_v21, %v991_v24  ;;  %v992_v31 = vmul.f32 %v988_v18, %v976_v25  ;;  %v977_v32 = vadd.f32 %v968_v10, %v928_v26  ;;  %v930_v33 = vadd.f32 %v929_v29, %v886_v28 }
 0x11f   : > { %1003 = vst [vmem:[%s377_s8] sm:$0xff] %v999_v30  ;;  %v1000_v35 = vadd.f32 %v996_v27, %v992_v31  ;;  %v993_v36 = vmul.f32 %v984_v13, %v977_v32  ;;  %v978_v37 = vadd.f32 %v972_v15, %v930_v33 }
 0x121   : > { %1004 = vst [vmem:[%s377_s8 + $0x8] sm:$0xff] %v1000_v35  ;;  %v1001_v39 = vadd.f32 %v997_v34, %v993_v36  ;;  %v994_v40 = vmul.f32 %v988_v18, %v978_v37 }
 0x123   : > { %1005 = vst [vmem:[%s377_s8 + $0x10] sm:$0xff] %v1001_v39  ;;  %v1002_v41 = vadd.f32 %v998_v38, %v994_v40 }
 0x125   : > { %1006 = vst [vmem:[%s377_s8 + $0x18] sm:$0xff] %v1002_v41 }
 0x126   : > { %1452 = shalt.err (!%p1449_p5)
}
 0x127   : > { %s1453_s12 = scalar_lea.hbm %s1838_s16, 512  ;;  %s1457_s10 = scalar_lea.hbm %s1894_s5, 1024 }
 0x128   : > { %p1454_p6 = scmp.ne.s32.totalorder %s1838_s16, %s1453_s12  ;;  %p1458_p10 = scmp.lt.s32.totalorder %s1838_s16, %s1894_s5 }
 0x129   : > { %p1459_p11 = scmp.lt.s32.totalorder %s1457_s10, %s1453_s12 }
 0x12a   : > { %p1455_p7 = pnand %p1454_p6, %p1590_p4 }
 0x12b   : > { %p1460_p12 = por %p1459_p11, %p1458_p10 }
 0x12c   : > { %p1456_p9 = pneg %p1455_p7 }
 0x12e   : > { %p1461_p13 = pnand %p1460_p12, %p1456_p9 }
 0x130   : > { %1464 = shalt.err (!%p1461_p13)
}
 0x131   : > { %s1518_s17 = smov 256   ;;  %s1519_s14 = smov 16  }
 0x132   : > { %1280 = dma.vmem_to_hbm [thread:$0]  (%p1590_p4), %s1840_s13, 512, %s1838_s16, %s1844_s21, %s1518_s17, %s1518_s17, %s1519_s14  }
 0x133 PF: > { %p1286_p0 = scmp.ge.s32.totalorder %s1515_s23, 2  ;;  %s1041_s15 = sand.u32 1, %s1495_s18  }
 0x134   : > { %s1042_s24 = scalar_lea.sflag [#allocation3], %s1041_s15 }
 0x135   : > { %p1283_p1 = pnand %p1286_p0, %p1597_p8 }
 0x137   : > { %p1284_p2 = pneg %p1283_p1 }
 0x139   : > { %1490 = dma.done.wait (%p1284_p2), %s1042_s24, 512  }
 0x13a   : > { %1492 = vsyncadd (%p1284_p2), %s1042_s24, 4294966784  ;;  %s18_s23 = sadd.s32 1, %s1515_s23   ;;  %s1897_s18 = smov %s1499_s19 }
 0x13b   : > { %p15_p3 = scmp.ge.s32.totalorder %s18_s23, 4   ;;  %s1898_s19 = smov %s1503_s20 }
 0x13c   : > { %s1899_s20 = smov %s1603_s6  ;;  %s1900_s21 = smov %s1511_s22 }
 0x13d   : > { %s1901_s22 = smov %s1903_s26  ;;  %17 = sbr.rel (!%p15_p3) target bundleno = 4 (0x4), region = 99 }
 0x142   :  { %1047 = vsyncpa [#allocation3], 1 }
 0x143   :  { %1049 = vsyncpa [#allocation3 + $0x1], 1 }

</bundles_post_ra>
